<compile_context>
chip_gen: v5e
topology: v5e:2x2
jax: 0.10.0
libtpu: 0.0.40
codegen_flags: <defaults>
</compile_context>

<pallas_src>
import jax
import jax.numpy as jnp
from jax.experimental import pallas as pl
from jax.experimental.pallas import tpu as pltpu


# ------------------------------ fused kernel --------------------------------

def _tiny_vgg4_kernel(*refs):
    """Entire TinyVGG_4 forward for one batch tile, fully resident in VMEM."""
    (x_ref,
     t0_ref, cb0_ref, t1_ref, cb1_ref, t2_ref, cb2_ref,
     t3_ref, cb3_ref, t4_ref, cb4_ref, t5_ref, cb5_ref,
     su0_ref, sd0_ref, re0_ref, ro0_ref, ce0_ref, co0_ref,
     su1_ref, sd1_ref, re1_ref, ro1_ref, ce1_ref, co1_ref,
     su2_ref, sd2_ref, re2_ref, ro2_ref, ce2_ref, co2_ref,
     fsel_ref, w1_ref, fb1_ref, w2_ref, fb2_ref,
     o_ref) = refs

    f32 = jnp.float32

    def conv3x3_relu(a, t_ref, b_ref, su_ref, sd_ref):
        # a: (BT*H, W*Cin).  t_ref stacks three banded matrices (one per kernel
        # row kh) along axis 0: (3*W*Cin, W*Cout).  Zero padding along W is
        # baked into the bands; zero padding along H comes from the (batch
        # block-diagonal) shift matrices su/sd (read row h-1 / h+1, zero rows
        # at each sample's borders).
        k = t_ref.shape[0] // 3
        up = jnp.dot(a, t_ref[0:k, :], preferred_element_type=f32)
        mid = jnp.dot(a, t_ref[k:2 * k, :], preferred_element_type=f32)
        dn = jnp.dot(a, t_ref[2 * k:3 * k, :], preferred_element_type=f32)
        y = (jnp.dot(su_ref[...], up, preferred_element_type=f32)
             + mid
             + jnp.dot(sd_ref[...], dn, preferred_element_type=f32)
             + b_ref[...])
        return jnp.maximum(y, 0.0)

    def maxpool2x2(a, re_ref, ro_ref, ce_ref, co_ref):
        # Even/odd row and column selection is linear -> tiny GEMMs (MXU);
        # the 2x2 reduction itself is two elementwise maxima (VPU).
        rows = jnp.maximum(
            jnp.dot(re_ref[...], a, preferred_element_type=f32),
            jnp.dot(ro_ref[...], a, preferred_element_type=f32))
        return jnp.maximum(
            jnp.dot(rows, ce_ref[...], preferred_element_type=f32),
            jnp.dot(rows, co_ref[...], preferred_element_type=f32))

    a = x_ref[...]                                          # (BT*16, 64)

    # conv_block_1
    a = conv3x3_relu(a, t0_ref, cb0_ref, su0_ref, sd0_ref)  # (BT*16, 128)
    a = conv3x3_relu(a, t1_ref, cb1_ref, su0_ref, sd0_ref)  # (BT*16, 128)
    a = maxpool2x2(a, re0_ref, ro0_ref, ce0_ref, co0_ref)   # (BT*8, 64)
    # conv_block_2
    a = conv3x3_relu(a, t2_ref, cb2_ref, su1_ref, sd1_ref)  # (BT*8, 64)
    a = conv3x3_relu(a, t3_ref, cb3_ref, su1_ref, sd1_ref)  # (BT*8, 64)
    a = maxpool2x2(a, re1_ref, ro1_ref, ce1_ref, co1_ref)   # (BT*4, 32)
    # conv_block_3
    a = conv3x3_relu(a, t4_ref, cb4_ref, su2_ref, sd2_ref)  # (BT*4, 32)
    a = conv3x3_relu(a, t5_ref, cb5_ref, su2_ref, sd2_ref)  # (BT*4, 32)
    a = maxpool2x2(a, re2_ref, ro2_ref, ce2_ref, co2_ref)   # (BT*2, 16)

    # classifier: Flatten (PyTorch NCHW order folded into the fc1 row
    # permutation at setup) -> Linear -> ReLU -> Dropout(eval) -> Linear.
    # Per-sample rows of the flattened feature are picked with tiny selection
    # GEMMs so the fc1 GEMMs cover the whole batch tile at once.
    wc3 = a.shape[1]                                        # (w3 * C)
    acc = None
    for hh in range(fsel_ref.shape[0]):                     # h3 iterations
        rows = jnp.dot(fsel_ref[hh], a, preferred_element_type=f32)  # (BT, wc3)
        part = jnp.dot(rows, w1_ref[hh * wc3:(hh + 1) * wc3, :],
                       preferred_element_type=f32)          # (BT, 2560)
        acc = part if acc is None else acc + part
    hcls = jnp.maximum(acc + fb1_ref[...], 0.0)
    # TODO(synk): nn.Dropout(p=0.3) is identity at inference; training-mode dropout not implemented.
    o_ref[...] = (jnp.dot(hcls, w2_ref[...], preferred_element_type=f32)
                  + fb2_ref[...])


# ------------------------- setup-time operand builders -----------------------

def _shift_mats(h, bt):
    """Block-diagonal (per-sample) row shift matrices for H-direction padding."""
    r = jnp.arange(h)
    s_up = (r[:, None] - 1 == r[None, :]).astype(jnp.float32)   # reads row h-1
    s_dn = (r[:, None] + 1 == r[None, :]).astype(jnp.float32)   # reads row h+1
    eye = jnp.eye(bt, dtype=jnp.float32)
    return jnp.kron(eye, s_up), jnp.kron(eye, s_dn)


def _pool_row_mats(h, bt):
    """Block-diagonal even/odd row selectors for 2x2 max-pool."""
    i = jnp.arange(h // 2)[:, None]
    j = jnp.arange(h)[None, :]
    ev = (j == 2 * i).astype(jnp.float32)
    od = (j == 2 * i + 1).astype(jnp.float32)
    eye = jnp.eye(bt, dtype=jnp.float32)
    return jnp.kron(eye, ev), jnp.kron(eye, od)


def _pool_col_mats(w, c):
    src = jnp.arange(w * c)
    dst = jnp.arange((w // 2) * c)
    sw, sc = src // c, src % c
    dw, dc = dst // c, dst % c
    same_c = sc[:, None] == dc[None, :]
    ev = ((sw[:, None] == 2 * dw[None, :]) & same_c).astype(jnp.float32)
    od = ((sw[:, None] == 2 * dw[None, :] + 1) & same_c).astype(jnp.float32)
    return ev, od


def _conv_band_mats(w, width):
    # w: (3, 3, Cin, Cout) -> stacked (3*width*Cin, width*Cout); block kh holds
    # T_kh[w_in*Cin+ci, w_out*Cout+co] = w[kh, w_in-w_out+1, ci, co]
    # (zero outside the 3-wide band == zero padding along W).
    _, _, cin, cout = w.shape
    wi = jnp.arange(width)
    dw = wi[:, None] - wi[None, :] + 1                       # (w_in, w_out)
    valid = ((dw >= 0) & (dw <= 2)).astype(w.dtype)[..., None, None]
    dw_c = jnp.clip(dw, 0, 2)
    bands = []
    for kh in range(3):
        band = w[kh][dw_c] * valid                           # (W, W, Cin, Cout)
        band = jnp.transpose(band, (0, 2, 1, 3)).reshape(width * cin, width * cout)
        bands.append(band)
    return jnp.concatenate(bands, axis=0)


def _flatten_sel_mats(h3, bt):
    # fsel[hh, s, r] = 1 iff r == s*h3 + hh : picks the per-sample row `hh`
    # of the final (sample-major) activation for the fc1 accumulation.
    hh = jnp.arange(h3)[:, None, None]
    s = jnp.arange(bt)[None, :, None]
    r = jnp.arange(bt * h3)[None, None, :]
    return (r == s * h3 + hh).astype(jnp.float32)


def _permute_fc1_rows(w1, h, w, c):
    # PyTorch flattens NCHW -> w1 rows are indexed c*H*W + h*W + w; the kernel
    # flattens in (h, w, c) order, so reorder the rows once at setup time.
    hi = jnp.arange(h)[:, None, None]
    wi = jnp.arange(w)[None, :, None]
    ci = jnp.arange(c)[None, None, :]
    src = (ci * h * w + hi * w + wi).reshape(-1)
    return w1[src, :]


# ------------------------------- model wrapper -------------------------------

def make_tiny_vgg4_forward(params, input_shape, batch, batch_tile=None):
    """Precompute all kernel operands; return a jittable forward(x_nchw)."""
    cin, height, width = input_shape
    c = params["conv0_w"].shape[-1]                # hidden_units
    n_out = params["fc2_w"].shape[-1]

    if batch_tile is None:
        batch_tile = batch if batch <= 8 else 8
    assert batch % batch_tile == 0, "batch must be divisible by batch_tile"
    bt = batch_tile
    n_tiles = batch // bt

    consts = []
    # conv banded weights + row-tiled biases (one pair per conv layer)
    conv_widths = [width, width, width // 2, width // 2, width // 4, width // 4]
    for l, wl in enumerate(conv_widths):
        consts.append(_conv_band_mats(params[f"conv{l}_w"].astype(jnp.float32), wl))
        consts.append(jnp.tile(params[f"conv{l}_b"].astype(jnp.float32), wl).reshape(1, wl * c))
    # per-block structural matrices (batch-block-diag H-shift / pool row
    # selectors, lane-only pool column selectors)
    for hs, ws in [(height, width), (height // 2, width // 2), (height // 4, width // 4)]:
        s_up, s_dn = _shift_mats(hs, bt)
        r_ev, r_od = _pool_row_mats(hs, bt)
        c_ev, c_od = _pool_col_mats(ws, c)
        consts += [s_up, s_dn, r_ev, r_od, c_ev, c_od]
    # classifier: flatten row selectors + fc weights (fc1 rows permuted to the
    # kernel's (h, w, c) flatten order)
    h3, w3 = height // 8, width // 8
    consts.append(_flatten_sel_mats(h3, bt))
    consts.append(_permute_fc1_rows(params["fc1_w"].astype(jnp.float32), h3, w3, c))
    consts.append(params["fc1_b"].astype(jnp.float32).reshape(1, -1))
    consts.append(params["fc2_w"].astype(jnp.float32))
    consts.append(params["fc2_b"].astype(jnp.float32).reshape(1, -1))

    in_specs = [pl.BlockSpec((bt * height, width * cin), lambda i: (i, 0))]

    def _const_spec(op):
        nd = op.ndim
        return pl.BlockSpec(op.shape, lambda i, _nd=nd: (0,) * _nd)

    in_specs += [_const_spec(op) for op in consts]

    fused_call = pl.pallas_call(
        _tiny_vgg4_kernel,
        out_shape=jax.ShapeDtypeStruct((batch, n_out), jnp.float32),
        grid=(n_tiles,),
        in_specs=in_specs,
        out_specs=pl.BlockSpec((bt, n_out), lambda i: (i, 0)),
        compiler_params=pltpu.CompilerParams(
            dimension_semantics=("parallel",)),    # batch tiles split across TCs on v7x
    )

    def forward(x_nchw):
        # NCHW -> stacked (BT*H, W*Cin) row layout: the only per-call glue ops.
        x_rows = jnp.transpose(x_nchw.astype(jnp.float32),
                               (0, 2, 3, 1)).reshape(n_tiles * bt * height,
                                                     width * cin)
        return fused_call(x_rows, *consts)

    return forward


def init_params(key, input_shape, hidden_units, output_shape):
    cin, height, width = input_shape
    flattened = hidden_units * (height // 8) * (width // 8)
    params = {}
    conv_cins = [cin] + [hidden_units] * 5
    keys = jax.random.split(key, 8)
    for idx, ci in enumerate(conv_cins):
        scale = 1.0 / jnp.sqrt(9.0 * ci)
        # NOTE: weights stored as (3, 3, Cin, Cout); real PyTorch weights
        # (Cout, Cin, 3, 3) would need transpose(2, 3, 1, 0) before use.
        params[f"conv{idx}_w"] = scale * jax.random.normal(
            keys[idx], (3, 3, ci, hidden_units), dtype=jnp.float32)
        params[f"conv{idx}_b"] = jnp.zeros((hidden_units,), dtype=jnp.float32)
    params["fc1_w"] = (1.0 / jnp.sqrt(flattened)) * jax.random.normal(
        keys[6], (flattened, 2560), dtype=jnp.float32)
    params["fc1_b"] = jnp.zeros((2560,), dtype=jnp.float32)
    params["fc2_w"] = (1.0 / jnp.sqrt(2560.0)) * jax.random.normal(
        keys[7], (2560, output_shape), dtype=jnp.float32)
    params["fc2_b"] = jnp.zeros((output_shape,), dtype=jnp.float32)
    return params


# --------------------------- pure-JAX reference ------------------------------

def _reference_forward(params, x_nchw):
    hp = jax.lax.Precision.HIGHEST
    x = jnp.transpose(x_nchw, (0, 2, 3, 1)).astype(jnp.float32)   # NHWC

    def conv_relu(x, w, b):
        y = jax.lax.conv_general_dilated(
            x, w, window_strides=(1, 1), padding="SAME",
            dimension_numbers=("NHWC", "HWIO", "NHWC"), precision=hp)
        return jnp.maximum(y + b, 0.0)

    def pool(x):
        b, h, w, c = x.shape
        return jnp.max(x.reshape(b, h // 2, 2, w // 2, 2, c), axis=(2, 4))

    for l in range(6):
        x = conv_relu(x, params[f"conv{l}_w"], params[f"conv{l}_b"])
        if l % 2 == 1:
            x = pool(x)
    b = x.shape[0]
    flat = jnp.transpose(x, (0, 3, 1, 2)).reshape(b, -1)          # NCHW flatten
    h = jnp.maximum(jnp.dot(flat, params["fc1_w"], precision=hp)
                    + params["fc1_b"], 0.0)
    return jnp.dot(h, params["fc2_w"], precision=hp) + params["fc2_b"]


# ----------------------------------- main ------------------------------------

if __name__ == "__main__":
    input_shape = (4, 16, 16)   # (C, H, W) as in the PyTorch module
    hidden_units = 8
    output_shape = 10
    batch = 2

    key = jax.random.PRNGKey(0)
    kx, kp = jax.random.split(key)
    x = jax.random.normal(kx, (batch, *input_shape), dtype=jnp.float32)  # NCHW
    params = init_params(kp, input_shape, hidden_units, output_shape)

    forward = jax.jit(make_tiny_vgg4_forward(params, input_shape, batch))
    out = jax.block_until_ready(forward(x))
    assert out.shape == (batch, output_shape), out.shape

    # correctness check against a pure-JAX reference of the PyTorch module
    ref = jax.block_until_ready(_reference_forward(params, x))
    max_err = float(jnp.max(jnp.abs(out - ref)))
    assert max_err < 3e-2, f"kernel/reference mismatch: max|err|={max_err:.4e}"

    print("KERNEL_OK")
</pallas_src>

<mosaic_0001>
module attributes {stable_mosaic.version = 11 : i64} {
  func.func @_tiny_vgg4_kernel(%arg0: i32, %arg1: memref<32x64xf32, #tpu.memory_space<vmem>>, %arg2: memref<192x128xf32, #tpu.memory_space<vmem>>, %arg3: memref<1x128xf32, #tpu.memory_space<vmem>>, %arg4: memref<384x128xf32, #tpu.memory_space<vmem>>, %arg5: memref<1x128xf32, #tpu.memory_space<vmem>>, %arg6: memref<192x64xf32, #tpu.memory_space<vmem>>, %arg7: memref<1x64xf32, #tpu.memory_space<vmem>>, %arg8: memref<192x64xf32, #tpu.memory_space<vmem>>, %arg9: memref<1x64xf32, #tpu.memory_space<vmem>>, %arg10: memref<96x32xf32, #tpu.memory_space<vmem>>, %arg11: memref<1x32xf32, #tpu.memory_space<vmem>>, %arg12: memref<96x32xf32, #tpu.memory_space<vmem>>, %arg13: memref<1x32xf32, #tpu.memory_space<vmem>>, %arg14: memref<32x32xf32, #tpu.memory_space<vmem>>, %arg15: memref<32x32xf32, #tpu.memory_space<vmem>>, %arg16: memref<16x32xf32, #tpu.memory_space<vmem>>, %arg17: memref<16x32xf32, #tpu.memory_space<vmem>>, %arg18: memref<128x64xf32, #tpu.memory_space<vmem>>, %arg19: memref<128x64xf32, #tpu.memory_space<vmem>>, %arg20: memref<16x16xf32, #tpu.memory_space<vmem>>, %arg21: memref<16x16xf32, #tpu.memory_space<vmem>>, %arg22: memref<8x16xf32, #tpu.memory_space<vmem>>, %arg23: memref<8x16xf32, #tpu.memory_space<vmem>>, %arg24: memref<64x32xf32, #tpu.memory_space<vmem>>, %arg25: memref<64x32xf32, #tpu.memory_space<vmem>>, %arg26: memref<8x8xf32, #tpu.memory_space<vmem>>, %arg27: memref<8x8xf32, #tpu.memory_space<vmem>>, %arg28: memref<4x8xf32, #tpu.memory_space<vmem>>, %arg29: memref<4x8xf32, #tpu.memory_space<vmem>>, %arg30: memref<32x16xf32, #tpu.memory_space<vmem>>, %arg31: memref<32x16xf32, #tpu.memory_space<vmem>>, %arg32: memref<2x2x4xf32, #tpu.memory_space<vmem>>, %arg33: memref<32x2560xf32, #tpu.memory_space<vmem>>, %arg34: memref<1x2560xf32, #tpu.memory_space<vmem>>, %arg35: memref<2560x10xf32, #tpu.memory_space<vmem>>, %arg36: memref<1x10xf32, #tpu.memory_space<vmem>>, %arg37: memref<2x10xf32, #tpu.memory_space<vmem>>) attributes {dimension_semantics = [#tpu.dimension_semantics<parallel>], iteration_bounds = array<i64: 1>, scalar_prefetch = 0 : i64, scratch_operands = 0 : i64, tpu.core_type = #tpu.core_type<tc>, window_params = [{transform_indices = @transform_0, window_bounds = array<i64: 32, 64>}, {pipeline_mode = #tpu.pipeline_mode<synchronous>, transform_indices = @transform_1, window_bounds = array<i64: 192, 128>}, {pipeline_mode = #tpu.pipeline_mode<synchronous>, transform_indices = @transform_2, window_bounds = array<i64: 1, 128>}, {pipeline_mode = #tpu.pipeline_mode<synchronous>, transform_indices = @transform_3, window_bounds = array<i64: 384, 128>}, {pipeline_mode = #tpu.pipeline_mode<synchronous>, transform_indices = @transform_4, window_bounds = array<i64: 1, 128>}, {pipeline_mode = #tpu.pipeline_mode<synchronous>, transform_indices = @transform_5, window_bounds = array<i64: 192, 64>}, {pipeline_mode = #tpu.pipeline_mode<synchronous>, transform_indices = @transform_6, window_bounds = array<i64: 1, 64>}, {pipeline_mode = #tpu.pipeline_mode<synchronous>, transform_indices = @transform_7, window_bounds = array<i64: 192, 64>}, {pipeline_mode = #tpu.pipeline_mode<synchronous>, transform_indices = @transform_8, window_bounds = array<i64: 1, 64>}, {pipeline_mode = #tpu.pipeline_mode<synchronous>, transform_indices = @transform_9, window_bounds = array<i64: 96, 32>}, {pipeline_mode = #tpu.pipeline_mode<synchronous>, transform_indices = @transform_10, window_bounds = array<i64: 1, 32>}, {pipeline_mode = #tpu.pipeline_mode<synchronous>, transform_indices = @transform_11, window_bounds = array<i64: 96, 32>}, {pipeline_mode = #tpu.pipeline_mode<synchronous>, transform_indices = @transform_12, window_bounds = array<i64: 1, 32>}, {pipeline_mode = #tpu.pipeline_mode<synchronous>, transform_indices = @transform_13, window_bounds = array<i64: 32, 32>}, {pipeline_mode = #tpu.pipeline_mode<synchronous>, transform_indices = @transform_14, window_bounds = array<i64: 32, 32>}, {pipeline_mode = #tpu.pipeline_mode<synchronous>, transform_indices = @transform_15, window_bounds = array<i64: 16, 32>}, {pipeline_mode = #tpu.pipeline_mode<synchronous>, transform_indices = @transform_16, window_bounds = array<i64: 16, 32>}, {pipeline_mode = #tpu.pipeline_mode<synchronous>, transform_indices = @transform_17, window_bounds = array<i64: 128, 64>}, {pipeline_mode = #tpu.pipeline_mode<synchronous>, transform_indices = @transform_18, window_bounds = array<i64: 128, 64>}, {pipeline_mode = #tpu.pipeline_mode<synchronous>, transform_indices = @transform_19, window_bounds = array<i64: 16, 16>}, {pipeline_mode = #tpu.pipeline_mode<synchronous>, transform_indices = @transform_20, window_bounds = array<i64: 16, 16>}, {pipeline_mode = #tpu.pipeline_mode<synchronous>, transform_indices = @transform_21, window_bounds = array<i64: 8, 16>}, {pipeline_mode = #tpu.pipeline_mode<synchronous>, transform_indices = @transform_22, window_bounds = array<i64: 8, 16>}, {pipeline_mode = #tpu.pipeline_mode<synchronous>, transform_indices = @transform_23, window_bounds = array<i64: 64, 32>}, {pipeline_mode = #tpu.pipeline_mode<synchronous>, transform_indices = @transform_24, window_bounds = array<i64: 64, 32>}, {pipeline_mode = #tpu.pipeline_mode<synchronous>, transform_indices = @transform_25, window_bounds = array<i64: 8, 8>}, {pipeline_mode = #tpu.pipeline_mode<synchronous>, transform_indices = @transform_26, window_bounds = array<i64: 8, 8>}, {pipeline_mode = #tpu.pipeline_mode<synchronous>, transform_indices = @transform_27, window_bounds = array<i64: 4, 8>}, {pipeline_mode = #tpu.pipeline_mode<synchronous>, transform_indices = @transform_28, window_bounds = array<i64: 4, 8>}, {pipeline_mode = #tpu.pipeline_mode<synchronous>, transform_indices = @transform_29, window_bounds = array<i64: 32, 16>}, {pipeline_mode = #tpu.pipeline_mode<synchronous>, transform_indices = @transform_30, window_bounds = array<i64: 32, 16>}, {pipeline_mode = #tpu.pipeline_mode<synchronous>, transform_indices = @transform_31, window_bounds = array<i64: 2, 2, 4>}, {pipeline_mode = #tpu.pipeline_mode<synchronous>, transform_indices = @transform_32, window_bounds = array<i64: 32, 2560>}, {pipeline_mode = #tpu.pipeline_mode<synchronous>, transform_indices = @transform_33, window_bounds = array<i64: 1, 2560>}, {pipeline_mode = #tpu.pipeline_mode<synchronous>, transform_indices = @transform_34, window_bounds = array<i64: 2560, 10>}, {pipeline_mode = #tpu.pipeline_mode<synchronous>, transform_indices = @transform_35, window_bounds = array<i64: 1, 10>}, {transform_indices = @transform_36, window_bounds = array<i64: 2, 10>}]} {
    %c0 = arith.constant 0 : index
    %c0_0 = arith.constant 0 : index
    %0 = vector.load %arg1[%c0, %c0_0] : memref<32x64xf32, #tpu.memory_space<vmem>>, vector<32x64xf32>
    %c0_1 = arith.constant 0 : index
    %c0_2 = arith.constant 0 : index
    %1 = vector.load %arg2[%c0_1, %c0_2] : memref<192x128xf32, #tpu.memory_space<vmem>>, vector<64x128xf32>
    %cst = arith.constant dense<0.000000e+00> : vector<32x128xf32>
    %2 = tpu.matmul %0, %1, %cst {dimension_numbers = #tpu.dot_dimension_numbers<[1], [0], [0], [1], [0, 0, 1, 1], [], []>} : vector<32x64xf32>, vector<64x128xf32>, vector<32x128xf32> -> vector<32x128xf32>
    %c64 = arith.constant 64 : index
    %c0_3 = arith.constant 0 : index
    %3 = vector.load %arg2[%c64, %c0_3] : memref<192x128xf32, #tpu.memory_space<vmem>>, vector<64x128xf32>
    %cst_4 = arith.constant dense<0.000000e+00> : vector<32x128xf32>
    %4 = tpu.matmul %0, %3, %cst_4 {dimension_numbers = #tpu.dot_dimension_numbers<[1], [0], [0], [1], [0, 0, 1, 1], [], []>} : vector<32x64xf32>, vector<64x128xf32>, vector<32x128xf32> -> vector<32x128xf32>
    %c128 = arith.constant 128 : index
    %c0_5 = arith.constant 0 : index
    %5 = vector.load %arg2[%c128, %c0_5] : memref<192x128xf32, #tpu.memory_space<vmem>>, vector<64x128xf32>
    %cst_6 = arith.constant dense<0.000000e+00> : vector<32x128xf32>
    %6 = tpu.matmul %0, %5, %cst_6 {dimension_numbers = #tpu.dot_dimension_numbers<[1], [0], [0], [1], [0, 0, 1, 1], [], []>} : vector<32x64xf32>, vector<64x128xf32>, vector<32x128xf32> -> vector<32x128xf32>
    %c0_7 = arith.constant 0 : index
    %c0_8 = arith.constant 0 : index
    %7 = vector.load %arg14[%c0_7, %c0_8] : memref<32x32xf32, #tpu.memory_space<vmem>>, vector<32x32xf32>
    %cst_9 = arith.constant dense<0.000000e+00> : vector<32x128xf32>
    %8 = tpu.matmul %7, %2, %cst_9 {dimension_numbers = #tpu.dot_dimension_numbers<[1], [0], [0], [1], [0, 0, 1, 1], [], []>} : vector<32x32xf32>, vector<32x128xf32>, vector<32x128xf32> -> vector<32x128xf32>
    %9 = arith.addf %8, %4 : vector<32x128xf32>
    %c0_10 = arith.constant 0 : index
    %c0_11 = arith.constant 0 : index
    %10 = vector.load %arg15[%c0_10, %c0_11] : memref<32x32xf32, #tpu.memory_space<vmem>>, vector<32x32xf32>
    %cst_12 = arith.constant dense<0.000000e+00> : vector<32x128xf32>
    %11 = tpu.matmul %10, %6, %cst_12 {dimension_numbers = #tpu.dot_dimension_numbers<[1], [0], [0], [1], [0, 0, 1, 1], [], []>} : vector<32x32xf32>, vector<32x128xf32>, vector<32x128xf32> -> vector<32x128xf32>
    %12 = arith.addf %9, %11 : vector<32x128xf32>
    %c0_13 = arith.constant 0 : index
    %c0_14 = arith.constant 0 : index
    %13 = vector.load %arg3[%c0_13, %c0_14] : memref<1x128xf32, #tpu.memory_space<vmem>>, vector<1x128xf32>
    %14 = vector.broadcast %13 : vector<1x128xf32> to vector<32x128xf32>
    %15 = arith.addf %12, %14 : vector<32x128xf32>
    %cst_15 = arith.constant 0.000000e+00 : f32
    %16 = vector.broadcast %cst_15 : f32 to vector<32x128xf32>
    %17 = arith.maximumf %15, %16 : vector<32x128xf32>
    %c0_16 = arith.constant 0 : index
    %c0_17 = arith.constant 0 : index
    %18 = vector.load %arg4[%c0_16, %c0_17] : memref<384x128xf32, #tpu.memory_space<vmem>>, vector<128x128xf32>
    %cst_18 = arith.constant dense<0.000000e+00> : vector<32x128xf32>
    %19 = tpu.matmul %17, %18, %cst_18 {dimension_numbers = #tpu.dot_dimension_numbers<[1], [0], [0], [1], [0, 0, 1, 1], [], []>} : vector<32x128xf32>, vector<128x128xf32>, vector<32x128xf32> -> vector<32x128xf32>
    %c128_19 = arith.constant 128 : index
    %c0_20 = arith.constant 0 : index
    %20 = vector.load %arg4[%c128_19, %c0_20] : memref<384x128xf32, #tpu.memory_space<vmem>>, vector<128x128xf32>
    %cst_21 = arith.constant dense<0.000000e+00> : vector<32x128xf32>
    %21 = tpu.matmul %17, %20, %cst_21 {dimension_numbers = #tpu.dot_dimension_numbers<[1], [0], [0], [1], [0, 0, 1, 1], [], []>} : vector<32x128xf32>, vector<128x128xf32>, vector<32x128xf32> -> vector<32x128xf32>
    %c256 = arith.constant 256 : index
    %c0_22 = arith.constant 0 : index
    %22 = vector.load %arg4[%c256, %c0_22] : memref<384x128xf32, #tpu.memory_space<vmem>>, vector<128x128xf32>
    %cst_23 = arith.constant dense<0.000000e+00> : vector<32x128xf32>
    %23 = tpu.matmul %17, %22, %cst_23 {dimension_numbers = #tpu.dot_dimension_numbers<[1], [0], [0], [1], [0, 0, 1, 1], [], []>} : vector<32x128xf32>, vector<128x128xf32>, vector<32x128xf32> -> vector<32x128xf32>
    %c0_24 = arith.constant 0 : index
    %c0_25 = arith.constant 0 : index
    %24 = vector.load %arg14[%c0_24, %c0_25] : memref<32x32xf32, #tpu.memory_space<vmem>>, vector<32x32xf32>
    %cst_26 = arith.constant dense<0.000000e+00> : vector<32x128xf32>
    %25 = tpu.matmul %24, %19, %cst_26 {dimension_numbers = #tpu.dot_dimension_numbers<[1], [0], [0], [1], [0, 0, 1, 1], [], []>} : vector<32x32xf32>, vector<32x128xf32>, vector<32x128xf32> -> vector<32x128xf32>
    %26 = arith.addf %25, %21 : vector<32x128xf32>
    %c0_27 = arith.constant 0 : index
    %c0_28 = arith.constant 0 : index
    %27 = vector.load %arg15[%c0_27, %c0_28] : memref<32x32xf32, #tpu.memory_space<vmem>>, vector<32x32xf32>
    %cst_29 = arith.constant dense<0.000000e+00> : vector<32x128xf32>
    %28 = tpu.matmul %27, %23, %cst_29 {dimension_numbers = #tpu.dot_dimension_numbers<[1], [0], [0], [1], [0, 0, 1, 1], [], []>} : vector<32x32xf32>, vector<32x128xf32>, vector<32x128xf32> -> vector<32x128xf32>
    %29 = arith.addf %26, %28 : vector<32x128xf32>
    %c0_30 = arith.constant 0 : index
    %c0_31 = arith.constant 0 : index
    %30 = vector.load %arg5[%c0_30, %c0_31] : memref<1x128xf32, #tpu.memory_space<vmem>>, vector<1x128xf32>
    %31 = vector.broadcast %30 : vector<1x128xf32> to vector<32x128xf32>
    %32 = arith.addf %29, %31 : vector<32x128xf32>
    %cst_32 = arith.constant 0.000000e+00 : f32
    %33 = vector.broadcast %cst_32 : f32 to vector<32x128xf32>
    %34 = arith.maximumf %32, %33 : vector<32x128xf32>
    %c0_33 = arith.constant 0 : index
    %c0_34 = arith.constant 0 : index
    %35 = vector.load %arg16[%c0_33, %c0_34] : memref<16x32xf32, #tpu.memory_space<vmem>>, vector<16x32xf32>
    %cst_35 = arith.constant dense<0.000000e+00> : vector<16x128xf32>
    %36 = tpu.matmul %35, %34, %cst_35 {dimension_numbers = #tpu.dot_dimension_numbers<[1], [0], [0], [1], [0, 0, 1, 1], [], []>} : vector<16x32xf32>, vector<32x128xf32>, vector<16x128xf32> -> vector<16x128xf32>
    %c0_36 = arith.constant 0 : index
    %c0_37 = arith.constant 0 : index
    %37 = vector.load %arg17[%c0_36, %c0_37] : memref<16x32xf32, #tpu.memory_space<vmem>>, vector<16x32xf32>
    %cst_38 = arith.constant dense<0.000000e+00> : vector<16x128xf32>
    %38 = tpu.matmul %37, %34, %cst_38 {dimension_numbers = #tpu.dot_dimension_numbers<[1], [0], [0], [1], [0, 0, 1, 1], [], []>} : vector<16x32xf32>, vector<32x128xf32>, vector<16x128xf32> -> vector<16x128xf32>
    %39 = arith.maximumf %36, %38 : vector<16x128xf32>
    %c0_39 = arith.constant 0 : index
    %c0_40 = arith.constant 0 : index
    %40 = vector.load %arg18[%c0_39, %c0_40] : memref<128x64xf32, #tpu.memory_space<vmem>>, vector<128x64xf32>
    %cst_41 = arith.constant dense<0.000000e+00> : vector<16x64xf32>
    %41 = tpu.matmul %39, %40, %cst_41 {dimension_numbers = #tpu.dot_dimension_numbers<[1], [0], [0], [1], [0, 0, 1, 1], [], []>} : vector<16x128xf32>, vector<128x64xf32>, vector<16x64xf32> -> vector<16x64xf32>
    %c0_42 = arith.constant 0 : index
    %c0_43 = arith.constant 0 : index
    %42 = vector.load %arg19[%c0_42, %c0_43] : memref<128x64xf32, #tpu.memory_space<vmem>>, vector<128x64xf32>
    %cst_44 = arith.constant dense<0.000000e+00> : vector<16x64xf32>
    %43 = tpu.matmul %39, %42, %cst_44 {dimension_numbers = #tpu.dot_dimension_numbers<[1], [0], [0], [1], [0, 0, 1, 1], [], []>} : vector<16x128xf32>, vector<128x64xf32>, vector<16x64xf32> -> vector<16x64xf32>
    %44 = arith.maximumf %41, %43 : vector<16x64xf32>
    %c0_45 = arith.constant 0 : index
    %c0_46 = arith.constant 0 : index
    %45 = vector.load %arg6[%c0_45, %c0_46] : memref<192x64xf32, #tpu.memory_space<vmem>>, vector<64x64xf32>
    %cst_47 = arith.constant dense<0.000000e+00> : vector<16x64xf32>
    %46 = tpu.matmul %44, %45, %cst_47 {dimension_numbers = #tpu.dot_dimension_numbers<[1], [0], [0], [1], [0, 0, 1, 1], [], []>} : vector<16x64xf32>, vector<64x64xf32>, vector<16x64xf32> -> vector<16x64xf32>
    %c64_48 = arith.constant 64 : index
    %c0_49 = arith.constant 0 : index
    %47 = vector.load %arg6[%c64_48, %c0_49] : memref<192x64xf32, #tpu.memory_space<vmem>>, vector<64x64xf32>
    %cst_50 = arith.constant dense<0.000000e+00> : vector<16x64xf32>
    %48 = tpu.matmul %44, %47, %cst_50 {dimension_numbers = #tpu.dot_dimension_numbers<[1], [0], [0], [1], [0, 0, 1, 1], [], []>} : vector<16x64xf32>, vector<64x64xf32>, vector<16x64xf32> -> vector<16x64xf32>
    %c128_51 = arith.constant 128 : index
    %c0_52 = arith.constant 0 : index
    %49 = vector.load %arg6[%c128_51, %c0_52] : memref<192x64xf32, #tpu.memory_space<vmem>>, vector<64x64xf32>
    %cst_53 = arith.constant dense<0.000000e+00> : vector<16x64xf32>
    %50 = tpu.matmul %44, %49, %cst_53 {dimension_numbers = #tpu.dot_dimension_numbers<[1], [0], [0], [1], [0, 0, 1, 1], [], []>} : vector<16x64xf32>, vector<64x64xf32>, vector<16x64xf32> -> vector<16x64xf32>
    %c0_54 = arith.constant 0 : index
    %c0_55 = arith.constant 0 : index
    %51 = vector.load %arg20[%c0_54, %c0_55] : memref<16x16xf32, #tpu.memory_space<vmem>>, vector<16x16xf32>
    %cst_56 = arith.constant dense<0.000000e+00> : vector<16x64xf32>
    %52 = tpu.matmul %51, %46, %cst_56 {dimension_numbers = #tpu.dot_dimension_numbers<[1], [0], [0], [1], [0, 0, 1, 1], [], []>} : vector<16x16xf32>, vector<16x64xf32>, vector<16x64xf32> -> vector<16x64xf32>
    %53 = arith.addf %52, %48 : vector<16x64xf32>
    %c0_57 = arith.constant 0 : index
    %c0_58 = arith.constant 0 : index
    %54 = vector.load %arg21[%c0_57, %c0_58] : memref<16x16xf32, #tpu.memory_space<vmem>>, vector<16x16xf32>
    %cst_59 = arith.constant dense<0.000000e+00> : vector<16x64xf32>
    %55 = tpu.matmul %54, %50, %cst_59 {dimension_numbers = #tpu.dot_dimension_numbers<[1], [0], [0], [1], [0, 0, 1, 1], [], []>} : vector<16x16xf32>, vector<16x64xf32>, vector<16x64xf32> -> vector<16x64xf32>
    %56 = arith.addf %53, %55 : vector<16x64xf32>
    %c0_60 = arith.constant 0 : index
    %c0_61 = arith.constant 0 : index
    %57 = vector.load %arg7[%c0_60, %c0_61] : memref<1x64xf32, #tpu.memory_space<vmem>>, vector<1x64xf32>
    %58 = vector.broadcast %57 : vector<1x64xf32> to vector<16x64xf32>
    %59 = arith.addf %56, %58 : vector<16x64xf32>
    %cst_62 = arith.constant 0.000000e+00 : f32
    %60 = vector.broadcast %cst_62 : f32 to vector<16x64xf32>
    %61 = arith.maximumf %59, %60 : vector<16x64xf32>
    %c0_63 = arith.constant 0 : index
    %c0_64 = arith.constant 0 : index
    %62 = vector.load %arg8[%c0_63, %c0_64] : memref<192x64xf32, #tpu.memory_space<vmem>>, vector<64x64xf32>
    %cst_65 = arith.constant dense<0.000000e+00> : vector<16x64xf32>
    %63 = tpu.matmul %61, %62, %cst_65 {dimension_numbers = #tpu.dot_dimension_numbers<[1], [0], [0], [1], [0, 0, 1, 1], [], []>} : vector<16x64xf32>, vector<64x64xf32>, vector<16x64xf32> -> vector<16x64xf32>
    %c64_66 = arith.constant 64 : index
    %c0_67 = arith.constant 0 : index
    %64 = vector.load %arg8[%c64_66, %c0_67] : memref<192x64xf32, #tpu.memory_space<vmem>>, vector<64x64xf32>
    %cst_68 = arith.constant dense<0.000000e+00> : vector<16x64xf32>
    %65 = tpu.matmul %61, %64, %cst_68 {dimension_numbers = #tpu.dot_dimension_numbers<[1], [0], [0], [1], [0, 0, 1, 1], [], []>} : vector<16x64xf32>, vector<64x64xf32>, vector<16x64xf32> -> vector<16x64xf32>
    %c128_69 = arith.constant 128 : index
    %c0_70 = arith.constant 0 : index
    %66 = vector.load %arg8[%c128_69, %c0_70] : memref<192x64xf32, #tpu.memory_space<vmem>>, vector<64x64xf32>
    %cst_71 = arith.constant dense<0.000000e+00> : vector<16x64xf32>
    %67 = tpu.matmul %61, %66, %cst_71 {dimension_numbers = #tpu.dot_dimension_numbers<[1], [0], [0], [1], [0, 0, 1, 1], [], []>} : vector<16x64xf32>, vector<64x64xf32>, vector<16x64xf32> -> vector<16x64xf32>
    %c0_72 = arith.constant 0 : index
    %c0_73 = arith.constant 0 : index
    %68 = vector.load %arg20[%c0_72, %c0_73] : memref<16x16xf32, #tpu.memory_space<vmem>>, vector<16x16xf32>
    %cst_74 = arith.constant dense<0.000000e+00> : vector<16x64xf32>
    %69 = tpu.matmul %68, %63, %cst_74 {dimension_numbers = #tpu.dot_dimension_numbers<[1], [0], [0], [1], [0, 0, 1, 1], [], []>} : vector<16x16xf32>, vector<16x64xf32>, vector<16x64xf32> -> vector<16x64xf32>
    %70 = arith.addf %69, %65 : vector<16x64xf32>
    %c0_75 = arith.constant 0 : index
    %c0_76 = arith.constant 0 : index
    %71 = vector.load %arg21[%c0_75, %c0_76] : memref<16x16xf32, #tpu.memory_space<vmem>>, vector<16x16xf32>
    %cst_77 = arith.constant dense<0.000000e+00> : vector<16x64xf32>
    %72 = tpu.matmul %71, %67, %cst_77 {dimension_numbers = #tpu.dot_dimension_numbers<[1], [0], [0], [1], [0, 0, 1, 1], [], []>} : vector<16x16xf32>, vector<16x64xf32>, vector<16x64xf32> -> vector<16x64xf32>
    %73 = arith.addf %70, %72 : vector<16x64xf32>
    %c0_78 = arith.constant 0 : index
    %c0_79 = arith.constant 0 : index
    %74 = vector.load %arg9[%c0_78, %c0_79] : memref<1x64xf32, #tpu.memory_space<vmem>>, vector<1x64xf32>
    %75 = vector.broadcast %74 : vector<1x64xf32> to vector<16x64xf32>
    %76 = arith.addf %73, %75 : vector<16x64xf32>
    %cst_80 = arith.constant 0.000000e+00 : f32
    %77 = vector.broadcast %cst_80 : f32 to vector<16x64xf32>
    %78 = arith.maximumf %76, %77 : vector<16x64xf32>
    %c0_81 = arith.constant 0 : index
    %c0_82 = arith.constant 0 : index
    %79 = vector.load %arg22[%c0_81, %c0_82] : memref<8x16xf32, #tpu.memory_space<vmem>>, vector<8x16xf32>
    %cst_83 = arith.constant dense<0.000000e+00> : vector<8x64xf32>
    %80 = tpu.matmul %79, %78, %cst_83 {dimension_numbers = #tpu.dot_dimension_numbers<[1], [0], [0], [1], [0, 0, 1, 1], [], []>} : vector<8x16xf32>, vector<16x64xf32>, vector<8x64xf32> -> vector<8x64xf32>
    %c0_84 = arith.constant 0 : index
    %c0_85 = arith.constant 0 : index
    %81 = vector.load %arg23[%c0_84, %c0_85] : memref<8x16xf32, #tpu.memory_space<vmem>>, vector<8x16xf32>
    %cst_86 = arith.constant dense<0.000000e+00> : vector<8x64xf32>
    %82 = tpu.matmul %81, %78, %cst_86 {dimension_numbers = #tpu.dot_dimension_numbers<[1], [0], [0], [1], [0, 0, 1, 1], [], []>} : vector<8x16xf32>, vector<16x64xf32>, vector<8x64xf32> -> vector<8x64xf32>
    %83 = arith.maximumf %80, %82 : vector<8x64xf32>
    %c0_87 = arith.constant 0 : index
    %c0_88 = arith.constant 0 : index
    %84 = vector.load %arg24[%c0_87, %c0_88] : memref<64x32xf32, #tpu.memory_space<vmem>>, vector<64x32xf32>
    %cst_89 = arith.constant dense<0.000000e+00> : vector<8x32xf32>
    %85 = tpu.matmul %83, %84, %cst_89 {dimension_numbers = #tpu.dot_dimension_numbers<[1], [0], [0], [1], [0, 0, 1, 1], [], []>} : vector<8x64xf32>, vector<64x32xf32>, vector<8x32xf32> -> vector<8x32xf32>
    %c0_90 = arith.constant 0 : index
    %c0_91 = arith.constant 0 : index
    %86 = vector.load %arg25[%c0_90, %c0_91] : memref<64x32xf32, #tpu.memory_space<vmem>>, vector<64x32xf32>
    %cst_92 = arith.constant dense<0.000000e+00> : vector<8x32xf32>
    %87 = tpu.matmul %83, %86, %cst_92 {dimension_numbers = #tpu.dot_dimension_numbers<[1], [0], [0], [1], [0, 0, 1, 1], [], []>} : vector<8x64xf32>, vector<64x32xf32>, vector<8x32xf32> -> vector<8x32xf32>
    %88 = arith.maximumf %85, %87 : vector<8x32xf32>
    %c0_93 = arith.constant 0 : index
    %c0_94 = arith.constant 0 : index
    %89 = vector.load %arg10[%c0_93, %c0_94] : memref<96x32xf32, #tpu.memory_space<vmem>>, vector<32x32xf32>
    %cst_95 = arith.constant dense<0.000000e+00> : vector<8x32xf32>
    %90 = tpu.matmul %88, %89, %cst_95 {dimension_numbers = #tpu.dot_dimension_numbers<[1], [0], [0], [1], [0, 0, 1, 1], [], []>} : vector<8x32xf32>, vector<32x32xf32>, vector<8x32xf32> -> vector<8x32xf32>
    %c32 = arith.constant 32 : index
    %c0_96 = arith.constant 0 : index
    %91 = vector.load %arg10[%c32, %c0_96] : memref<96x32xf32, #tpu.memory_space<vmem>>, vector<32x32xf32>
    %cst_97 = arith.constant dense<0.000000e+00> : vector<8x32xf32>
    %92 = tpu.matmul %88, %91, %cst_97 {dimension_numbers = #tpu.dot_dimension_numbers<[1], [0], [0], [1], [0, 0, 1, 1], [], []>} : vector<8x32xf32>, vector<32x32xf32>, vector<8x32xf32> -> vector<8x32xf32>
    %c64_98 = arith.constant 64 : index
    %c0_99 = arith.constant 0 : index
    %93 = vector.load %arg10[%c64_98, %c0_99] : memref<96x32xf32, #tpu.memory_space<vmem>>, vector<32x32xf32>
    %cst_100 = arith.constant dense<0.000000e+00> : vector<8x32xf32>
    %94 = tpu.matmul %88, %93, %cst_100 {dimension_numbers = #tpu.dot_dimension_numbers<[1], [0], [0], [1], [0, 0, 1, 1], [], []>} : vector<8x32xf32>, vector<32x32xf32>, vector<8x32xf32> -> vector<8x32xf32>
    %c0_101 = arith.constant 0 : index
    %c0_102 = arith.constant 0 : index
    %95 = vector.load %arg26[%c0_101, %c0_102] : memref<8x8xf32, #tpu.memory_space<vmem>>, vector<8x8xf32>
    %cst_103 = arith.constant dense<0.000000e+00> : vector<8x32xf32>
    %96 = tpu.matmul %95, %90, %cst_103 {dimension_numbers = #tpu.dot_dimension_numbers<[1], [0], [0], [1], [0, 0, 1, 1], [], []>} : vector<8x8xf32>, vector<8x32xf32>, vector<8x32xf32> -> vector<8x32xf32>
    %97 = arith.addf %96, %92 : vector<8x32xf32>
    %c0_104 = arith.constant 0 : index
    %c0_105 = arith.constant 0 : index
    %98 = vector.load %arg27[%c0_104, %c0_105] : memref<8x8xf32, #tpu.memory_space<vmem>>, vector<8x8xf32>
    %cst_106 = arith.constant dense<0.000000e+00> : vector<8x32xf32>
    %99 = tpu.matmul %98, %94, %cst_106 {dimension_numbers = #tpu.dot_dimension_numbers<[1], [0], [0], [1], [0, 0, 1, 1], [], []>} : vector<8x8xf32>, vector<8x32xf32>, vector<8x32xf32> -> vector<8x32xf32>
    %100 = arith.addf %97, %99 : vector<8x32xf32>
    %c0_107 = arith.constant 0 : index
    %c0_108 = arith.constant 0 : index
    %101 = vector.load %arg11[%c0_107, %c0_108] : memref<1x32xf32, #tpu.memory_space<vmem>>, vector<1x32xf32>
    %102 = vector.broadcast %101 : vector<1x32xf32> to vector<8x32xf32>
    %103 = arith.addf %100, %102 : vector<8x32xf32>
    %cst_109 = arith.constant 0.000000e+00 : f32
    %104 = vector.broadcast %cst_109 : f32 to vector<8x32xf32>
    %105 = arith.maximumf %103, %104 : vector<8x32xf32>
    %c0_110 = arith.constant 0 : index
    %c0_111 = arith.constant 0 : index
    %106 = vector.load %arg12[%c0_110, %c0_111] : memref<96x32xf32, #tpu.memory_space<vmem>>, vector<32x32xf32>
    %cst_112 = arith.constant dense<0.000000e+00> : vector<8x32xf32>
    %107 = tpu.matmul %105, %106, %cst_112 {dimension_numbers = #tpu.dot_dimension_numbers<[1], [0], [0], [1], [0, 0, 1, 1], [], []>} : vector<8x32xf32>, vector<32x32xf32>, vector<8x32xf32> -> vector<8x32xf32>
    %c32_113 = arith.constant 32 : index
    %c0_114 = arith.constant 0 : index
    %108 = vector.load %arg12[%c32_113, %c0_114] : memref<96x32xf32, #tpu.memory_space<vmem>>, vector<32x32xf32>
    %cst_115 = arith.constant dense<0.000000e+00> : vector<8x32xf32>
    %109 = tpu.matmul %105, %108, %cst_115 {dimension_numbers = #tpu.dot_dimension_numbers<[1], [0], [0], [1], [0, 0, 1, 1], [], []>} : vector<8x32xf32>, vector<32x32xf32>, vector<8x32xf32> -> vector<8x32xf32>
    %c64_116 = arith.constant 64 : index
    %c0_117 = arith.constant 0 : index
    %110 = vector.load %arg12[%c64_116, %c0_117] : memref<96x32xf32, #tpu.memory_space<vmem>>, vector<32x32xf32>
    %cst_118 = arith.constant dense<0.000000e+00> : vector<8x32xf32>
    %111 = tpu.matmul %105, %110, %cst_118 {dimension_numbers = #tpu.dot_dimension_numbers<[1], [0], [0], [1], [0, 0, 1, 1], [], []>} : vector<8x32xf32>, vector<32x32xf32>, vector<8x32xf32> -> vector<8x32xf32>
    %c0_119 = arith.constant 0 : index
    %c0_120 = arith.constant 0 : index
    %112 = vector.load %arg26[%c0_119, %c0_120] : memref<8x8xf32, #tpu.memory_space<vmem>>, vector<8x8xf32>
    %cst_121 = arith.constant dense<0.000000e+00> : vector<8x32xf32>
    %113 = tpu.matmul %112, %107, %cst_121 {dimension_numbers = #tpu.dot_dimension_numbers<[1], [0], [0], [1], [0, 0, 1, 1], [], []>} : vector<8x8xf32>, vector<8x32xf32>, vector<8x32xf32> -> vector<8x32xf32>
    %114 = arith.addf %113, %109 : vector<8x32xf32>
    %c0_122 = arith.constant 0 : index
    %c0_123 = arith.constant 0 : index
    %115 = vector.load %arg27[%c0_122, %c0_123] : memref<8x8xf32, #tpu.memory_space<vmem>>, vector<8x8xf32>
    %cst_124 = arith.constant dense<0.000000e+00> : vector<8x32xf32>
    %116 = tpu.matmul %115, %111, %cst_124 {dimension_numbers = #tpu.dot_dimension_numbers<[1], [0], [0], [1], [0, 0, 1, 1], [], []>} : vector<8x8xf32>, vector<8x32xf32>, vector<8x32xf32> -> vector<8x32xf32>
    %117 = arith.addf %114, %116 : vector<8x32xf32>
    %c0_125 = arith.constant 0 : index
    %c0_126 = arith.constant 0 : index
    %118 = vector.load %arg13[%c0_125, %c0_126] : memref<1x32xf32, #tpu.memory_space<vmem>>, vector<1x32xf32>
    %119 = vector.broadcast %118 : vector<1x32xf32> to vector<8x32xf32>
    %120 = arith.addf %117, %119 : vector<8x32xf32>
    %cst_127 = arith.constant 0.000000e+00 : f32
    %121 = vector.broadcast %cst_127 : f32 to vector<8x32xf32>
    %122 = arith.maximumf %120, %121 : vector<8x32xf32>
    %c0_128 = arith.constant 0 : index
    %c0_129 = arith.constant 0 : index
    %123 = vector.load %arg28[%c0_128, %c0_129] : memref<4x8xf32, #tpu.memory_space<vmem>>, vector<4x8xf32>
    %cst_130 = arith.constant dense<0.000000e+00> : vector<4x32xf32>
    %124 = tpu.matmul %123, %122, %cst_130 {dimension_numbers = #tpu.dot_dimension_numbers<[1], [0], [0], [1], [0, 0, 1, 1], [], []>} : vector<4x8xf32>, vector<8x32xf32>, vector<4x32xf32> -> vector<4x32xf32>
    %c0_131 = arith.constant 0 : index
    %c0_132 = arith.constant 0 : index
    %125 = vector.load %arg29[%c0_131, %c0_132] : memref<4x8xf32, #tpu.memory_space<vmem>>, vector<4x8xf32>
    %cst_133 = arith.constant dense<0.000000e+00> : vector<4x32xf32>
    %126 = tpu.matmul %125, %122, %cst_133 {dimension_numbers = #tpu.dot_dimension_numbers<[1], [0], [0], [1], [0, 0, 1, 1], [], []>} : vector<4x8xf32>, vector<8x32xf32>, vector<4x32xf32> -> vector<4x32xf32>
    %127 = arith.maximumf %124, %126 : vector<4x32xf32>
    %c0_134 = arith.constant 0 : index
    %c0_135 = arith.constant 0 : index
    %128 = vector.load %arg30[%c0_134, %c0_135] : memref<32x16xf32, #tpu.memory_space<vmem>>, vector<32x16xf32>
    %cst_136 = arith.constant dense<0.000000e+00> : vector<4x16xf32>
    %129 = tpu.matmul %127, %128, %cst_136 {dimension_numbers = #tpu.dot_dimension_numbers<[1], [0], [0], [1], [0, 0, 1, 1], [], []>} : vector<4x32xf32>, vector<32x16xf32>, vector<4x16xf32> -> vector<4x16xf32>
    %c0_137 = arith.constant 0 : index
    %c0_138 = arith.constant 0 : index
    %130 = vector.load %arg31[%c0_137, %c0_138] : memref<32x16xf32, #tpu.memory_space<vmem>>, vector<32x16xf32>
    %cst_139 = arith.constant dense<0.000000e+00> : vector<4x16xf32>
    %131 = tpu.matmul %127, %130, %cst_139 {dimension_numbers = #tpu.dot_dimension_numbers<[1], [0], [0], [1], [0, 0, 1, 1], [], []>} : vector<4x32xf32>, vector<32x16xf32>, vector<4x16xf32> -> vector<4x16xf32>
    %132 = arith.maximumf %129, %131 : vector<4x16xf32>
    %c0_140 = arith.constant 0 : index
    %c0_141 = arith.constant 0 : index
    %c0_142 = arith.constant 0 : index
    %133 = vector.load %arg32[%c0_140, %c0_141, %c0_142] : memref<2x2x4xf32, #tpu.memory_space<vmem>>, vector<1x2x4xf32>
    %134 = vector.shape_cast %133 : vector<1x2x4xf32> to vector<2x4xf32>
    %cst_143 = arith.constant dense<0.000000e+00> : vector<2x16xf32>
    %135 = tpu.matmul %134, %132, %cst_143 {dimension_numbers = #tpu.dot_dimension_numbers<[1], [0], [0], [1], [0, 0, 1, 1], [], []>} : vector<2x4xf32>, vector<4x16xf32>, vector<2x16xf32> -> vector<2x16xf32>
    %c0_144 = arith.constant 0 : index
    %c0_145 = arith.constant 0 : index
    %136 = vector.load %arg33[%c0_144, %c0_145] : memref<32x2560xf32, #tpu.memory_space<vmem>>, vector<16x2560xf32>
    %cst_146 = arith.constant dense<0.000000e+00> : vector<2x2560xf32>
    %137 = tpu.matmul %135, %136, %cst_146 {dimension_numbers = #tpu.dot_dimension_numbers<[1], [0], [0], [1], [0, 0, 1, 1], [], []>} : vector<2x16xf32>, vector<16x2560xf32>, vector<2x2560xf32> -> vector<2x2560xf32>
    %c1 = arith.constant 1 : index
    %c0_147 = arith.constant 0 : index
    %c0_148 = arith.constant 0 : index
    %138 = vector.load %arg32[%c1, %c0_147, %c0_148] : memref<2x2x4xf32, #tpu.memory_space<vmem>>, vector<1x2x4xf32>
    %139 = vector.shape_cast %138 : vector<1x2x4xf32> to vector<2x4xf32>
    %cst_149 = arith.constant dense<0.000000e+00> : vector<2x16xf32>
    %140 = tpu.matmul %139, %132, %cst_149 {dimension_numbers = #tpu.dot_dimension_numbers<[1], [0], [0], [1], [0, 0, 1, 1], [], []>} : vector<2x4xf32>, vector<4x16xf32>, vector<2x16xf32> -> vector<2x16xf32>
    %c16 = arith.constant 16 : index
    %c0_150 = arith.constant 0 : index
    %141 = vector.load %arg33[%c16, %c0_150] : memref<32x2560xf32, #tpu.memory_space<vmem>>, vector<16x2560xf32>
    %cst_151 = arith.constant dense<0.000000e+00> : vector<2x2560xf32>
    %142 = tpu.matmul %140, %141, %cst_151 {dimension_numbers = #tpu.dot_dimension_numbers<[1], [0], [0], [1], [0, 0, 1, 1], [], []>} : vector<2x16xf32>, vector<16x2560xf32>, vector<2x2560xf32> -> vector<2x2560xf32>
    %143 = arith.addf %137, %142 : vector<2x2560xf32>
    %c0_152 = arith.constant 0 : index
    %c0_153 = arith.constant 0 : index
    %144 = vector.load %arg34[%c0_152, %c0_153] : memref<1x2560xf32, #tpu.memory_space<vmem>>, vector<1x2560xf32>
    %145 = vector.broadcast %144 : vector<1x2560xf32> to vector<2x2560xf32>
    %146 = arith.addf %143, %145 : vector<2x2560xf32>
    %cst_154 = arith.constant 0.000000e+00 : f32
    %147 = vector.broadcast %cst_154 : f32 to vector<2x2560xf32>
    %148 = arith.maximumf %146, %147 : vector<2x2560xf32>
    %c0_155 = arith.constant 0 : index
    %c0_156 = arith.constant 0 : index
    %149 = vector.load %arg35[%c0_155, %c0_156] : memref<2560x10xf32, #tpu.memory_space<vmem>>, vector<2560x10xf32>
    %cst_157 = arith.constant dense<0.000000e+00> : vector<2x10xf32>
    %150 = tpu.matmul %148, %149, %cst_157 {dimension_numbers = #tpu.dot_dimension_numbers<[1], [0], [0], [1], [0, 0, 1, 1], [], []>} : vector<2x2560xf32>, vector<2560x10xf32>, vector<2x10xf32> -> vector<2x10xf32>
    %c0_158 = arith.constant 0 : index
    %c0_159 = arith.constant 0 : index
    %151 = vector.load %arg36[%c0_158, %c0_159] : memref<1x10xf32, #tpu.memory_space<vmem>>, vector<1x10xf32>
    %152 = vector.broadcast %151 : vector<1x10xf32> to vector<2x10xf32>
    %153 = arith.addf %150, %152 : vector<2x10xf32>
    %c0_160 = arith.constant 0 : index
    %c0_161 = arith.constant 0 : index
    %154 = vector.load %arg37[%c0_160, %c0_161] : memref<2x10xf32, #tpu.memory_space<vmem>>, vector<2x10xf32>
    tpu.vector_store %arg37[%c0_160, %c0_161], %153 {strides = array<i32>} : memref<2x10xf32, #tpu.memory_space<vmem>>, vector<2x10xf32>,
    return
  }
  func.func @transform_0(%arg0: i32) -> (i32, i32) {
    %c0_i32 = arith.constant 0 : i32
    %c0_i32_0 = arith.constant 0 : i32
    return %arg0, %c0_i32 : i32, i32
  }
  func.func @transform_1(%arg0: i32) -> (i32, i32) {
    %c0_i32 = arith.constant 0 : i32
    %c0_i32_0 = arith.constant 0 : i32
    %c0_i32_1 = arith.constant 0 : i32
    return %c0_i32, %c0_i32_0 : i32, i32
  }
  func.func @transform_2(%arg0: i32) -> (i32, i32) {
    %c0_i32 = arith.constant 0 : i32
    %c0_i32_0 = arith.constant 0 : i32
    %c0_i32_1 = arith.constant 0 : i32
    return %c0_i32, %c0_i32_0 : i32, i32
  }
  func.func @transform_3(%arg0: i32) -> (i32, i32) {
    %c0_i32 = arith.constant 0 : i32
    %c0_i32_0 = arith.constant 0 : i32
    %c0_i32_1 = arith.constant 0 : i32
    return %c0_i32, %c0_i32_0 : i32, i32
  }
  func.func @transform_4(%arg0: i32) -> (i32, i32) {
    %c0_i32 = arith.constant 0 : i32
    %c0_i32_0 = arith.constant 0 : i32
    %c0_i32_1 = arith.constant 0 : i32
    return %c0_i32, %c0_i32_0 : i32, i32
  }
  func.func @transform_5(%arg0: i32) -> (i32, i32) {
    %c0_i32 = arith.constant 0 : i32
    %c0_i32_0 = arith.constant 0 : i32
    %c0_i32_1 = arith.constant 0 : i32
    return %c0_i32, %c0_i32_0 : i32, i32
  }
  func.func @transform_6(%arg0: i32) -> (i32, i32) {
    %c0_i32 = arith.constant 0 : i32
    %c0_i32_0 = arith.constant 0 : i32
    %c0_i32_1 = arith.constant 0 : i32
    return %c0_i32, %c0_i32_0 : i32, i32
  }
  func.func @transform_7(%arg0: i32) -> (i32, i32) {
    %c0_i32 = arith.constant 0 : i32
    %c0_i32_0 = arith.constant 0 : i32
    %c0_i32_1 = arith.constant 0 : i32
    return %c0_i32, %c0_i32_0 : i32, i32
  }
  func.func @transform_8(%arg0: i32) -> (i32, i32) {
    %c0_i32 = arith.constant 0 : i32
    %c0_i32_0 = arith.constant 0 : i32
    %c0_i32_1 = arith.constant 0 : i32
    return %c0_i32, %c0_i32_0 : i32, i32
  }
  func.func @transform_9(%arg0: i32) -> (i32, i32) {
    %c0_i32 = arith.constant 0 : i32
    %c0_i32_0 = arith.constant 0 : i32
    %c0_i32_1 = arith.constant 0 : i32
    return %c0_i32, %c0_i32_0 : i32, i32
  }
  func.func @transform_10(%arg0: i32) -> (i32, i32) {
    %c0_i32 = arith.constant 0 : i32
    %c0_i32_0 = arith.constant 0 : i32
    %c0_i32_1 = arith.constant 0 : i32
    return %c0_i32, %c0_i32_0 : i32, i32
  }
  func.func @transform_11(%arg0: i32) -> (i32, i32) {
    %c0_i32 = arith.constant 0 : i32
    %c0_i32_0 = arith.constant 0 : i32
    %c0_i32_1 = arith.constant 0 : i32
    return %c0_i32, %c0_i32_0 : i32, i32
  }
  func.func @transform_12(%arg0: i32) -> (i32, i32) {
    %c0_i32 = arith.constant 0 : i32
    %c0_i32_0 = arith.constant 0 : i32
    %c0_i32_1 = arith.constant 0 : i32
    return %c0_i32, %c0_i32_0 : i32, i32
  }
  func.func @transform_13(%arg0: i32) -> (i32, i32) {
    %c0_i32 = arith.constant 0 : i32
    %c0_i32_0 = arith.constant 0 : i32
    %c0_i32_1 = arith.constant 0 : i32
    return %c0_i32, %c0_i32_0 : i32, i32
  }
  func.func @transform_14(%arg0: i32) -> (i32, i32) {
    %c0_i32 = arith.constant 0 : i32
    %c0_i32_0 = arith.constant 0 : i32
    %c0_i32_1 = arith.constant 0 : i32
    return %c0_i32, %c0_i32_0 : i32, i32
  }
  func.func @transform_15(%arg0: i32) -> (i32, i32) {
    %c0_i32 = arith.constant 0 : i32
    %c0_i32_0 = arith.constant 0 : i32
    %c0_i32_1 = arith.constant 0 : i32
    return %c0_i32, %c0_i32_0 : i32, i32
  }
  func.func @transform_16(%arg0: i32) -> (i32, i32) {
    %c0_i32 = arith.constant 0 : i32
    %c0_i32_0 = arith.constant 0 : i32
    %c0_i32_1 = arith.constant 0 : i32
    return %c0_i32, %c0_i32_0 : i32, i32
  }
  func.func @transform_17(%arg0: i32) -> (i32, i32) {
    %c0_i32 = arith.constant 0 : i32
    %c0_i32_0 = arith.constant 0 : i32
    %c0_i32_1 = arith.constant 0 : i32
    return %c0_i32, %c0_i32_0 : i32, i32
  }
  func.func @transform_18(%arg0: i32) -> (i32, i32) {
    %c0_i32 = arith.constant 0 : i32
    %c0_i32_0 = arith.constant 0 : i32
    %c0_i32_1 = arith.constant 0 : i32
    return %c0_i32, %c0_i32_0 : i32, i32
  }
  func.func @transform_19(%arg0: i32) -> (i32, i32) {
    %c0_i32 = arith.constant 0 : i32
    %c0_i32_0 = arith.constant 0 : i32
    %c0_i32_1 = arith.constant 0 : i32
    return %c0_i32, %c0_i32_0 : i32, i32
  }
  func.func @transform_20(%arg0: i32) -> (i32, i32) {
    %c0_i32 = arith.constant 0 : i32
    %c0_i32_0 = arith.constant 0 : i32
    %c0_i32_1 = arith.constant 0 : i32
    return %c0_i32, %c0_i32_0 : i32, i32
  }
  func.func @transform_21(%arg0: i32) -> (i32, i32) {
    %c0_i32 = arith.constant 0 : i32
    %c0_i32_0 = arith.constant 0 : i32
    %c0_i32_1 = arith.constant 0 : i32
    return %c0_i32, %c0_i32_0 : i32, i32
  }
  func.func @transform_22(%arg0: i32) -> (i32, i32) {
    %c0_i32 = arith.constant 0 : i32
    %c0_i32_0 = arith.constant 0 : i32
    %c0_i32_1 = arith.constant 0 : i32
    return %c0_i32, %c0_i32_0 : i32, i32
  }
  func.func @transform_23(%arg0: i32) -> (i32, i32) {
    %c0_i32 = arith.constant 0 : i32
    %c0_i32_0 = arith.constant 0 : i32
    %c0_i32_1 = arith.constant 0 : i32
    return %c0_i32, %c0_i32_0 : i32, i32
  }
  func.func @transform_24(%arg0: i32) -> (i32, i32) {
    %c0_i32 = arith.constant 0 : i32
    %c0_i32_0 = arith.constant 0 : i32
    %c0_i32_1 = arith.constant 0 : i32
    return %c0_i32, %c0_i32_0 : i32, i32
  }
  func.func @transform_25(%arg0: i32) -> (i32, i32) {
    %c0_i32 = arith.constant 0 : i32
    %c0_i32_0 = arith.constant 0 : i32
    %c0_i32_1 = arith.constant 0 : i32
    return %c0_i32, %c0_i32_0 : i32, i32
  }
  func.func @transform_26(%arg0: i32) -> (i32, i32) {
    %c0_i32 = arith.constant 0 : i32
    %c0_i32_0 = arith.constant 0 : i32
    %c0_i32_1 = arith.constant 0 : i32
    return %c0_i32, %c0_i32_0 : i32, i32
  }
  func.func @transform_27(%arg0: i32) -> (i32, i32) {
    %c0_i32 = arith.constant 0 : i32
    %c0_i32_0 = arith.constant 0 : i32
    %c0_i32_1 = arith.constant 0 : i32
    return %c0_i32, %c0_i32_0 : i32, i32
  }
  func.func @transform_28(%arg0: i32) -> (i32, i32) {
    %c0_i32 = arith.constant 0 : i32
    %c0_i32_0 = arith.constant 0 : i32
    %c0_i32_1 = arith.constant 0 : i32
    return %c0_i32, %c0_i32_0 : i32, i32
  }
  func.func @transform_29(%arg0: i32) -> (i32, i32) {
    %c0_i32 = arith.constant 0 : i32
    %c0_i32_0 = arith.constant 0 : i32
    %c0_i32_1 = arith.constant 0 : i32
    return %c0_i32, %c0_i32_0 : i32, i32
  }
  func.func @transform_30(%arg0: i32) -> (i32, i32) {
    %c0_i32 = arith.constant 0 : i32
    %c0_i32_0 = arith.constant 0 : i32
    %c0_i32_1 = arith.constant 0 : i32
    return %c0_i32, %c0_i32_0 : i32, i32
  }
  func.func @transform_31(%arg0: i32) -> (i32, i32, i32) {
    %c0_i32 = arith.constant 0 : i32
    %c0_i32_0 = arith.constant 0 : i32
    %c0_i32_1 = arith.constant 0 : i32
    %c0_i32_2 = arith.constant 0 : i32
    return %c0_i32, %c0_i32_0, %c0_i32_1 : i32, i32, i32
  }
  func.func @transform_32(%arg0: i32) -> (i32, i32) {
    %c0_i32 = arith.constant 0 : i32
    %c0_i32_0 = arith.constant 0 : i32
    %c0_i32_1 = arith.constant 0 : i32
    return %c0_i32, %c0_i32_0 : i32, i32
  }
  func.func @transform_33(%arg0: i32) -> (i32, i32) {
    %c0_i32 = arith.constant 0 : i32
    %c0_i32_0 = arith.constant 0 : i32
    %c0_i32_1 = arith.constant 0 : i32
    return %c0_i32, %c0_i32_0 : i32, i32
  }
  func.func @transform_34(%arg0: i32) -> (i32, i32) {
    %c0_i32 = arith.constant 0 : i32
    %c0_i32_0 = arith.constant 0 : i32
    %c0_i32_1 = arith.constant 0 : i32
    return %c0_i32, %c0_i32_0 : i32, i32
  }
  func.func @transform_35(%arg0: i32) -> (i32, i32) {
    %c0_i32 = arith.constant 0 : i32
    %c0_i32_0 = arith.constant 0 : i32
    %c0_i32_1 = arith.constant 0 : i32
    return %c0_i32, %c0_i32_0 : i32, i32
  }
  func.func @transform_36(%arg0: i32) -> (i32, i32) {
    %c0_i32 = arith.constant 0 : i32
    %c0_i32_0 = arith.constant 0 : i32
    return %arg0, %c0_i32 : i32, i32
  }
}

</mosaic_0001>

<bundles_post_ra>
// kernel: forward.1
= control target key start
LH: loop header
LB: loop body
LE: loop exit
PB: predicated region body
PF: predicated region fallthrough
CT: control target
= control target key end

     0   :  { %s4647_s6 = smov 1   ;;  %s4648_s10 = smov 2   ;;  %s5418_s0 = inlined_call_operand.smem [shape: u32[37], index: -1, kind: input, shape index: {}] }
   0x1   :  { %s4725_s5 = sld [smem:[%s5418_s0]]   ;;  %s4649_s14 = smov 3  }
   0x2   :  { %s4730_s9 = sld [smem:[%s5418_s0 + %s4647_s6]]   ;;  %s4650_s18 = smov 4  }
   0x3   :  { %s4735_s13 = sld [smem:[%s5418_s0 + %s4648_s10]]   ;;  %s4651_s22 = smov 5  }
   0x4   :  { %s4740_s17 = sld [smem:[%s5418_s0 + %s4649_s14]]   ;;  %s4652_s26 = smov 6  }
   0x5   :  { %s4745_s21 = sld [smem:[%s5418_s0 + %s4650_s18]]   ;;  %s4653_s30 = smov 7  }
   0x6   :  { %s4750_s25 = sld [smem:[%s5418_s0 + %s4651_s22]]   ;;  %s4654_s4 = smov 8  }
   0x7   :  { %5432 = sst [smem:[#allocation60_spill]] %s4725_s5  ;;  %s4655_s10 = smov 9  }
   0x8   :  { %s4755_s29 = sld [smem:[%s5418_s0 + %s4652_s26]]   ;;  %s4656_s15 = smov 10  }
   0x9   :  { %5433 = sst [smem:[#allocation61_spill]] %s4735_s13  ;;  %s4657_s20 = smov 11  }
   0xa   :  { %s4760_s3 = sld [smem:[%s5418_s0 + %s4653_s30]]   ;;  %s4658_s26 = smov 12  }
   0xb   :  { %5434 = sst [smem:[#allocation62_spill]] %s4745_s21  ;;  %s4659_s1 = smov 13  }
   0xc   :  { %5435 = sst [smem:[#allocation63_spill]] %s4750_s25  ;;  %s4660_s7 = smov 14  }
   0xd   :  { %s4765_s8 = sld [smem:[%s5418_s0 + %s4654_s4]]   ;;  %s4662_s22 = smov 16  }
   0xe   :  { %5436 = sst [smem:[#allocation64_spill]] %s4755_s29  ;;  %s4663_s28 = smov 17  }
   0xf   :  { %s4770_s14 = sld [smem:[%s5418_s0 + %s4655_s10]]  }
  0x10   :  { %s4775_s19 = sld [smem:[%s5418_s0 + %s4656_s15]]   ;;  %s4661_s15 = smov 15  }
  0x11   :  { %s4780_s24 = sld [smem:[%s5418_s0 + %s4657_s20]]  }
  0x12   :  { %s4785_s30 = sld [smem:[%s5418_s0 + %s4658_s26]]  }
  0x13   :  { %5437 = sst [smem:[#allocation65_spill]] %s4765_s8 }
  0x14   :  { %s4790_s6 = sld [smem:[%s5418_s0 + %s4659_s1]]  }
  0x15   :  { %5438 = sst [smem:[#allocation66_spill]] %s4770_s14 }
  0x16   :  { %5439 = sst [smem:[#allocation67_spill]] %s4775_s19 }
  0x17   :  { %s4795_s12 = sld [smem:[%s5418_s0 + %s4660_s7]]   ;;  %s4664_s7 = smov 18  }
  0x18   :  { %5440 = sst [smem:[#allocation68_spill]] %s4785_s30 }
  0x19   :  { %s4800_s20 = sld [smem:[%s5418_s0 + %s4661_s15]]   ;;  %s4665_s15 = smov 19  }
  0x1a   :  { %5441 = sst [smem:[#allocation69_spill]] %s4790_s6 }
  0x1b   :  { %s4805_s27 = sld [smem:[%s5418_s0 + %s4662_s22]]   ;;  %s4666_s22 = smov 20  }
  0x1c   :  { %s4810_s4 = sld [smem:[%s5418_s0 + %s4663_s28]]   ;;  %s4667_s28 = smov 21  }
  0x1d   :  { %s4815_s30 = sld [smem:[%s5418_s0 + %s4664_s7]]   ;;  %s4668_s7 = smov 22  }
  0x1e   :  { %s4820_s19 = sld [smem:[%s5418_s0 + %s4665_s15]]   ;;  %s4669_s15 = smov 23  }
  0x1f   :  { %5442 = sst [smem:[#allocation70_spill]] %s4800_s20 }
  0x20   :  { %s4825_s8 = sld [smem:[%s5418_s0 + %s4666_s22]]   ;;  %s4670_s22 = smov 24  }
  0x21   :  { %s4830_s29 = sld [smem:[%s5418_s0 + %s4667_s28]]   ;;  %s4671_s28 = smov 25  }
  0x22   :  { %5443 = sst [smem:[#allocation71_spill]] %s4810_s4 }
  0x23   :  { %s4835_s21 = sld [smem:[%s5418_s0 + %s4668_s7]]   ;;  %s4672_s7 = smov 26  }
  0x24   :  { %5444 = sst [smem:[#allocation72_spill]] %s4820_s19 }
  0x25   :  { %s4840_s13 = sld [smem:[%s5418_s0 + %s4669_s15]]   ;;  %s4673_s15 = smov 27  }
  0x26   :  { %s4845_s5 = sld [smem:[%s5418_s0 + %s4670_s22]]   ;;  %s4674_s22 = smov 28  }
  0x27   :  { %5445 = sst [smem:[#allocation73_spill]] %s4830_s29 }
  0x28   :  { %s4850_s29 = sld [smem:[%s5418_s0 + %s4671_s28]]   ;;  %s4675_s28 = smov 29  }
  0x29   :  { %s4855_s19 = sld [smem:[%s5418_s0 + %s4672_s7]]   ;;  %s4676_s7 = smov 30  }
  0x2a   :  { %s4865_s4 = sld [smem:[%s5418_s0 + %s4674_s22]]   ;;  %s4678_s22 = smov 32  }
  0x2b   :  { %5446 = sst [smem:[#allocation74_spill]] %s4840_s13 }
  0x2c   :  { %s4860_s13 = sld [smem:[%s5418_s0 + %s4673_s15]]   ;;  %s4677_s15 = smov 31  }
  0x2d   :  { %s4875_s20 = sld [smem:[%s5418_s0 + %s4676_s7]]   ;;  %s4680_s7 = smov 34  }
  0x2e   :  { %5447 = sst [smem:[#allocation75_spill]] %s4850_s29 }
  0x2f   :  { %s4870_s29 = sld [smem:[%s5418_s0 + %s4675_s28]]   ;;  %s4679_s28 = smov 33  }
  0x30   :  { %s4885_s6 = sld [smem:[%s5418_s0 + %s4678_s22]]   ;;  %s4682_s22 = smov 36  }
  0x31   :  { %s4895_s14 = sld [smem:[%s5418_s0 + %s4680_s7]]  }
  0x32   :  { %5448 = sst [smem:[#allocation76_spill]] %s4860_s13 }
  0x33   :  { %s4880_s13 = sld [smem:[%s5418_s0 + %s4677_s15]]   ;;  %s4681_s15 = smov 35  }
  0x34   :  { %s4905_s25 = sld [smem:[%s5418_s0 + %s4682_s22]]  }
  0x35   :  { %5449 = sst [smem:[#allocation77_spill]] %s4870_s29 }
  0x36   :  { %s4890_s29 = sld [smem:[%s5418_s0 + %s4679_s28]]  }
  0x39   :  { %5450 = sst [smem:[#allocation78_spill]] %s4880_s13 }
  0x3a   :  { %s4900_s13 = sld [smem:[%s5418_s0 + %s4681_s15]]  }
  0x3b   :  { %78 = vsyncpa [#allocation3], 0 }
  0x3c   :  { %79 = vsyncpa [#allocation6], 0 }
  0x3d   :  { %80 = vsyncpa [#allocation9], 0 }
  0x3e   :  { %81 = vsyncpa [#allocation12], 0 }
  0x3f   :  { %82 = vsyncpa [#allocation15], 0 }
  0x40   :  { %83 = vsyncpa [#allocation18], 0 }
  0x41   :  { %84 = vsyncpa [#allocation21], 0 }
  0x42   :  { %85 = vsyncpa [#allocation24], 0 }
  0x43   :  { %86 = vsyncpa [#allocation27], 0 }
  0x44   :  { %87 = vsyncpa [#allocation30], 0 }
  0x45   :  { %88 = vsyncpa [#allocation33], 0 }
  0x46   :  { %89 = vsyncpa [#allocation36], 0 }
  0x47   :  { %90 = vsyncpa [#allocation39], 0 }
  0x48   :  { %91 = vsyncpa [#allocation42], 0 }
  0x49   :  { %92 = vsyncpa [#allocation4], 0  ;;  %s114_s0 = sshll.u32 %s4740_s17, 4  ;;  %s4683_s28 = smov [#allocation5]   ;;  %s115_s0 = int_to_ptr.hbm [resolvable:$true] %s114_s0 }
  0x4a   :  { %s116_s1 = sshll.u32 %s4683_s28, 4  ;;  %s144_s2 = sshll.u32 %s4760_s3, 4  ;;  %s117_s1 = int_to_ptr.vmem [resolvable:$true] %s116_s1  ;;  %s145_s2 = int_to_ptr.hbm [resolvable:$true] %s144_s2 }
  0x4b   :  { %s3945_s7 = sshra.s32 %s115_s0, 4  ;;  %s3949_s11 = scalar_lea.hbm %s4740_s17, 384  ;;  %s3946_s7 = int_to_ptr.hbm [resolvable:$true] %s3945_s7 }
  0x4c   :  { %s3947_s10 = scalar_lea.hbm %s3946_s7, 384  ;;  %p3950_p1 = scmp.lt.s32.totalorder %s3946_s7, %s4740_s17 }
  0x4d   :  { %p3948_p0 = scmp.ne.s32.totalorder %s3946_s7, %s3947_s10  ;;  %p3951_p2 = scmp.lt.s32.totalorder %s3949_s11, %s3947_s10 }
  0x4f   :  { %p3952_p3 = por %p3951_p2, %p3950_p1 }
  0x51   :  { %p3953_p4 = pnand %p3952_p3, %p3948_p0 }
  0x53   :  { %3956 = shalt.err (!%p3953_p4)
}
  0x54   :  { %s4684_s15 = smov 128   ;;  %s4685_s16 = smov 8  }
  0x55   :  { %122 = dma.hbm_to_vmem [thread:$0]  %s115_s0, 6144, %s117_s1, [#allocation6], %s4684_s15, %s4684_s15, %s4685_s16  }
  0x56   :  { %s4686_s18 = smov [#allocation8]   ;;  %s174_s23 = sshll.u32 %s4780_s24, 4  ;;  %s4915_s23 = int_to_ptr.hbm [resolvable:$true] %s174_s23 }
  0x57   :  { %s146_s22 = sshll.u32 %s4686_s18, 4  ;;  %s3969_s17 = sshra.s32 %s145_s2, 4  ;;  %s147_s22 = int_to_ptr.vmem [resolvable:$true] %s146_s22  ;;  %s3970_s17 = int_to_ptr.hbm [resolvable:$true] %s3969_s17 }
  0x58   :  { %s3971_s26 = scalar_lea.hbm %s3970_s17, 192  ;;  %s3973_s28 = scalar_lea.hbm %s4760_s3, 192 }
  0x59   :  { %p3972_p5 = scmp.ne.s32.totalorder %s3970_s17, %s3971_s26  ;;  %p3974_p6 = scmp.lt.s32.totalorder %s3970_s17, %s4760_s3 }
  0x5a   :  { %p3975_p7 = scmp.lt.s32.totalorder %s3973_s28, %s3971_s26 }
  0x5c   :  { %p3976_p8 = por %p3975_p7, %p3974_p6 }
  0x5e   :  { %p3977_p9 = pnand %p3976_p8, %p3972_p5 }
  0x60   :  { %3980 = shalt.err (!%p3977_p9)
}
  0x61   :  { %152 = dma.hbm_to_vmem [thread:$0]  %s145_s2, 3072, %s147_s22, [#allocation9], %s4684_s15, %s4684_s15, %s4685_s16  }
  0x62   :  { %s202_s0 = sshll.u32 %s4795_s12, 4  ;;  %s4687_s1 = smov [#allocation11]   ;;  %s4923_s0 = int_to_ptr.hbm [resolvable:$true] %s202_s0 }
  0x63   :  { %s176_s7 = sshll.u32 %s4687_s1, 4  ;;  %s3993_s10 = sshra.s32 %s4915_s23, 4  ;;  %s177_s7 = int_to_ptr.vmem [resolvable:$true] %s176_s7  ;;  %s3994_s10 = int_to_ptr.hbm [resolvable:$true] %s3993_s10 }
  0x64   :  { %s3995_s3 = scalar_lea.hbm %s3994_s10, 96  ;;  %s3997_s11 = scalar_lea.hbm %s4780_s24, 96 }
  0x65   :  { %p3996_p10 = scmp.ne.s32.totalorder %s3994_s10, %s3995_s3  ;;  %p3998_p11 = scmp.lt.s32.totalorder %s3994_s10, %s4780_s24 }
  0x66   :  { %p3999_p12 = scmp.lt.s32.totalorder %s3997_s11, %s3995_s3 }
  0x68   :  { %p4000_p13 = por %p3999_p12, %p3998_p11 }
  0x6a   :  { %p4001_p0 = pnand %p4000_p13, %p3996_p10 }
  0x6c   :  { %4004 = shalt.err (!%p4001_p0)
}
  0x6d   :  { %182 = dma.hbm_to_vmem [thread:$0]  %s4915_s23, 1536, %s177_s7, [#allocation12], %s4684_s15, %s4684_s15, %s4685_s16  }
  0x6e   :  { %s4688_s2 = smov [#allocation14]   ;;  %s228_s22 = sshll.u32 %s4805_s27, 4  ;;  %s4933_s22 = int_to_ptr.hbm [resolvable:$true] %s228_s22 }
  0x6f   :  { %s204_s18 = sshll.u32 %s4688_s2, 4  ;;  %s4017_s24 = sshra.s32 %s4923_s0, 4  ;;  %s205_s18 = int_to_ptr.vmem [resolvable:$true] %s204_s18  ;;  %s4018_s24 = int_to_ptr.hbm [resolvable:$true] %s4017_s24 }
  0x70   :  { %s4019_s17 = scalar_lea.hbm %s4018_s24, 32  ;;  %s4021_s26 = scalar_lea.hbm %s4795_s12, 32 }
  0x71   :  { %p4020_p1 = scmp.ne.s32.totalorder %s4018_s24, %s4019_s17  ;;  %p4022_p2 = scmp.lt.s32.totalorder %s4018_s24, %s4795_s12 }
  0x72   :  { %p4023_p3 = scmp.lt.s32.totalorder %s4021_s26, %s4019_s17 }
  0x74   :  { %p4024_p4 = por %p4023_p3, %p4022_p2 }
  0x76   :  { %p4025_p5 = pnand %p4024_p4, %p4020_p1 }
  0x78   :  { %4028 = shalt.err (!%p4025_p5)
}
  0x79   :  { %210 = dma.hbm_to_vmem [thread:$0]  %s4923_s0, 512, %s205_s18, [#allocation15], %s4684_s15, %s4684_s15, %s4685_s16  }
  0x7a   :  { %s254_s23 = sshll.u32 %s4815_s30, 4  ;;  %s4689_s28 = smov [#allocation17]   ;;  %s4943_s23 = int_to_ptr.hbm [resolvable:$true] %s254_s23 }
  0x7b   :  { %s230_s1 = sshll.u32 %s4689_s28, 4  ;;  %s4041_s12 = sshra.s32 %s4933_s22, 4  ;;  %s231_s1 = int_to_ptr.vmem [resolvable:$true] %s230_s1  ;;  %s4042_s12 = int_to_ptr.hbm [resolvable:$true] %s4041_s12 }
  0x7c   :  { %s4043_s7 = scalar_lea.hbm %s4042_s12, 16  ;;  %s4045_s10 = scalar_lea.hbm %s4805_s27, 16 }
  0x7d   :  { %p4044_p6 = scmp.ne.s32.totalorder %s4042_s12, %s4043_s7  ;;  %p4046_p7 = scmp.lt.s32.totalorder %s4042_s12, %s4805_s27 }
  0x7e   :  { %p4047_p8 = scmp.lt.s32.totalorder %s4045_s10, %s4043_s7 }
  0x80   :  { %p4048_p9 = por %p4047_p8, %p4046_p7 }
  0x82   :  { %p4049_p10 = pnand %p4048_p9, %p4044_p6 }
  0x84   :  { %4052 = shalt.err (!%p4049_p10)
}
  0x85   :  { %236 = dma.hbm_to_vmem [thread:$0]  %s4933_s22, 256, %s231_s1, [#allocation18], %s4684_s15, %s4684_s15, %s4685_s16  }
  0x86   :  { %s4690_s0 = smov [#allocation20]   ;;  %s280_s11 = sshll.u32 %s4825_s8, 4  ;;  %s4953_s11 = int_to_ptr.hbm [resolvable:$true] %s280_s11 }
  0x87   :  { %s256_s3 = sshll.u32 %s4690_s0, 4  ;;  %s4065_s27 = sshra.s32 %s4943_s23, 4  ;;  %s257_s3 = int_to_ptr.vmem [resolvable:$true] %s256_s3  ;;  %s4066_s27 = int_to_ptr.hbm [resolvable:$true] %s4065_s27 }
  0x88   :  { %s4067_s2 = scalar_lea.hbm %s4066_s27, 128  ;;  %s4069_s18 = scalar_lea.hbm %s4815_s30, 128 }
  0x89   :  { %p4068_p11 = scmp.ne.s32.totalorder %s4066_s27, %s4067_s2  ;;  %p4070_p12 = scmp.lt.s32.totalorder %s4066_s27, %s4815_s30 }
  0x8a   :  { %p4071_p13 = scmp.lt.s32.totalorder %s4069_s18, %s4067_s2 }
  0x8c   :  { %p4072_p0 = por %p4071_p13, %p4070_p12 }
  0x8e   :  { %p4073_p1 = pnand %p4072_p0, %p4068_p11 }
  0x90   :  { %4076 = shalt.err (!%p4073_p1)
}
  0x91   :  { %262 = dma.hbm_to_vmem [thread:$0]  %s4943_s23, 2048, %s257_s3, [#allocation21], %s4684_s15, %s4684_s15, %s4685_s16  }
  0x92   :  { %s305_s22 = sshll.u32 %s4835_s21, 4  ;;  %s4691_s24 = smov [#allocation23]   ;;  %s306_s22 = int_to_ptr.hbm [resolvable:$true] %s305_s22 }
  0x93   :  { %s282_s17 = sshll.u32 %s4691_s24, 4  ;;  %s4089_s26 = sshra.s32 %s4953_s11, 4  ;;  %s283_s17 = int_to_ptr.vmem [resolvable:$true] %s282_s17  ;;  %s4090_s26 = int_to_ptr.hbm [resolvable:$true] %s4089_s26 }
  0x94   :  { %s4091_s30 = scalar_lea.hbm %s4090_s26, 16  ;;  %s4093_s28 = scalar_lea.hbm %s4825_s8, 16 }
  0x95   :  { %p4092_p2 = scmp.ne.s32.totalorder %s4090_s26, %s4091_s30  ;;  %p4094_p3 = scmp.lt.s32.totalorder %s4090_s26, %s4825_s8 }
  0x96   :  { %p4095_p4 = scmp.lt.s32.totalorder %s4093_s28, %s4091_s30 }
  0x98   :  { %p4096_p5 = por %p4095_p4, %p4094_p3 }
  0x9a   :  { %p4097_p6 = pnand %p4096_p5, %p4092_p2 }
  0x9c   :  { %4100 = shalt.err (!%p4097_p6)
}
  0x9d   :  { %288 = dma.hbm_to_vmem [thread:$0]  %s4953_s11, 256, %s283_s17, [#allocation24], %s4684_s15, %s4684_s15, %s4685_s16  }
  0x9e   :  { %s4692_s23 = smov [#allocation26]   ;;  %s328_s12 = sshll.u32 %s4845_s5, 4  ;;  %s4971_s12 = int_to_ptr.hbm [resolvable:$true] %s328_s12 }
  0x9f   :  { %s307_s1 = sshll.u32 %s4692_s23, 4  ;;  %s4113_s7 = sshra.s32 %s306_s22, 4  ;;  %s308_s1 = int_to_ptr.vmem [resolvable:$true] %s307_s1  ;;  %s4114_s7 = int_to_ptr.hbm [resolvable:$true] %s4113_s7 }
  0xa0   :  { %s4115_s8 = scalar_lea.hbm %s4114_s7, 8  ;;  %s4117_s10 = scalar_lea.hbm %s4835_s21, 8 }
  0xa1   :  { %p4116_p7 = scmp.ne.s32.totalorder %s4114_s7, %s4115_s8  ;;  %p4118_p8 = scmp.lt.s32.totalorder %s4114_s7, %s4835_s21 }
  0xa2   :  { %p4119_p9 = scmp.lt.s32.totalorder %s4117_s10, %s4115_s8 }
  0xa4   :  { %p4120_p10 = por %p4119_p9, %p4118_p8 }
  0xa6   :  { %p4121_p11 = pnand %p4120_p10, %p4116_p7 }
  0xa8   :  { %4124 = shalt.err (!%p4121_p11)
}
  0xa9   :  { %310 = dma.hbm_to_vmem [thread:$0]  %s306_s22, 128, %s308_s1, [#allocation27]  }
  0xaa   :  { %s353_s0 = sshll.u32 %s4855_s19, 4  ;;  %s4693_s3 = smov [#allocation29]   ;;  %s354_s0 = int_to_ptr.hbm [resolvable:$true] %s353_s0 }
  0xab   :  { %s330_s11 = sshll.u32 %s4693_s3, 4  ;;  %s4137_s27 = sshra.s32 %s4971_s12, 4  ;;  %s331_s11 = int_to_ptr.vmem [resolvable:$true] %s330_s11  ;;  %s4138_s27 = int_to_ptr.hbm [resolvable:$true] %s4137_s27 }
  0xac   :  { %s4139_s2 = scalar_lea.hbm %s4138_s27, 64  ;;  %s4141_s18 = scalar_lea.hbm %s4845_s5, 64 }
  0xad   :  { %p4140_p12 = scmp.ne.s32.totalorder %s4138_s27, %s4139_s2  ;;  %p4142_p13 = scmp.lt.s32.totalorder %s4138_s27, %s4845_s5 }
  0xae   :  { %p4143_p0 = scmp.lt.s32.totalorder %s4141_s18, %s4139_s2 }
  0xb0   :  { %p4144_p1 = por %p4143_p0, %p4142_p13 }
  0xb2   :  { %p4145_p2 = pnand %p4144_p1, %p4140_p12 }
  0xb4   :  { %4148 = shalt.err (!%p4145_p2)
}
  0xb5   :  { %336 = dma.hbm_to_vmem [thread:$0]  %s4971_s12, 1024, %s331_s11, [#allocation30], %s4684_s15, %s4684_s15, %s4685_s16  }
  0xb6   :  { %s4694_s21 = smov [#allocation32]   ;;  %s375_s24 = sshll.u32 %s4865_s4, 4  ;;  %s376_s24 = int_to_ptr.hbm [resolvable:$true] %s375_s24 }
  0xb7   :  { %s355_s22 = sshll.u32 %s4694_s21, 4  ;;  %s4161_s17 = sshra.s32 %s354_s0, 4  ;;  %s356_s22 = int_to_ptr.vmem [resolvable:$true] %s355_s22  ;;  %s4162_s17 = int_to_ptr.hbm [resolvable:$true] %s4161_s17 }
  0xb8   :  { %s4163_s5 = scalar_lea.hbm %s4162_s17, 8  ;;  %s4165_s26 = scalar_lea.hbm %s4855_s19, 8 }
  0xb9   :  { %p4164_p3 = scmp.ne.s32.totalorder %s4162_s17, %s4163_s5  ;;  %p4166_p4 = scmp.lt.s32.totalorder %s4162_s17, %s4855_s19 }
  0xba   :  { %p4167_p5 = scmp.lt.s32.totalorder %s4165_s26, %s4163_s5 }
  0xbc   :  { %p4168_p6 = por %p4167_p5, %p4166_p4 }
  0xbe   :  { %p4169_p7 = pnand %p4168_p6, %p4164_p3 }
  0xc0   :  { %4172 = shalt.err (!%p4169_p7)
}
  0xc1   :  { %358 = dma.hbm_to_vmem [thread:$0]  %s354_s0, 128, %s356_s22, [#allocation33]  }
  0xc2   :  { %s398_s30 = sshll.u32 %s4875_s20, 4  ;;  %s4695_s28 = smov [#allocation35]   ;;  %s4987_s30 = int_to_ptr.hbm [resolvable:$true] %s398_s30 }
  0xc3   :  { %s377_s23 = sshll.u32 %s4695_s28, 4  ;;  %s4185_s1 = sshra.s32 %s376_s24, 4  ;;  %s378_s23 = int_to_ptr.vmem [resolvable:$true] %s377_s23  ;;  %s4186_s1 = int_to_ptr.hbm [resolvable:$true] %s4185_s1 }
  0xc4   :  { %s4187_s12 = scalar_lea.hbm %s4186_s1, 4  ;;  %s4189_s7 = scalar_lea.hbm %s4865_s4, 4 }
  0xc5   :  { %p4188_p8 = scmp.ne.s32.totalorder %s4186_s1, %s4187_s12  ;;  %p4190_p9 = scmp.lt.s32.totalorder %s4186_s1, %s4865_s4 }
  0xc6   :  { %p4191_p10 = scmp.lt.s32.totalorder %s4189_s7, %s4187_s12 }
  0xc8   :  { %p4192_p11 = por %p4191_p10, %p4190_p9 }
  0xca   :  { %p4193_p12 = pnand %p4192_p11, %p4188_p8 }
  0xcc   :  { %4196 = shalt.err (!%p4193_p12)
}
  0xcd   :  { %380 = dma.hbm_to_vmem [thread:$0]  %s376_s24, 64, %s378_s23, [#allocation36]  }
  0xce   :  { %s4696_s19 = smov [#allocation38]   ;;  %s424_s10 = sshll.u32 %s4885_s6, 4  ;;  %s4992_s10 = int_to_ptr.hbm [resolvable:$true] %s424_s10 }
  0xcf   :  { %s400_s8 = sshll.u32 %s4696_s19, 4  ;;  %s4209_s0 = sshra.s32 %s4987_s30, 4  ;;  %s401_s8 = int_to_ptr.vmem [resolvable:$true] %s400_s8  ;;  %s4210_s0 = int_to_ptr.hbm [resolvable:$true] %s4209_s0 }
  0xd0   :  { %s4211_s3 = scalar_lea.hbm %s4210_s0, 32  ;;  %s4213_s4 = scalar_lea.hbm %s4875_s20, 32 }
  0xd1   :  { %p4212_p13 = scmp.ne.s32.totalorder %s4210_s0, %s4211_s3  ;;  %p4214_p0 = scmp.lt.s32.totalorder %s4210_s0, %s4875_s20 }
  0xd2   :  { %p4215_p1 = scmp.lt.s32.totalorder %s4213_s4, %s4211_s3 }
  0xd4   :  { %p4216_p2 = por %p4215_p1, %p4214_p0 }
  0xd6   :  { %p4217_p3 = pnand %p4216_p2, %p4212_p13 }
  0xd8   :  { %4220 = shalt.err (!%p4217_p3)
}
  0xd9   :  { %406 = dma.hbm_to_vmem [thread:$0]  %s4987_s30, 512, %s401_s8, [#allocation39], %s4684_s15, %s4684_s15, %s4685_s16  }
  0xda   :  { %s4697_s11 = smov [#allocation41]   ;;  %s99_s2 = sshll.u32 %s4730_s9, 4  ;;  %s100_s2 = int_to_ptr.hbm [resolvable:$true] %s99_s2 }
  0xdb   :  { %s426_s27 = sshll.u32 %s4697_s11, 4  ;;  %s4233_s18 = sshra.s32 %s4992_s10, 4  ;;  %s427_s27 = int_to_ptr.vmem [resolvable:$true] %s426_s27  ;;  %s4234_s18 = int_to_ptr.hbm [resolvable:$true] %s4233_s18 }
  0xdc   :  { %s4235_s20 = scalar_lea.hbm %s4234_s18, 640  ;;  %s4237_s21 = scalar_lea.hbm %s4885_s6, 640 }
  0xdd   :  { %p4236_p4 = scmp.ne.s32.totalorder %s4234_s18, %s4235_s20  ;;  %p4238_p5 = scmp.lt.s32.totalorder %s4234_s18, %s4885_s6 }
  0xde   :  { %p4239_p6 = scmp.lt.s32.totalorder %s4237_s21, %s4235_s20 }
  0xe0   :  { %p4240_p7 = por %p4239_p6, %p4238_p5 }
  0xe2   :  { %p4241_p8 = pnand %p4240_p7, %p4236_p4 }
  0xe4   :  { %4244 = shalt.err (!%p4241_p8)
}
  0xe5   :  { %s4698_s22 = smov 2560   ;;  %s5451_s24 = sld [smem:[#allocation63_spill]] }
  0xe6   :  { %s4699_s17 = smov 160   ;;  %s4700_s5 = smov [#allocation2]  }
  0xe7   :  { %432 = dma.hbm_to_vmem [thread:$0]  %s4992_s10, 10240, %s427_s27, [#allocation42], %s4698_s22, %s4698_s22, %s4699_s17  }
  0xe8   :  { %s101_s26 = sshll.u32 %s4700_s5, 4  ;;  %s4257_s28 = sshra.s32 %s100_s2, 4  ;;  %s102_s26 = int_to_ptr.vmem [resolvable:$true] %s101_s26  ;;  %s4258_s28 = int_to_ptr.hbm [resolvable:$true] %s4257_s28 }
  0xe9   :  { %s4259_s6 = scalar_lea.hbm %s4258_s28, 192  ;;  %s4261_s23 = scalar_lea.hbm %s4730_s9, 192 }
  0xea   :  { %p4260_p9 = scmp.ne.s32.totalorder %s4258_s28, %s4259_s6  ;;  %p4262_p10 = scmp.lt.s32.totalorder %s4258_s28, %s4730_s9 }
  0xeb   :  { %s129_s30 = sshll.u32 %s5451_s24, 4  ;;  %p4263_p11 = scmp.lt.s32.totalorder %s4261_s23, %s4259_s6  ;;  %s5007_s30 = int_to_ptr.hbm [resolvable:$true] %s129_s30 }
  0xed   :  { %p4264_p12 = por %p4263_p11, %p4262_p10 }
  0xef   :  { %p4265_p13 = pnand %p4264_p12, %p4260_p9 }
  0xf1   :  { %4268 = shalt.err (!%p4265_p13)
}
  0xf2   :  { %s5452_s1 = sld [smem:[#allocation66_spill]]  ;;  %s4701_s7 = smov [#allocation7]  }
  0xf3   :  { %107 = dma.hbm_to_vmem [thread:$0]  %s100_s2, 3072, %s102_s26, [#allocation3], %s4684_s15, %s4684_s15, %s4685_s16  }
  0xf4   :  { %s131_s19 = sshll.u32 %s4701_s7, 4  ;;  %s4281_s8 = sshra.s32 %s5007_s30, 4  ;;  %s132_s19 = int_to_ptr.vmem [resolvable:$true] %s131_s19  ;;  %s4282_s8 = int_to_ptr.hbm [resolvable:$true] %s4281_s8 }
  0xf5   :  { %s4283_s9 = scalar_lea.hbm %s4282_s8, 192  ;;  %s4285_s10 = scalar_lea.hbm %s5451_s24, 192 }
  0xf6   :  { %p4284_p0 = scmp.ne.s32.totalorder %s4282_s8, %s4283_s9  ;;  %p4286_p1 = scmp.lt.s32.totalorder %s4282_s8, %s5451_s24 }
  0xf7   :  { %p4287_p2 = scmp.lt.s32.totalorder %s4285_s10, %s4283_s9 }
  0xf8   :  { %s159_s12 = sshll.u32 %s5452_s1, 4  ;;  %s5015_s12 = int_to_ptr.hbm [resolvable:$true] %s159_s12 }
  0xf9   :  { %p4288_p3 = por %p4287_p2, %p4286_p1 }
  0xfb   :  { %p4289_p4 = pnand %p4288_p3, %p4284_p0 }
  0xfd   :  { %4292 = shalt.err (!%p4289_p4)
}
  0xfe   :  { %s5453_s0 = sld [smem:[#allocation69_spill]]  ;;  %s4702_s3 = smov [#allocation10]  }
  0xff   :  { %137 = dma.hbm_to_vmem [thread:$0]  %s5007_s30, 3072, %s132_s19, [#allocation6], %s4684_s15, %s4684_s15, %s4685_s16  }
 0x100   :  { %s161_s4 = sshll.u32 %s4702_s3, 4  ;;  %s4305_s27 = sshra.s32 %s5015_s12, 4  ;;  %s162_s4 = int_to_ptr.vmem [resolvable:$true] %s161_s4  ;;  %s4306_s27 = int_to_ptr.hbm [resolvable:$true] %s4305_s27 }
 0x101   :  { %s4307_s2 = scalar_lea.hbm %s4306_s27, 96  ;;  %s4309_s18 = scalar_lea.hbm %s5452_s1, 96 }
 0x102   :  { %p4308_p5 = scmp.ne.s32.totalorder %s4306_s27, %s4307_s2  ;;  %p4310_p6 = scmp.lt.s32.totalorder %s4306_s27, %s5452_s1 }
 0x103   :  { %p4311_p7 = scmp.lt.s32.totalorder %s4309_s18, %s4307_s2 }
 0x104   :  { %s189_s11 = sshll.u32 %s5453_s0, 4  ;;  %s5025_s11 = int_to_ptr.hbm [resolvable:$true] %s189_s11 }
 0x105   :  { %p4312_p8 = por %p4311_p7, %p4310_p6 }
 0x107   :  { %p4313_p9 = pnand %p4312_p8, %p4308_p5 }
 0x109   :  { %4316 = shalt.err (!%p4313_p9)
}
 0x10a   :  { %s5454_s20 = sld [smem:[#allocation70_spill]]  ;;  %s4703_s22 = smov [#allocation13]  }
 0x10b   :  { %167 = dma.hbm_to_vmem [thread:$0]  %s5015_s12, 1536, %s162_s4, [#allocation9], %s4684_s15, %s4684_s15, %s4685_s16  }
 0x10c   :  { %s191_s24 = sshll.u32 %s4703_s22, 4  ;;  %s4329_s17 = sshra.s32 %s5025_s11, 4  ;;  %s192_s24 = int_to_ptr.vmem [resolvable:$true] %s191_s24  ;;  %s4330_s17 = int_to_ptr.hbm [resolvable:$true] %s4329_s17 }
 0x10d   :  { %s4331_s5 = scalar_lea.hbm %s4330_s17, 32  ;;  %s4333_s26 = scalar_lea.hbm %s5453_s0, 32 }
 0x10e   :  { %p4332_p10 = scmp.ne.s32.totalorder %s4330_s17, %s4331_s5  ;;  %p4334_p11 = scmp.lt.s32.totalorder %s4330_s17, %s5453_s0 }
 0x10f   :  { %p4335_p12 = scmp.lt.s32.totalorder %s4333_s26, %s4331_s5 }
 0x110   :  { %s215_s21 = sshll.u32 %s5454_s20, 4  ;;  %s5035_s21 = int_to_ptr.hbm [resolvable:$true] %s215_s21 }
 0x111   :  { %p4336_p13 = por %p4335_p12, %p4334_p11 }
 0x113   :  { %p4337_p0 = pnand %p4336_p13, %p4332_p10 }
 0x115   :  { %4340 = shalt.err (!%p4337_p0)
}
 0x116   :  { %s5455_s30 = sld [smem:[#allocation71_spill]]  ;;  %s4704_s28 = smov [#allocation16]  }
 0x117   :  { %197 = dma.hbm_to_vmem [thread:$0]  %s5025_s11, 512, %s192_s24, [#allocation12], %s4684_s15, %s4684_s15, %s4685_s16  }
 0x118   :  { %s217_s6 = sshll.u32 %s4704_s28, 4  ;;  %s4353_s1 = sshra.s32 %s5035_s21, 4  ;;  %s218_s6 = int_to_ptr.vmem [resolvable:$true] %s217_s6  ;;  %s4354_s1 = int_to_ptr.hbm [resolvable:$true] %s4353_s1 }
 0x119   :  { %s4355_s12 = scalar_lea.hbm %s4354_s1, 16  ;;  %s4357_s7 = scalar_lea.hbm %s5454_s20, 16 }
 0x11a   :  { %p4356_p1 = scmp.ne.s32.totalorder %s4354_s1, %s4355_s12  ;;  %p4358_p2 = scmp.lt.s32.totalorder %s4354_s1, %s5454_s20 }
 0x11b   :  { %p4359_p3 = scmp.lt.s32.totalorder %s4357_s7, %s4355_s12 }
 0x11c   :  { %s241_s23 = sshll.u32 %s5455_s30, 4  ;;  %s5045_s23 = int_to_ptr.hbm [resolvable:$true] %s241_s23 }
 0x11d   :  { %p4360_p4 = por %p4359_p3, %p4358_p2 }
 0x11f   :  { %p4361_p5 = pnand %p4360_p4, %p4356_p1 }
 0x121   :  { %4364 = shalt.err (!%p4361_p5)
}
 0x122   :  { %s5456_s19 = sld [smem:[#allocation72_spill]]  ;;  %s4705_s9 = smov [#allocation19]  }
 0x123   :  { %223 = dma.hbm_to_vmem [thread:$0]  %s5035_s21, 256, %s218_s6, [#allocation15], %s4684_s15, %s4684_s15, %s4685_s16  }
 0x124   :  { %s243_s10 = sshll.u32 %s4705_s9, 4  ;;  %s4377_s0 = sshra.s32 %s5045_s23, 4  ;;  %s244_s10 = int_to_ptr.vmem [resolvable:$true] %s243_s10  ;;  %s4378_s0 = int_to_ptr.hbm [resolvable:$true] %s4377_s0 }
 0x125   :  { %s4379_s3 = scalar_lea.hbm %s4378_s0, 128  ;;  %s4381_s4 = scalar_lea.hbm %s5455_s30, 128 }
 0x126   :  { %p4380_p6 = scmp.ne.s32.totalorder %s4378_s0, %s4379_s3  ;;  %p4382_p7 = scmp.lt.s32.totalorder %s4378_s0, %s5455_s30 }
 0x127   :  { %p4383_p8 = scmp.lt.s32.totalorder %s4381_s4, %s4379_s3 }
 0x128   :  { %s267_s8 = sshll.u32 %s5456_s19, 4  ;;  %s5055_s8 = int_to_ptr.hbm [resolvable:$true] %s267_s8 }
 0x129   :  { %p4384_p9 = por %p4383_p8, %p4382_p7 }
 0x12b   :  { %p4385_p10 = pnand %p4384_p9, %p4380_p6 }
 0x12d   :  { %4388 = shalt.err (!%p4385_p10)
}
 0x12e   :  { %s5457_s11 = sld [smem:[#allocation73_spill]]  ;;  %s4706_s27 = smov [#allocation22]  }
 0x12f   :  { %249 = dma.hbm_to_vmem [thread:$0]  %s5045_s23, 2048, %s244_s10, [#allocation18], %s4684_s15, %s4684_s15, %s4685_s16  }
 0x130   :  { %s269_s2 = sshll.u32 %s4706_s27, 4  ;;  %s4401_s20 = sshra.s32 %s5055_s8, 4  ;;  %s270_s2 = int_to_ptr.vmem [resolvable:$true] %s269_s2  ;;  %s4402_s20 = int_to_ptr.hbm [resolvable:$true] %s4401_s20 }
 0x131   :  { %s4403_s21 = scalar_lea.hbm %s4402_s20, 16  ;;  %s4405_s22 = scalar_lea.hbm %s5456_s19, 16 }
 0x132   :  { %p4404_p11 = scmp.ne.s32.totalorder %s4402_s20, %s4403_s21  ;;  %p4406_p12 = scmp.lt.s32.totalorder %s4402_s20, %s5456_s19 }
 0x133   :  { %p4407_p13 = scmp.lt.s32.totalorder %s4405_s22, %s4403_s21 }
 0x134   :  { %s294_s18 = sshll.u32 %s5457_s11, 4  ;;  %s295_s18 = int_to_ptr.hbm [resolvable:$true] %s294_s18 }
 0x135   :  { %p4408_p0 = por %p4407_p13, %p4406_p12 }
 0x137   :  { %p4409_p1 = pnand %p4408_p0, %p4404_p11 }
 0x139   :  { %4412 = shalt.err (!%p4409_p1)
}
 0x13a   :  { %s5458_s24 = sld [smem:[#allocation74_spill]]  ;;  %s4707_s5 = smov [#allocation25]  }
 0x13b   :  { %275 = dma.hbm_to_vmem [thread:$0]  %s5055_s8, 256, %s270_s2, [#allocation21], %s4684_s15, %s4684_s15, %s4685_s16  }
 0x13c   :  { %s296_s26 = sshll.u32 %s4707_s5, 4  ;;  %s4425_s30 = sshra.s32 %s295_s18, 4  ;;  %s297_s26 = int_to_ptr.vmem [resolvable:$true] %s296_s26  ;;  %s4426_s30 = int_to_ptr.hbm [resolvable:$true] %s4425_s30 }
 0x13d   :  { %s4427_s28 = scalar_lea.hbm %s4426_s30, 8  ;;  %s4429_s6 = scalar_lea.hbm %s5457_s11, 8 }
 0x13e   :  { %p4428_p2 = scmp.ne.s32.totalorder %s4426_s30, %s4427_s28  ;;  %p4430_p3 = scmp.lt.s32.totalorder %s4426_s30, %s5457_s11 }
 0x13f   :  { %p4431_p4 = scmp.lt.s32.totalorder %s4429_s6, %s4427_s28 }
 0x140   :  { %s315_s17 = sshll.u32 %s5458_s24, 4  ;;  %s5073_s17 = int_to_ptr.hbm [resolvable:$true] %s315_s17 }
 0x141   :  { %p4432_p5 = por %p4431_p4, %p4430_p3 }
 0x143   :  { %p4433_p6 = pnand %p4432_p5, %p4428_p2 }
 0x145   :  { %4436 = shalt.err (!%p4433_p6)
}
 0x146   :  { %299 = dma.hbm_to_vmem [thread:$0]  %s295_s18, 128, %s297_s26, [#allocation24]  }
 0x147   :  { %s5459_s23 = sld [smem:[#allocation75_spill]]  ;;  %s4708_s1 = smov [#allocation28]  }
 0x148   :  { %s317_s12 = sshll.u32 %s4708_s1, 4  ;;  %s4449_s19 = sshra.s32 %s5073_s17, 4  ;;  %s318_s12 = int_to_ptr.vmem [resolvable:$true] %s317_s12  ;;  %s4450_s19 = int_to_ptr.hbm [resolvable:$true] %s4449_s19 }
 0x149   :  { %s4451_s8 = scalar_lea.hbm %s4450_s19, 64  ;;  %s4453_s9 = scalar_lea.hbm %s5458_s24, 64 }
 0x14a   :  { %p4452_p7 = scmp.ne.s32.totalorder %s4450_s19, %s4451_s8  ;;  %p4454_p8 = scmp.lt.s32.totalorder %s4450_s19, %s5458_s24 }
 0x14b   :  { %p4455_p9 = scmp.lt.s32.totalorder %s4453_s9, %s4451_s8 }
 0x14d   :  { %s342_s7 = sshll.u32 %s5459_s23, 4  ;;  %p4456_p10 = por %p4455_p9, %p4454_p8  ;;  %s343_s7 = int_to_ptr.hbm [resolvable:$true] %s342_s7 }
 0x14f   :  { %p4457_p11 = pnand %p4456_p10, %p4452_p7 }
 0x151   :  { %4460 = shalt.err (!%p4457_p11)
}
 0x152   :  { %s5460_s10 = sld [smem:[#allocation76_spill]]  ;;  %s4709_s3 = smov [#allocation31]  }
 0x153   :  { %323 = dma.hbm_to_vmem [thread:$0]  %s5073_s17, 1024, %s318_s12, [#allocation27], %s4684_s15, %s4684_s15, %s4685_s16  }
 0x154   :  { %s344_s4 = sshll.u32 %s4709_s3, 4  ;;  %s4473_s11 = sshra.s32 %s343_s7, 4  ;;  %s345_s4 = int_to_ptr.vmem [resolvable:$true] %s344_s4  ;;  %s4474_s11 = int_to_ptr.hbm [resolvable:$true] %s4473_s11 }
 0x155   :  { %s4475_s27 = scalar_lea.hbm %s4474_s11, 8  ;;  %s4477_s2 = scalar_lea.hbm %s5459_s23, 8 }
 0x156   :  { %p4476_p12 = scmp.ne.s32.totalorder %s4474_s11, %s4475_s27  ;;  %p4478_p13 = scmp.lt.s32.totalorder %s4474_s11, %s5459_s23 }
 0x157   :  { %p4479_p0 = scmp.lt.s32.totalorder %s4477_s2, %s4475_s27 }
 0x158   :  { %s364_s0 = sshll.u32 %s5460_s10, 4  ;;  %s365_s0 = int_to_ptr.hbm [resolvable:$true] %s364_s0 }
 0x159   :  { %p4480_p1 = por %p4479_p0, %p4478_p13 }
 0x15b   :  { %p4481_p2 = pnand %p4480_p1, %p4476_p12 }
 0x15d   :  { %4484 = shalt.err (!%p4481_p2)
}
 0x15e   :  { %347 = dma.hbm_to_vmem [thread:$0]  %s343_s7, 128, %s345_s4, [#allocation30]  }
 0x15f   :  { %s5461_s18 = sld [smem:[#allocation77_spill]]  ;;  %s4710_s20 = smov [#allocation34]  }
 0x160   :  { %s366_s21 = sshll.u32 %s4710_s20, 4  ;;  %s4497_s24 = sshra.s32 %s365_s0, 4  ;;  %s367_s21 = int_to_ptr.vmem [resolvable:$true] %s366_s21  ;;  %s4498_s24 = int_to_ptr.hbm [resolvable:$true] %s4497_s24 }
 0x161   :  { %s4499_s17 = scalar_lea.hbm %s4498_s24, 4  ;;  %s4501_s5 = scalar_lea.hbm %s5460_s10, 4 }
 0x162   :  { %p4500_p3 = scmp.ne.s32.totalorder %s4498_s24, %s4499_s17  ;;  %p4502_p4 = scmp.lt.s32.totalorder %s4498_s24, %s5460_s10 }
 0x163   :  { %p4503_p5 = scmp.lt.s32.totalorder %s4501_s5, %s4499_s17 }
 0x165   :  { %s385_s22 = sshll.u32 %s5461_s18, 4  ;;  %p4504_p6 = por %p4503_p5, %p4502_p4  ;;  %s5089_s22 = int_to_ptr.hbm [resolvable:$true] %s385_s22 }
 0x167   :  { %p4505_p7 = pnand %p4504_p6, %p4500_p3 }
 0x169   :  { %4508 = shalt.err (!%p4505_p7)
}
 0x16a   :  { %369 = dma.hbm_to_vmem [thread:$0]  %s365_s0, 64, %s367_s21, [#allocation33]  }
 0x16b   :  { %s5462_s26 = sld [smem:[#allocation78_spill]]  ;;  %s4711_s28 = smov [#allocation37]  }
 0x16c   :  { %s387_s6 = sshll.u32 %s4711_s28, 4  ;;  %s4521_s23 = sshra.s32 %s5089_s22, 4  ;;  %s388_s6 = int_to_ptr.vmem [resolvable:$true] %s387_s6  ;;  %s4522_s23 = int_to_ptr.hbm [resolvable:$true] %s4521_s23 }
 0x16d   :  { %s4523_s1 = scalar_lea.hbm %s4522_s23, 32  ;;  %s4525_s12 = scalar_lea.hbm %s5461_s18, 32 }
 0x16e   :  { %p4524_p8 = scmp.ne.s32.totalorder %s4522_s23, %s4523_s1  ;;  %p4526_p9 = scmp.lt.s32.totalorder %s4522_s23, %s5461_s18 }
 0x16f   :  { %p4527_p10 = scmp.lt.s32.totalorder %s4525_s12, %s4523_s1 }
 0x171   :  { %s411_s30 = sshll.u32 %s5462_s26, 4  ;;  %p4528_p11 = por %p4527_p10, %p4526_p9  ;;  %s5094_s30 = int_to_ptr.hbm [resolvable:$true] %s411_s30 }
 0x173   :  { %p4529_p12 = pnand %p4528_p11, %p4524_p8 }
 0x175   :  { %4532 = shalt.err (!%p4529_p12)
}
 0x176   :  { %393 = dma.hbm_to_vmem [thread:$0]  %s5089_s22, 512, %s388_s6, [#allocation36], %s4684_s15, %s4684_s15, %s4685_s16  }
 0x177   :  { %s4712_s7 = smov [#allocation40]   ;;  %s4545_s8 = sshra.s32 %s5094_s30, 4  ;;  %s4546_s8 = int_to_ptr.hbm [resolvable:$true] %s4545_s8 }
 0x178   :  { %s413_s19 = sshll.u32 %s4712_s7, 4  ;;  %s4547_s9 = scalar_lea.hbm %s4546_s8, 4  ;;  %s414_s19 = int_to_ptr.vmem [resolvable:$true] %s413_s19 }
 0x179   :  { %p4548_p13 = scmp.ne.s32.totalorder %s4546_s8, %s4547_s9  ;;  %s4549_s10 = scalar_lea.hbm %s5462_s26, 4 }
 0x17a   :  { %p4550_p0 = scmp.lt.s32.totalorder %s4546_s8, %s5462_s26  ;;  %p4551_p1 = scmp.lt.s32.totalorder %s4549_s10, %s4547_s9 }
 0x17c   :  { %p4552_p2 = por %p4551_p1, %p4550_p0 }
 0x17e   :  { %p4553_p3 = pnand %p4552_p2, %p4548_p13 }
 0x180   :  { %4556 = shalt.err (!%p4553_p3)
}
 0x181   :  { %s4713_s0 = smov 32   ;;  %s4714_s3 = smov 2  }
 0x182   :  { %419 = dma.hbm_to_vmem [thread:$0]  %s5094_s30, 64, %s414_s19, [#allocation39], %s4713_s0, %s4713_s0, %s4714_s3  }
 0x183   :  { %s439_s4 = sshll.u32 %s4895_s14, 4  ;;  %s4715_s11 = smov [#allocation43]   ;;  %s440_s4 = int_to_ptr.hbm [resolvable:$true] %s439_s4 }
 0x184   :  { %s441_s27 = sshll.u32 %s4715_s11, 4  ;;  %s4569_s2 = sshra.s32 %s440_s4, 4  ;;  %s442_s27 = int_to_ptr.vmem [resolvable:$true] %s441_s27  ;;  %s4570_s2 = int_to_ptr.hbm [resolvable:$true] %s4569_s2 }
 0x185   :  { %s4571_s18 = scalar_lea.hbm %s4570_s2, 2560  ;;  %s4573_s20 = scalar_lea.hbm %s4895_s14, 2560 }
 0x186   :  { %p4572_p4 = scmp.ne.s32.totalorder %s4570_s2, %s4571_s18  ;;  %p4574_p5 = scmp.lt.s32.totalorder %s4570_s2, %s4895_s14 }
 0x187   :  { %p4575_p6 = scmp.lt.s32.totalorder %s4573_s20, %s4571_s18 }
 0x189   :  { %p4576_p7 = por %p4575_p6, %p4574_p5 }
 0x18b   :  { %p4577_p8 = pnand %p4576_p7, %p4572_p4 }
 0x18d   :  { %4580 = shalt.err (!%p4577_p8)
}
 0x18e   :  { %447 = dma.hbm_to_vmem [thread:$0]  %s440_s4, 40960, %s442_s27, [#allocation42], %s4684_s15, %s4684_s15, %s4685_s16  }
 0x18f   :  { %4617 = dma.done.wait [#allocation3], 3072  }
 0x190   :  { %4618 = vsyncadd [#allocation3], 4294964224 }
 0x191   :  { %4619 = dma.done.wait [#allocation6], 9216  }
 0x192   :  { %4620 = vsyncadd [#allocation6], 4294958080 }
 0x193   :  { %4621 = dma.done.wait [#allocation9], 4608  }
 0x194   :  { %4622 = vsyncadd [#allocation9], 4294962688 }
 0x195   :  { %4623 = dma.done.wait [#allocation12], 2048  }
 0x196   :  { %4624 = vsyncadd [#allocation12], 4294965248 }
 0x197   :  { %4625 = dma.done.wait [#allocation15], 768  }
 0x198   :  { %4626 = vsyncadd [#allocation15], 4294966528 }
 0x199   :  { %4627 = dma.done.wait [#allocation18], 2304  }
 0x19a   :  { %4628 = vsyncadd [#allocation18], 4294964992 }
 0x19b   :  { %4629 = dma.done.wait [#allocation21], 2304  }
 0x19c   :  { %4630 = vsyncadd [#allocation21], 4294964992 }
 0x19d   :  { %4631 = dma.done.wait [#allocation24], 384  }
 0x19e   :  { %4632 = vsyncadd [#allocation24], 4294966912 }
 0x19f   :  { %4633 = dma.done.wait [#allocation27], 1152  }
 0x1a0   :  { %4634 = vsyncadd [#allocation27], 4294966144 }
 0x1a1   :  { %4635 = dma.done.wait [#allocation30], 1152  }
 0x1a2   :  { %4636 = vsyncadd [#allocation30], 4294966144 }
 0x1a3   :  { %4637 = dma.done.wait [#allocation33], 192  }
 0x1a4   :  { %4638 = vsyncadd [#allocation33], 4294967104 }
 0x1a5   :  { %4639 = dma.done.wait [#allocation36], 576  }
 0x1a6   :  { %4640 = vsyncadd [#allocation36], 4294966720 }
 0x1a7   :  { %4641 = dma.done.wait [#allocation39], 576  }
 0x1a8   :  { %4642 = vsyncadd [#allocation39], 4294966720 }
 0x1a9   :  { %4643 = dma.done.wait [#allocation42], 51200  }
 0x1aa   :  { %4644 = vsyncadd [#allocation42], 4294916096  ;;  %v569_v0 = vld [vmem:[#allocation2 + $0x38] sm:$0xff]  ;;  %v568_v2 = vld [vmem:[#allocation2 + $0x30] sm:$0xff]  ;;  %s5463_s14 = sld [smem:[#allocation60_spill]]  ;;  %vm570_vm0 = vcmask 523264  }
 0x1ab   :  { %v656_v1 = vld [vmem:[#allocation2 + $0xb8] sm:$0xff]  ;;  %591 = vmatpush.msra.mxu0 %v569_v0  ;;  %v655_v3 = vld [vmem:[#allocation2 + $0xb0] sm:$0xff]  ;;  %v567_v4 = vld [vmem:[#allocation2 + $0x28] sm:$0xff]  ;;  %vm690_vm1 = vcmask 261120   ;;  %s5464_s15 = sld [smem:[#allocation61_spill]]  ;;  %vm1247_vm2 = vcmask 130048  }
 0x1ac   :  { %665 = vmatpush.msra.mxu2 %v656_v1  ;;  %v654_v5 = vld [vmem:[#allocation2 + $0xa8] sm:$0xff]  ;;  %v566_v6 = vld [vmem:[#allocation2 + $0x20] sm:$0xff]  ;;  %v565_v8 = vld [vmem:[#allocation2 + $0x18] sm:$0xff]  ;;  %s5465_s16 = sld [smem:[#allocation62_spill]]  ;;  %vm1658_vm3 = vcmask 64512   ;;  %vm1941_vm4 = vcmask 1043456  }
 0x1ad   :  { %592 = vmatpush.msra.mxu0 %v568_v2  ;;  %v653_v7 = vld [vmem:[#allocation2 + $0xa0] sm:$0xff]  ;;  %v652_v9 = vld [vmem:[#allocation2 + $0x98] sm:$0xff]  ;;  %v564_v10 = vld [vmem:[#allocation2 + $0x10] sm:$0xff]  ;;  %s5466_s21 = sld [smem:[#allocation64_spill]]  ;;  %vm1937_vm5 = vcmask 31744   ;;  %s3695_s5 = sshll.u32 %s4905_s25, 4  ;;  %s3696_s5 = int_to_ptr.hbm [resolvable:$true] %s3695_s5 }
 0x1ae   :  { %666 = vmatpush.msra.mxu2 %v655_v3  ;;  %v651_v11 = vld [vmem:[#allocation2 + $0x90] sm:$0xff]  ;;  %v563_v12 = vld [vmem:[#allocation2 + $0x8] sm:$0xff]  ;;  %v562_v14 = vld [vmem:[#allocation2] sm:$0xff]  ;;  %s5467_s22 = sld [smem:[#allocation65_spill]]  ;;  %vm3686_vm6 = vcmask 74752   ;;  %s4605_s26 = sshra.s32 %s3696_s5, 4  ;;  %s4606_s26 = int_to_ptr.hbm [resolvable:$true] %s4605_s26 }
 0x1af   :  { %593 = vmatpush.msra.mxu0 %v567_v4  ;;  %v650_v13 = vld [vmem:[#allocation2 + $0x88] sm:$0xff]  ;;  %v649_v15 = vld [vmem:[#allocation2 + $0x80] sm:$0xff]  ;;  %v619_v20 = vld [vmem:[#allocation2 + $0x78] sm:$0xff]  ;;  %s5468_s24 = sld [smem:[#allocation67_spill]]  ;;  %s4607_s30 = scalar_lea.hbm %s4606_s26, 2 }
 0x1b0   :  { %667 = vmatpush.msra.mxu2 %v654_v5  ;;  %v558_v16 = vld [vmem:[%s5463_s14] sm:$0xff]  ;;  %v559_v17 = vld [vmem:[%s5463_s14 + $0x8] sm:$0xff]  ;;  %v560_v18 = vld [vmem:[%s5463_s14 + $0x10] sm:$0xff]  ;;  %628 = vmatpush.msra.mxu1 %v619_v20  ;;  %s5469_s17 = sld [smem:[#allocation68_spill]]  ;;  %p4608_p9 = scmp.ne.s32.totalorder %s4606_s26, %s4607_s30 }
 0x1b1   :  { %594 = vmatpush.msra.mxu0 %v566_v6  ;;  %v561_v19 = vld [vmem:[%s5463_s14 + $0x18] sm:$0xff]  ;;  %v618_v21 = vld [vmem:[#allocation2 + $0x70] sm:$0xff]  ;;  %v617_v22 = vld [vmem:[#allocation2 + $0x68] sm:$0xff]  ;;  %s4609_s28 = scalar_lea.hbm %s4905_s25, 2  ;;  %p4610_p10 = scmp.lt.s32.totalorder %s4606_s26, %s4905_s25 }
 0x1b2   :  { %668 = vmatpush.msra.mxu2 %v653_v7  ;;  %629 = vmatpush.msra.mxu1 %v618_v21  ;;  %v616_v23 = vld [vmem:[#allocation2 + $0x60] sm:$0xff]  ;;  %v615_v24 = vld [vmem:[#allocation2 + $0x58] sm:$0xff]  ;;  %v614_v26 = vld [vmem:[#allocation2 + $0x50] sm:$0xff]  ;;  %p4611_p11 = scmp.lt.s32.totalorder %s4609_s28, %s4607_s30 }
 0x1b3   :  { %595 = vmatpush.msra.mxu0 %v565_v8  ;;  %v613_v27 = vld [vmem:[#allocation2 + $0x48] sm:$0xff]  ;;  %v612_v28 = vld [vmem:[#allocation2 + $0x40] sm:$0xff]  ;;  %v5137_v38 = vld [vmem:[#allocation13 + $0x10] sm:$0xff] }
 0x1b4   :  { %669 = vmatpush.msra.mxu2 %v652_v9  ;;  %630 = vmatpush.msra.mxu1 %v617_v22  ;;  %v5128_v35 = vld [vmem:[#allocation13] sm:$0xff]  ;;  %v5133_v37 = vld [vmem:[#allocation13 + $0x8] sm:$0xff]  ;;  %v5141_v39 = vld [vmem:[#allocation13 + $0x18] sm:$0xff]  ;;  %p4612_p12 = por %p4611_p11, %p4610_p10 }
 0x1b5   :  { %596 = vmatpush.msra.mxu0 %v564_v10  ;;  %v5145_v40 = vld [vmem:[#allocation14] sm:$0xff]  ;;  %v5149_v41 = vld [vmem:[#allocation14 + $0x8] sm:$0xff]  ;;  %v5153_v42 = vld [vmem:[#allocation14 + $0x10] sm:$0xff] }
 0x1b6   :  { %670 = vmatpush.msra.mxu2 %v651_v11  ;;  %631 = vmatpush.msra.mxu1 %v616_v23  ;;  %v5157_v43 = vld [vmem:[#allocation14 + $0x18] sm:$0xff]  ;;  %v807_v47 = vld [vmem:[#allocation5 + $0x70] sm:$0xff]  ;;  %v806_v50 = vld [vmem:[#allocation5 + $0x68] sm:$0xff]  ;;  %p4613_p13 = pnand %p4612_p12, %p4608_p9 }
 0x1b7   :  { %597 = vmatpush.msra.mxu0 %v563_v12  ;;  %v808_v44 = vld [vmem:[#allocation5 + $0x78] sm:$0xff]  ;;  %v852_v48 = vld [vmem:[#allocation5 + $0xf0] sm:$0xff]  ;;  %v851_v51 = vld [vmem:[#allocation5 + $0xe8] sm:$0xff] }
 0x1b8   :  { %671 = vmatpush.msra.mxu2 %v650_v13  ;;  %632 = vmatpush.msra.mxu1 %v615_v24  ;;  %v853_v45 = vld [vmem:[#allocation5 + $0xf8] sm:$0xff]  ;;  %v897_v49 = vld [vmem:[#allocation5 + $0x170] sm:$0xff]  ;;  %v896_v52 = vld [vmem:[#allocation5 + $0x168] sm:$0xff] }
 0x1b9   :  { %598 = vmatpush.msra.mxu0 %v562_v14  ;;  %v898_v46 = vld [vmem:[#allocation5 + $0x178] sm:$0xff]  ;;  %v805_v53 = vld [vmem:[#allocation5 + $0x60] sm:$0xff]  ;;  %v803_v59 = vld [vmem:[#allocation5 + $0x50] sm:$0xff] }
 0x1ba   :  { %672 = vmatpush.msra.mxu2 %v649_v15  ;;  %3754 = vmatmul.msk.f32.vlgmr.msra.gmra.mxu0 %vm570_vm0, %v558_v16  ;;  %v850_v54 = vld [vmem:[#allocation5 + $0xe0] sm:$0xff]  ;;  %v804_v56 = vld [vmem:[#allocation5 + $0x58] sm:$0xff]  ;;  %v848_v60 = vld [vmem:[#allocation5 + $0xd0] sm:$0xff] }
 0x1bb   :  { %3762 = vmatmul.msk.f32.vlgmr.msra.gmra.mxu2 %vm570_vm0, %v558_v16  ;;  %633 = vmatpush.msra.mxu1 %v614_v26  ;;  %v895_v55 = vld [vmem:[#allocation5 + $0x160] sm:$0xff]  ;;  %v849_v57 = vld [vmem:[#allocation5 + $0xd8] sm:$0xff]  ;;  %v893_v61 = vld [vmem:[#allocation5 + $0x150] sm:$0xff] }
 0x1bc   :  { %809 = vmatpush.msrb.mxu0 %v808_v44  ;;  %899 = vmatpush.msrb.mxu2 %v898_v46  ;;  %v894_v58 = vld [vmem:[#allocation5 + $0x158] sm:$0xff]  ;;  %v802_v62 = vld [vmem:[#allocation5 + $0x48] sm:$0xff]  ;;  %v801_v1 = vld [vmem:[#allocation5 + $0x40] sm:$0xff] }
 0x1bd   :  { %634 = vmatpush.msra.mxu1 %v613_v27  ;;  %v847_v63 = vld [vmem:[#allocation5 + $0xc8] sm:$0xff]  ;;  %v846_v2 = vld [vmem:[#allocation5 + $0xc0] sm:$0xff]  ;;  %v800_v4 = vld [vmem:[#allocation5 + $0x38] sm:$0xff] }
 0x1be   :  { %810 = vmatpush.msrb.mxu0 %v807_v47  ;;  %900 = vmatpush.msrb.mxu2 %v897_v49  ;;  %v892_v0 = vld [vmem:[#allocation5 + $0x148] sm:$0xff]  ;;  %v891_v3 = vld [vmem:[#allocation5 + $0x140] sm:$0xff]  ;;  %v845_v5 = vld [vmem:[#allocation5 + $0xb8] sm:$0xff] }
 0x1bf   :  { %635 = vmatpush.msra.mxu1 %v612_v28  ;;  %v890_v6 = vld [vmem:[#allocation5 + $0x138] sm:$0xff]  ;;  %v799_v7 = vld [vmem:[#allocation5 + $0x30] sm:$0xff]  ;;  %v798_v10 = vld [vmem:[#allocation5 + $0x28] sm:$0xff] }
 0x1c0   :  { %3758 = vmatmul.msk.f32.vlgmr.msra.gmra.mxu1 %vm570_vm0, %v558_v16  ;;  %811 = vmatpush.msrb.mxu0 %v806_v50  ;;  %v844_v8 = vld [vmem:[#allocation5 + $0xb0] sm:$0xff]  ;;  %v843_v11 = vld [vmem:[#allocation5 + $0xa8] sm:$0xff]  ;;  %v797_v13 = vld [vmem:[#allocation5 + $0x20] sm:$0xff] }
 0x1c1   :  { %854 = vmatpush.msrb.mxu1 %v853_v45  ;;  %901 = vmatpush.msrb.mxu2 %v896_v52  ;;  %v889_v9 = vld [vmem:[#allocation5 + $0x130] sm:$0xff]  ;;  %v888_v12 = vld [vmem:[#allocation5 + $0x128] sm:$0xff]  ;;  %v842_v14 = vld [vmem:[#allocation5 + $0xa0] sm:$0xff] }
 0x1c2   :  { %3755 = vmatmul.msk.f32.gmra.mxu0 %vm570_vm0, %v559_v17  ;;  %v887_v15 = vld [vmem:[#allocation5 + $0x120] sm:$0xff]  ;;  %v795_v20 = vld [vmem:[#allocation5 + $0x10] sm:$0xff]  ;;  %v794_v23 = vld [vmem:[#allocation5 + $0x8] sm:$0xff] }
 0x1c3   :  { %3763 = vmatmul.msk.f32.gmra.mxu2 %vm570_vm0, %v559_v17  ;;  %855 = vmatpush.msrb.mxu1 %v852_v48  ;;  %v840_v21 = vld [vmem:[#allocation5 + $0x90] sm:$0xff]  ;;  %v839_v24 = vld [vmem:[#allocation5 + $0x88] sm:$0xff]  ;;  %v793_v26 = vld [vmem:[#allocation5] sm:$0xff] }
 0x1c4   :  { %812 = vmatpush.msrb.mxu0 %v805_v53  ;;  %902 = vmatpush.msrb.mxu2 %v895_v55  ;;  %v885_v22 = vld [vmem:[#allocation5 + $0x110] sm:$0xff]  ;;  %v838_v27 = vld [vmem:[#allocation5 + $0x80] sm:$0xff] }
 0x1c5   :  { %856 = vmatpush.msrb.mxu1 %v851_v51  ;;  %v883_v28 = vld [vmem:[#allocation5 + $0x100] sm:$0xff] }
 0x1c6   :  { %813 = vmatpush.msrb.mxu0 %v804_v56  ;;  %903 = vmatpush.msrb.mxu2 %v894_v58 }
 0x1c7   :  { %857 = vmatpush.msrb.mxu1 %v850_v54 }
 0x1c8   :  { %3759 = vmatmul.msk.f32.gmra.mxu1 %vm570_vm0, %v559_v17  ;;  %814 = vmatpush.msrb.mxu0 %v803_v59  ;;  %v796_v17 = vld [vmem:[#allocation5 + $0x18] sm:$0xff] }
 0x1c9   :  { %858 = vmatpush.msrb.mxu1 %v849_v57  ;;  %904 = vmatpush.msrb.mxu2 %v893_v61 }
 0x1ca   :  { %3756 = vmatmul.msk.f32.gmra.mxu0 %vm570_vm0, %v560_v18 }
 0x1cb   :  { %3764 = vmatmul.msk.f32.gmra.mxu2 %vm570_vm0, %v560_v18  ;;  %859 = vmatpush.msrb.mxu1 %v848_v60 }
 0x1cc   :  { %815 = vmatpush.msrb.mxu0 %v802_v62  ;;  %905 = vmatpush.msrb.mxu2 %v892_v0 }
 0x1cd   :  { %860 = vmatpush.msrb.mxu1 %v847_v63 }
 0x1ce   :  { %816 = vmatpush.msrb.mxu0 %v801_v1  ;;  %906 = vmatpush.msrb.mxu2 %v891_v3 }
 0x1cf   :  { %861 = vmatpush.msrb.mxu1 %v846_v2 }
 0x1d0   :  { %3760 = vmatmul.msk.f32.gmra.mxu1 %vm570_vm0, %v560_v18  ;;  %817 = vmatpush.msrb.mxu0 %v800_v4  ;;  %v841_v18 = vld [vmem:[#allocation5 + $0x98] sm:$0xff] }
 0x1d1   :  { %862 = vmatpush.msrb.mxu1 %v845_v5  ;;  %907 = vmatpush.msrb.mxu2 %v890_v6 }
 0x1d2   :  { %3757 = vmatmul.msk.f32.gmra.mxu0 %vm570_vm0, %v561_v19 }
 0x1d3   :  { %3765 = vmatmul.msk.f32.gmra.mxu2 %vm570_vm0, %v561_v19  ;;  %818 = vmatpush.msrb.mxu0 %v799_v7 }
 0x1d4   :  { %863 = vmatpush.msrb.mxu1 %v844_v8  ;;  %908 = vmatpush.msrb.mxu2 %v889_v9 }
 0x1d5   :  { %819 = vmatpush.msrb.mxu0 %v798_v10 }
 0x1d6   :  { %864 = vmatpush.msrb.mxu1 %v843_v11  ;;  %909 = vmatpush.msrb.mxu2 %v888_v12 }
 0x1d7   :  { %820 = vmatpush.msrb.mxu0 %v797_v13  ;;  %v1081_v13 = vld [vmem:[#allocation19 + $0x78] sm:$0xff] }
 0x1d8   :  { %3761 = vmatmul.msk.f32.gmra.mxu1 %vm570_vm0, %v561_v19  ;;  %910 = vmatpush.msrb.mxu2 %v887_v15  ;;  %v886_v19 = vld [vmem:[#allocation5 + $0x118] sm:$0xff]  ;;  %v1119_v15 = vld [vmem:[#allocation20 + $0x70] sm:$0xff] }
 0x1d9   :  { %865 = vmatpush.msrb.mxu1 %v842_v14  ;;  %821 = vmatpush.msrb.mxu0 %v796_v17  ;;  %v1120_v14 = vld [vmem:[#allocation20 + $0x78] sm:$0xff]  ;;  %v1117_v17 = vld [vmem:[#allocation20 + $0x60] sm:$0xff] }
 0x1da   :  { %911 = vmatpush.msrb.mxu2 %v886_v19  ;;  %v1077_v19 = vld [vmem:[#allocation19 + $0x58] sm:$0xff] }
 0x1db   :  { %866 = vmatpush.msrb.mxu1 %v841_v18  ;;  %822 = vmatpush.msrb.mxu0 %v795_v20  ;;  %v1116_v20 = vld [vmem:[#allocation20 + $0x58] sm:$0xff] }
 0x1dc   :  { %912 = vmatpush.msrb.mxu2 %v885_v22 }
 0x1dd   :  { %867 = vmatpush.msrb.mxu1 %v840_v21  ;;  %823 = vmatpush.msrb.mxu0 %v794_v23 }
 0x1df   :  { %868 = vmatpush.msrb.mxu1 %v839_v24  ;;  %824 = vmatpush.msrb.mxu0 %v793_v26  ;;  %v1076_v24 = vld [vmem:[#allocation19 + $0x50] sm:$0xff] }
 0x1e1   :  { %869 = vmatpush.msrb.mxu1 %v838_v27 }
 0x237   :  { %v600_v25 = vpop.f32.mrf.mxu0 }
 0x23e   :  { %v674_v29 = vpop.f32.mrf.mxu2 }
 0x23f   :  { %v603_v30 = vpop.f32.mrf.mxu0 }
 0x246   :  { %v677_v31 = vpop.f32.mrf.mxu2 }
 0x247   :  { %v606_v32 = vpop.f32.mrf.mxu0 }
 0x24e   :  { %v680_v33 = vpop.f32.mrf.mxu2 }
 0x24f   :  { %v609_v34 = vpop.f32.mrf.mxu0 }
 0x250   :  { %715 = vmatpush.msra.mxu3 %v609_v34  ;;  %v3938_v34 = vld [vmem:[%s5464_s15] ss:$0 sm:$0xff] }
 0x252   :  { %716 = vmatpush.msra.mxu3 %v606_v32 }
 0x254   :  { %717 = vmatpush.msra.mxu3 %v603_v30 }
 0x256   :  { %v683_v36 = vpop.f32.mrf.mxu2  ;;  %718 = vmatpush.msra.mxu3 %v600_v25  ;;  %v884_v25 = vld [vmem:[#allocation5 + $0x108] sm:$0xff] }
 0x257   :  { %3766 = vmatmul.msk.f32.vlgmr.msra.gmra.mxu3 %vm690_vm1, %v5128_v35  ;;  %913 = vmatpush.msrb.mxu2 %v884_v25  ;;  %v1115_v25 = vld [vmem:[#allocation20 + $0x50] sm:$0xff] }
 0x258   :  { %760 = vmatpush.msrb.mxu3 %v683_v36 }
 0x259   :  { %914 = vmatpush.msrb.mxu2 %v883_v28 }
 0x25a   :  { %761 = vmatpush.msrb.mxu3 %v680_v33 }
 0x25c   :  { %762 = vmatpush.msrb.mxu3 %v677_v31  ;;  %v637_v31 = vpop.f32.mrf.mxu1 }
 0x25e   :  { %763 = vmatpush.msrb.mxu3 %v674_v29 }
 0x25f   :  { %3767 = vmatmul.msk.f32.gmra.mxu3 %vm690_vm1, %v5133_v37 }
 0x264   :  { %v640_v36 = vpop.f32.mrf.mxu1 }
 0x267   :  { %3768 = vmatmul.msk.f32.gmra.mxu3 %vm690_vm1, %v5137_v38 }
 0x26c   :  { %v643_v51 = vpop.f32.mrf.mxu1 }
 0x26f   :  { %3769 = vmatmul.msk.f32.gmra.mxu3 %vm690_vm1, %v5141_v39 }
 0x274   :  { %v646_v58 = vpop.f32.mrf.mxu1 }
 0x277   :  { %3770 = vmatmul.msk.f32.vlgmr.msrb.gmra.mxu3 %vm690_vm1, %v5145_v40 }
 0x27f   :  { %3771 = vmatmul.msk.f32.gmra.mxu3 %vm690_vm1, %v5149_v41 }
 0x287   :  { %3772 = vmatmul.msk.f32.gmra.mxu3 %vm690_vm1, %v5153_v42 }
 0x28f   :  { %3773 = vmatmul.msk.f32.gmra.mxu3 %vm690_vm1, %v5157_v43 }
 0x2da   :  { %v720_v16 = vpop.f32.mrf.mxu3 }
 0x2db   :  { %v721_v33 = vadd.f32 %v720_v16, %v637_v31  ;;  %v1079_v16 = vld [vmem:[#allocation19 + $0x68] sm:$0xff] }
 0x2dc   :  { %v1114_v31 = vld [vmem:[#allocation20 + $0x48] sm:$0xff] }
 0x2e2   :  { %v723_v29 = vpop.f32.mrf.mxu3 }
 0x2e3   :  { %v724_v48 = vadd.f32 %v723_v29, %v640_v36  ;;  %v1074_v36 = vld [vmem:[#allocation19 + $0x40] sm:$0xff] }
 0x2ea   :  { %v726_v30 = vpop.f32.mrf.mxu3 }
 0x2eb   :  { %v727_v54 = vadd.f32 %v726_v30, %v643_v51  ;;  %v1075_v30 = vld [vmem:[#allocation19 + $0x48] sm:$0xff]  ;;  %v1112_v51 = vld [vmem:[#allocation20 + $0x38] sm:$0xff] }
 0x2f2   :  { %v729_v32 = vpop.f32.mrf.mxu3 }
 0x2f3   :  { %v730_v60 = vadd.f32 %v729_v32, %v646_v58  ;;  %v3939_v32 = vld [vmem:[%s5465_s16] ss:$0 sm:$0xff]  ;;  %v1110_v58 = vld [vmem:[#allocation20 + $0x28] sm:$0xff] }
 0x2fa   :  { %v765_v44 = vpop.f32.mrf.mxu3 }
 0x2fb   :  { %v777_v45 = vadd.f32 %v765_v44, %v721_v33  ;;  %v1113_v44 = vld [vmem:[#allocation20 + $0x40] sm:$0xff] }
 0x2fd   :  { %v785_v46 = vadd.f32 %v3938_v34, %v777_v45 }
 0x2ff   :  { %v789_v47 = vmax.f32 %v785_v46, 0.0 }
 0x301   :  { %825 = vmatmul.f32.vlgmr.msrb.gmra.mxu0 %v789_v47  ;;  %870 = vmatmul.f32.vlgmr.msrb.gmra.mxu1 %v789_v47 }
 0x302   :  { %915 = vmatmul.f32.vlgmr.msrb.gmra.mxu2 %v789_v47  ;;  %v768_v49 = vpop.f32.mrf.mxu3 }
 0x303   :  { %v778_v50 = vadd.f32 %v768_v49, %v724_v48 }
 0x305   :  { %v786_v52 = vadd.f32 %v3938_v34, %v778_v50  ;;  %v1073_v50 = vld [vmem:[#allocation19 + $0x38] sm:$0xff] }
 0x307   :  { %v790_v53 = vmax.f32 %v786_v52, 0.0 }
 0x309   :  { %828 = vmatmul.f32.gmra.mxu0 %v790_v53  ;;  %873 = vmatmul.f32.gmra.mxu1 %v790_v53 }
 0x30a   :  { %918 = vmatmul.f32.gmra.mxu2 %v790_v53  ;;  %v771_v55 = vpop.f32.mrf.mxu3 }
 0x30b   :  { %v779_v56 = vadd.f32 %v771_v55, %v727_v54  ;;  %v1072_v54 = vld [vmem:[#allocation19 + $0x30] sm:$0xff] }
 0x30c   :  { %v1111_v55 = vld [vmem:[#allocation20 + $0x30] sm:$0xff] }
 0x30d   :  { %v787_v57 = vadd.f32 %v3938_v34, %v779_v56 }
 0x30f   :  { %v791_v59 = vmax.f32 %v787_v57, 0.0  ;;  %v1071_v57 = vld [vmem:[#allocation19 + $0x28] sm:$0xff] }
 0x311   :  { %831 = vmatmul.f32.gmra.mxu0 %v791_v59  ;;  %876 = vmatmul.f32.gmra.mxu1 %v791_v59 }
 0x312   :  { %921 = vmatmul.f32.gmra.mxu2 %v791_v59  ;;  %v774_v61 = vpop.f32.mrf.mxu3 }
 0x313   :  { %v780_v62 = vadd.f32 %v774_v61, %v730_v60  ;;  %v1033_v60 = vld [vmem:[#allocation17] sm:$0xff]  ;;  %v1002_v61 = vld [vmem:[#allocation16] sm:$0xff] }
 0x315   :  { %v788_v63 = vadd.f32 %v3938_v34, %v780_v62  ;;  %v1070_v62 = vld [vmem:[#allocation19 + $0x20] sm:$0xff] }
 0x317   :  { %v792_v0 = vmax.f32 %v788_v63, 0.0  ;;  %v1109_v63 = vld [vmem:[#allocation20 + $0x20] sm:$0xff] }
 0x319   :  { %834 = vmatmul.f32.gmra.mxu0 %v792_v0  ;;  %879 = vmatmul.f32.gmra.mxu1 %v792_v0 }
 0x31a   :  { %924 = vmatmul.f32.gmra.mxu2 %v792_v0  ;;  %v1069_v0 = vld [vmem:[#allocation19 + $0x18] sm:$0xff] }
 0x37e   :  { %v826_v1 = vpop.f32.mrf.mxu0 }
 0x385   :  { %v916_v2 = vpop.f32.mrf.mxu2 }
 0x386   :  { %v829_v3 = vpop.f32.mrf.mxu0 }
 0x38d   :  { %v919_v4 = vpop.f32.mrf.mxu2 }
 0x38e   :  { %v832_v5 = vpop.f32.mrf.mxu0 }
 0x395   :  { %v922_v6 = vpop.f32.mrf.mxu2 }
 0x396   :  { %v835_v7 = vpop.f32.mrf.mxu0 }
 0x397   :  { %940 = vmatpush.msra.mxu3 %v835_v7  ;;  %v1106_v7 = vld [vmem:[#allocation20 + $0x8] sm:$0xff] }
 0x399   :  { %941 = vmatpush.msra.mxu3 %v832_v5  ;;  %v1003_v5 = vld [vmem:[#allocation16 + $0x8] sm:$0xff] }
 0x39b   :  { %942 = vmatpush.msra.mxu3 %v829_v3  ;;  %v1107_v3 = vld [vmem:[#allocation20 + $0x10] sm:$0xff] }
 0x39d   :  { %v925_v8 = vpop.f32.mrf.mxu2  ;;  %943 = vmatpush.msra.mxu3 %v826_v1  ;;  %v1108_v1 = vld [vmem:[#allocation20 + $0x18] sm:$0xff] }
 0x39e   :  { %969 = vmatpush.msra.mxu0 %v925_v8  ;;  %3774 = vmatmul.msk.f32.vlgmr.msra.gmra.mxu3 %vm690_vm1, %v5128_v35  ;;  %v871_v35 = vpop.f32.mrf.mxu1  ;;  %v1066_v8 = vld [vmem:[#allocation19] sm:$0xff] }
 0x39f   :  { %1082 = vmatpush.msrb.mxu3 %v1081_v13 }
 0x3a0   :  { %970 = vmatpush.msra.mxu0 %v922_v6  ;;  %v1067_v6 = vld [vmem:[#allocation19 + $0x8] sm:$0xff] }
 0x3a2   :  { %971 = vmatpush.msra.mxu0 %v919_v4  ;;  %v1034_v4 = vld [vmem:[#allocation17 + $0x8] sm:$0xff] }
 0x3a4   :  { %972 = vmatpush.msra.mxu0 %v916_v2  ;;  %v1068_v2 = vld [vmem:[#allocation19 + $0x10] sm:$0xff] }
 0x3a5   :  { %3778 = vmatmul.msk.f32.vlgmr.msra.gmra.mxu0 %vm690_vm1, %v5145_v40 }
 0x3a6   :  { %3775 = vmatmul.msk.f32.gmra.mxu3 %vm690_vm1, %v5133_v37  ;;  %v874_v10 = vpop.f32.mrf.mxu1  ;;  %1121 = vmatpush.msrb.mxu0 %v1120_v14 }
 0x3a8   :  { %1122 = vmatpush.msrb.mxu0 %v1119_v15 }
 0x3ad   :  { %3779 = vmatmul.msk.f32.gmra.mxu0 %vm690_vm1, %v5149_v41 }
 0x3ae   :  { %3776 = vmatmul.msk.f32.gmra.mxu3 %vm690_vm1, %v5137_v38  ;;  %v877_v12 = vpop.f32.mrf.mxu1 }
 0x3b5   :  { %3780 = vmatmul.msk.f32.gmra.mxu0 %vm690_vm1, %v5153_v42  ;;  %v1080_v42 = vld [vmem:[#allocation19 + $0x70] sm:$0xff] }
 0x3b6   :  { %3777 = vmatmul.msk.f32.gmra.mxu3 %vm690_vm1, %v5141_v39  ;;  %v1118_v39 = vld [vmem:[#allocation20 + $0x68] sm:$0xff]  ;;  %v880_v22 = vpop.f32.mrf.mxu1 }
 0x3b7   :  { %1083 = vmatpush.msrb.mxu3 %v1080_v42  ;;  %1123 = vmatpush.msrb.mxu0 %v1118_v39  ;;  %v1187_v39 = vld [vmem:[#allocation7 + $0x60] sm:$0xff] }
 0x3b9   :  { %1084 = vmatpush.msrb.mxu3 %v1079_v16  ;;  %1124 = vmatpush.msrb.mxu0 %v1117_v17  ;;  %v1150_v16 = vld [vmem:[#allocation7 + $0x20] sm:$0xff]  ;;  %v1186_v17 = vld [vmem:[#allocation7 + $0x58] sm:$0xff] }
 0x3bb   :  { %1125 = vmatpush.msrb.mxu0 %v1116_v20  ;;  %v1147_v20 = vld [vmem:[#allocation7 + $0x8] sm:$0xff] }
 0x3bd   :  { %3781 = vmatmul.msk.f32.gmra.mxu0 %vm690_vm1, %v5157_v43  ;;  %v1078_v43 = vld [vmem:[#allocation19 + $0x60] sm:$0xff] }
 0x3be   :  { %1085 = vmatpush.msrb.mxu3 %v1078_v43  ;;  %1126 = vmatpush.msrb.mxu0 %v1115_v25  ;;  %v1149_v43 = vld [vmem:[#allocation7 + $0x18] sm:$0xff]  ;;  %v1220_v25 = vld [vmem:[#allocation7 + $0xb0] sm:$0xff] }
 0x3c0   :  { %1086 = vmatpush.msrb.mxu3 %v1077_v19  ;;  %1127 = vmatpush.msrb.mxu0 %v1114_v31  ;;  %v1185_v19 = vld [vmem:[#allocation7 + $0x50] sm:$0xff]  ;;  %v1214_v31 = vld [vmem:[#allocation7 + $0x80] sm:$0xff] }
 0x3c2   :  { %1087 = vmatpush.msrb.mxu3 %v1076_v24  ;;  %1128 = vmatpush.msrb.mxu0 %v1113_v44  ;;  %v1221_v24 = vld [vmem:[#allocation7 + $0xb8] sm:$0xff] }
 0x3c4   :  { %1088 = vmatpush.msrb.mxu3 %v1075_v30  ;;  %1129 = vmatpush.msrb.mxu0 %v1112_v51  ;;  %v1215_v30 = vld [vmem:[#allocation7 + $0x88] sm:$0xff] }
 0x3c6   :  { %1089 = vmatpush.msrb.mxu3 %v1074_v36  ;;  %1130 = vmatpush.msrb.mxu0 %v1111_v55  ;;  %v1362_v55 = vld [vmem:[#allocation8 + $0x78] sm:$0xff] }
 0x3c8   :  { %1090 = vmatpush.msrb.mxu3 %v1073_v50  ;;  %1131 = vmatpush.msrb.mxu0 %v1110_v58  ;;  %v5193_v50 = vld [vmem:[#allocation22 + $0x8] sm:$0xff]  ;;  %v1361_v58 = vld [vmem:[#allocation8 + $0x70] sm:$0xff] }
 0x3ca   :  { %1091 = vmatpush.msrb.mxu3 %v1072_v54  ;;  %1132 = vmatpush.msrb.mxu0 %v1109_v63  ;;  %v1325_v54 = vld [vmem:[#allocation8 + $0x38] sm:$0xff]  ;;  %v1322_v63 = vld [vmem:[#allocation8 + $0x20] sm:$0xff] }
 0x3cc   :  { %1092 = vmatpush.msrb.mxu3 %v1071_v57  ;;  %1133 = vmatpush.msrb.mxu0 %v1108_v1  ;;  %v1324_v57 = vld [vmem:[#allocation8 + $0x30] sm:$0xff]  ;;  %v1390_v1 = vld [vmem:[#allocation8 + $0xa0] sm:$0xff] }
 0x3ce   :  { %1093 = vmatpush.msrb.mxu3 %v1070_v62  ;;  %1134 = vmatpush.msrb.mxu0 %v1107_v3  ;;  %v1391_v62 = vld [vmem:[#allocation8 + $0xa8] sm:$0xff]  ;;  %v1358_v3 = vld [vmem:[#allocation8 + $0x58] sm:$0xff] }
 0x3d0   :  { %1094 = vmatpush.msrb.mxu3 %v1069_v0  ;;  %1135 = vmatpush.msrb.mxu0 %v1106_v7  ;;  %v1359_v0 = vld [vmem:[#allocation8 + $0x60] sm:$0xff]  ;;  %v1388_v7 = vld [vmem:[#allocation8 + $0x90] sm:$0xff] }
 0x3d2   :  { %1095 = vmatpush.msrb.mxu3 %v1068_v2  ;;  %v1321_v2 = vld [vmem:[#allocation8 + $0x18] sm:$0xff] }
 0x3d4   :  { %1096 = vmatpush.msrb.mxu3 %v1067_v6  ;;  %v1357_v6 = vld [vmem:[#allocation8 + $0x50] sm:$0xff] }
 0x3d6   :  { %1097 = vmatpush.msrb.mxu3 %v1066_v8  ;;  %v1319_v8 = vld [vmem:[#allocation8 + $0x8] sm:$0xff] }
 0x421   :  { %v945_v40 = vpop.f32.mrf.mxu3 }
 0x422   :  { %v974_v9 = vpop.f32.mrf.mxu0  ;;  %v946_v26 = vadd.f32 %v945_v40, %v871_v35  ;;  %v1105_v35 = vld [vmem:[#allocation20] sm:$0xff]  ;;  %v1153_v40 = vld [vmem:[#allocation7 + $0x38] sm:$0xff] }
 0x423   :  { %1136 = vmatpush.msrb.mxu0 %v1105_v35  ;;  %v1356_v35 = vld [vmem:[#allocation8 + $0x48] sm:$0xff] }
 0x424   :  { %v986_v45 = vadd.f32 %v974_v9, %v946_v26  ;;  %v1190_v9 = vld [vmem:[#allocation7 + $0x78] sm:$0xff]  ;;  %v1219_v26 = vld [vmem:[#allocation7 + $0xa8] sm:$0xff] }
 0x425   :  { %1340 = vmatpush.msra.mxu0 %v1325_v54 }
 0x426   :  { %v994_v52 = vadd.f32 %v3939_v32, %v986_v45 }
 0x427   :  { %1341 = vmatpush.msra.mxu0 %v1324_v57 }
 0x428   :  { %v998_v59 = vmax.f32 %v994_v52, 0.0  ;;  %v5197_v52 = vld [vmem:[#allocation23] sm:$0xff] }
 0x429   :  { %v948_v37 = vpop.f32.mrf.mxu3 }
 0x42a   :  { %v977_v11 = vpop.f32.mrf.mxu0  ;;  %v949_v21 = vadd.f32 %v948_v37, %v874_v10  ;;  %v1152_v10 = vld [vmem:[#allocation7 + $0x30] sm:$0xff] }
 0x42b   :  { %v1189_v37 = vld [vmem:[#allocation7 + $0x70] sm:$0xff] }
 0x42c   :  { %v987_v33 = vadd.f32 %v977_v11, %v949_v21  ;;  %v1151_v11 = vld [vmem:[#allocation7 + $0x28] sm:$0xff] }
 0x42d   :  { %v1184_v21 = vld [vmem:[#allocation7 + $0x48] sm:$0xff] }
 0x42e   :  { %v995_v48 = vadd.f32 %v3939_v32, %v987_v33 }
 0x430   :  { %v999_v56 = vmax.f32 %v995_v48, 0.0  ;;  %v5189_v48 = vld [vmem:[#allocation22] sm:$0xff] }
 0x431   :  { %v951_v41 = vpop.f32.mrf.mxu3 }
 0x432   :  { %v980_v38 = vpop.f32.mrf.mxu0  ;;  %v952_v18 = vadd.f32 %v951_v41, %v877_v12  ;;  %v1188_v12 = vld [vmem:[#allocation7 + $0x68] sm:$0xff] }
 0x434   :  { %v988_v27 = vadd.f32 %v980_v38, %v952_v18  ;;  %v1148_v18 = vld [vmem:[#allocation7 + $0x10] sm:$0xff] }
 0x436   :  { %v996_v46 = vadd.f32 %v3939_v32, %v988_v27  ;;  %v1218_v27 = vld [vmem:[#allocation7 + $0xa0] sm:$0xff] }
 0x438   :  { %v1000_v53 = vmax.f32 %v996_v46, 0.0 }
 0x439   :  { %v954_v23 = vpop.f32.mrf.mxu3 }
 0x43a   :  { %v955_v28 = vadd.f32 %v954_v23, %v880_v22  ;;  %v983_v29 = vpop.f32.mrf.mxu0  ;;  %v1146_v22 = vld [vmem:[#allocation7] sm:$0xff] }
 0x43b   :  { %v1183_v23 = vld [vmem:[#allocation7 + $0x40] sm:$0xff] }
 0x43c   :  { %v989_v34 = vadd.f32 %v983_v29, %v955_v28  ;;  %v1217_v28 = vld [vmem:[#allocation7 + $0x98] sm:$0xff]  ;;  %v1216_v29 = vld [vmem:[#allocation7 + $0x90] sm:$0xff] }
 0x43e   :  { %v997_v47 = vadd.f32 %v3939_v32, %v989_v34 }
 0x440   :  { %v1001_v49 = vmax.f32 %v997_v47, 0.0 }
 0x442   :  { %1022 = vmatpush.msra.mxu1 %v1001_v49  ;;  %1053 = vmatpush.msra.mxu2 %v1001_v49 }
 0x444   :  { %1023 = vmatpush.msra.mxu1 %v1000_v53  ;;  %1054 = vmatpush.msra.mxu2 %v1000_v53  ;;  %v5201_v53 = vld [vmem:[#allocation23 + $0x8] sm:$0xff] }
 0x446   :  { %1024 = vmatpush.msra.mxu1 %v999_v56  ;;  %1055 = vmatpush.msra.mxu2 %v999_v56  ;;  %v1393_v56 = vld [vmem:[#allocation8 + $0xb8] sm:$0xff] }
 0x448   :  { %1025 = vmatpush.msra.mxu1 %v998_v59  ;;  %1056 = vmatpush.msra.mxu2 %v998_v59  ;;  %v1392_v59 = vld [vmem:[#allocation8 + $0xb0] sm:$0xff] }
 0x449   :  { %3784 = vmatmul.msk.f32.vlgmr.msra.gmra.mxu2 %vm690_vm1, %v1033_v60  ;;  %3782 = vmatmul.msk.f32.vlgmr.msra.gmra.mxu1 %vm690_vm1, %v1002_v61  ;;  %v1323_v60 = vld [vmem:[#allocation8 + $0x28] sm:$0xff] }
 0x44a   :  { %1168 = vmatpush.msrb.mxu1 %v1153_v40  ;;  %1199 = vmatpush.msrb.mxu2 %v1190_v9  ;;  %v1360_v61 = vld [vmem:[#allocation8 + $0x68] sm:$0xff]  ;;  %v1318_v9 = vld [vmem:[#allocation8] sm:$0xff] }
 0x44b   :  { %1342 = vmatpush.msra.mxu0 %v1323_v60  ;;  %v1387_v40 = vld [vmem:[#allocation8 + $0x88] sm:$0xff] }
 0x44c   :  { %1169 = vmatpush.msrb.mxu1 %v1152_v10  ;;  %1200 = vmatpush.msrb.mxu2 %v1189_v37  ;;  %v1355_v10 = vld [vmem:[#allocation8 + $0x40] sm:$0xff]  ;;  %v1497_v60 = vld [vmem:[#allocation26] sm:$0xff] }
 0x44d   :  { %1343 = vmatpush.msra.mxu0 %v1322_v63  ;;  %v1386_v37 = vld [vmem:[#allocation8 + $0x80] sm:$0xff]  ;;  %v1554_v63 = vld [vmem:[#allocation29 + $0x8] sm:$0xff] }
 0x44e   :  { %1170 = vmatpush.msrb.mxu1 %v1151_v11  ;;  %1201 = vmatpush.msrb.mxu2 %v1188_v12 }
 0x44f   :  { %1344 = vmatpush.msra.mxu0 %v1321_v2 }
 0x450   :  { %1171 = vmatpush.msrb.mxu1 %v1150_v16  ;;  %1202 = vmatpush.msrb.mxu2 %v1187_v39 }
 0x451   :  { %3785 = vmatmul.msk.f32.gmra.mxu2 %vm690_vm1, %v1034_v4  ;;  %3783 = vmatmul.msk.f32.gmra.mxu1 %vm690_vm1, %v1003_v5  ;;  %v1389_v4 = vld [vmem:[#allocation8 + $0x98] sm:$0xff]  ;;  %v1320_v5 = vld [vmem:[#allocation8 + $0x10] sm:$0xff] }
 0x452   :  { %1172 = vmatpush.msrb.mxu1 %v1149_v43  ;;  %1203 = vmatpush.msrb.mxu2 %v1186_v17 }
 0x453   :  { %1345 = vmatpush.msra.mxu0 %v1320_v5  ;;  %v1585_v5 = vld [vmem:[#allocation10 + $0x18] sm:$0xff] }
 0x454   :  { %1173 = vmatpush.msrb.mxu1 %v1148_v18  ;;  %1204 = vmatpush.msrb.mxu2 %v1185_v19 }
 0x455   :  { %1346 = vmatpush.msra.mxu0 %v1319_v8  ;;  %v1611_v8 = vld [vmem:[#allocation10 + $0x30] sm:$0xff] }
 0x456   :  { %1174 = vmatpush.msrb.mxu1 %v1147_v20  ;;  %1205 = vmatpush.msrb.mxu2 %v1184_v21 }
 0x457   :  { %1347 = vmatpush.msra.mxu0 %v1318_v9  ;;  %v1582_v9 = vld [vmem:[#allocation10] sm:$0xff] }
 0x458   :  { %1175 = vmatpush.msrb.mxu1 %v1146_v22  ;;  %1206 = vmatpush.msrb.mxu2 %v1183_v23 }
 0x45a   :  { %1230 = vmatpush.msra.mxu1 %v1221_v24 }
 0x45c   :  { %1231 = vmatpush.msra.mxu1 %v1220_v25  ;;  %v1529_v25 = vld [vmem:[#allocation28 + $0x38] sm:$0xff] }
 0x45e   :  { %1232 = vmatpush.msra.mxu1 %v1219_v26  ;;  %v1560_v26 = vld [vmem:[#allocation29 + $0x38] sm:$0xff] }
 0x460   :  { %1233 = vmatpush.msra.mxu1 %v1218_v27  ;;  %v1528_v27 = vld [vmem:[#allocation28 + $0x30] sm:$0xff] }
 0x462   :  { %1234 = vmatpush.msra.mxu1 %v1217_v28  ;;  %v1559_v28 = vld [vmem:[#allocation29 + $0x30] sm:$0xff] }
 0x464   :  { %1235 = vmatpush.msra.mxu1 %v1216_v29  ;;  %v1527_v29 = vld [vmem:[#allocation28 + $0x28] sm:$0xff] }
 0x466   :  { %1236 = vmatpush.msra.mxu1 %v1215_v30  ;;  %v1558_v30 = vld [vmem:[#allocation29 + $0x28] sm:$0xff] }
 0x468   :  { %1237 = vmatpush.msra.mxu1 %v1214_v31  ;;  %v1526_v31 = vld [vmem:[#allocation28 + $0x20] sm:$0xff] }
 0x4c6   :  { %v1027_v41 = vpop.f32.mrf.mxu1 }
 0x4cc   :  { %v1058_v13 = vpop.f32.mrf.mxu2 }
 0x4cd   :  { %v1064_v14 = vmax.f32 %v1027_v41, %v1058_v13 }
 0x4ce   :  { %v1030_v38 = vpop.f32.mrf.mxu1 }
 0x4cf   :  { %1098 = vmatmul.f32.vlgmr.msrb.gmra.mxu3 %v1064_v14  ;;  %1137 = vmatmul.f32.vlgmr.msrb.gmra.mxu0 %v1064_v14  ;;  %v3940_v14 = vld [vmem:[%s5466_s21] ss:$0 sm:$0xff] }
 0x4d4   :  { %v1061_v42 = vpop.f32.mrf.mxu2 }
 0x4d5   :  { %v1065_v15 = vmax.f32 %v1030_v38, %v1061_v42 }
 0x4d7   :  { %1101 = vmatmul.f32.gmra.mxu3 %v1065_v15  ;;  %1140 = vmatmul.f32.gmra.mxu0 %v1065_v15 }
 0x54c   :  { %v1138_v32 = vpop.f32.mrf.mxu0 }
 0x552   :  { %v1099_v33 = vpop.f32.mrf.mxu3 }
 0x553   :  { %v1144_v34 = vmax.f32 %v1099_v33, %v1138_v32  ;;  %v1557_v32 = vld [vmem:[#allocation29 + $0x20] sm:$0xff]  ;;  %v1525_v33 = vld [vmem:[#allocation28 + $0x18] sm:$0xff] }
 0x554   :  { %v1141_v36 = vpop.f32.mrf.mxu0 }
 0x555   :  { %3786 = vmatmul.msk.f32.vlgmr.msrb.gmra.mxu1 %vm570_vm0, %v1144_v34  ;;  %3788 = vmatmul.msk.f32.vlgmr.msrb.gmra.mxu2 %vm570_vm0, %v1144_v34 }
 0x556   :  { %1371 = vmatpush.msrb.mxu1 %v1362_v55 }
 0x558   :  { %1372 = vmatpush.msrb.mxu1 %v1361_v58 }
 0x55a   :  { %v1102_v44 = vpop.f32.mrf.mxu3  ;;  %1373 = vmatpush.msrb.mxu1 %v1360_v61  ;;  %v1473_v61 = vld [vmem:[#allocation25] sm:$0xff] }
 0x55b   :  { %v1145_v45 = vmax.f32 %v1102_v44, %v1141_v36  ;;  %v1524_v36 = vld [vmem:[#allocation28 + $0x10] sm:$0xff] }
 0x55c   :  { %1374 = vmatpush.msrb.mxu1 %v1359_v0  ;;  %v1555_v44 = vld [vmem:[#allocation29 + $0x10] sm:$0xff]  ;;  %v1522_v0 = vld [vmem:[#allocation28] sm:$0xff] }
 0x55d   :  { %3787 = vmatmul.msk.f32.gmra.mxu1 %vm570_vm0, %v1145_v45  ;;  %3789 = vmatmul.msk.f32.gmra.mxu2 %vm570_vm0, %v1145_v45 }
 0x55e   :  { %1375 = vmatpush.msrb.mxu1 %v1358_v3 }
 0x560   :  { %1376 = vmatpush.msrb.mxu1 %v1357_v6  ;;  %v1612_v6 = vld [vmem:[#allocation10 + $0x38] sm:$0xff] }
 0x562   :  { %1377 = vmatpush.msrb.mxu1 %v1356_v35  ;;  %v1583_v35 = vld [vmem:[#allocation10 + $0x8] sm:$0xff] }
 0x564   :  { %1378 = vmatpush.msrb.mxu1 %v1355_v10  ;;  %v1609_v10 = vld [vmem:[#allocation10 + $0x20] sm:$0xff] }
 0x565   :  { %3790 = vmatmul.msk.f32.vlgmr.msra.gmra.mxu1 %vm570_vm0, %v1144_v34  ;;  %v1556_v34 = vld [vmem:[#allocation29 + $0x18] sm:$0xff] }
 0x56d   :  { %3791 = vmatmul.msk.f32.gmra.mxu1 %vm570_vm0, %v1145_v45 }
 0x5d2   :  { %v1177_v46 = vpop.f32.mrf.mxu1 }
 0x5d8   :  { %v1208_v11 = vpop.f32.mrf.mxu2 }
 0x5da   :  { %v1180_v47 = vpop.f32.mrf.mxu1 }
 0x5db   :  { %1268 = vmatpush.msra.mxu2 %v1180_v47 }
 0x5dd   :  { %1269 = vmatpush.msra.mxu2 %v1177_v46 }
 0x5de   :  { %3792 = vmatmul.msk.f32.vlgmr.msra.gmra.mxu2 %vm1247_vm2, %v5189_v48 }
 0x5df   :  { %1402 = vmatpush.msrb.mxu2 %v1393_v56 }
 0x5e0   :  { %v1211_v12 = vpop.f32.mrf.mxu2 }
 0x5e1   :  { %1403 = vmatpush.msrb.mxu2 %v1392_v59 }
 0x5e2   :  { %v1239_v49 = vpop.f32.mrf.mxu1 }
 0x5e3   :  { %1404 = vmatpush.msrb.mxu2 %v1391_v62  ;;  %v1523_v62 = vld [vmem:[#allocation28 + $0x8] sm:$0xff] }
 0x5e5   :  { %1405 = vmatpush.msrb.mxu2 %v1390_v1  ;;  %v1553_v1 = vld [vmem:[#allocation29] sm:$0xff] }
 0x5e6   :  { %3793 = vmatmul.msk.f32.gmra.mxu2 %vm1247_vm2, %v5193_v50 }
 0x5e7   :  { %1406 = vmatpush.msrb.mxu2 %v1389_v4 }
 0x5e9   :  { %1407 = vmatpush.msrb.mxu2 %v1388_v7  ;;  %v1584_v7 = vld [vmem:[#allocation10 + $0x10] sm:$0xff] }
 0x5ea   :  { %v1242_v51 = vpop.f32.mrf.mxu1 }
 0x5eb   :  { %1299 = vmatpush.msra.mxu3 %v1242_v51  ;;  %1408 = vmatpush.msrb.mxu2 %v1387_v40  ;;  %v1610_v40 = vld [vmem:[#allocation10 + $0x28] sm:$0xff] }
 0x5ed   :  { %1300 = vmatpush.msra.mxu3 %v1239_v49  ;;  %1409 = vmatpush.msrb.mxu2 %v1386_v37  ;;  %v1636_v37 = vld [vmem:[#allocation10 + $0x58] sm:$0xff] }
 0x5ee   :  { %3794 = vmatmul.msk.f32.vlgmr.msra.gmra.mxu3 %vm1247_vm2, %v5197_v52 }
 0x5f6   :  { %3795 = vmatmul.msk.f32.gmra.mxu3 %vm1247_vm2, %v5201_v53 }
 0x661   :  { %v1271_v41 = vpop.f32.mrf.mxu2 }
 0x662   :  { %v1272_v13 = vadd.f32 %v1271_v41, %v1208_v11  ;;  %v1635_v11 = vld [vmem:[#allocation10 + $0x50] sm:$0xff]  ;;  %v1633_v41 = vld [vmem:[#allocation10 + $0x40] sm:$0xff] }
 0x669   :  { %v1274_v16 = vpop.f32.mrf.mxu2 }
 0x66a   :  { %v1275_v43 = vadd.f32 %v1274_v16, %v1211_v12  ;;  %v1634_v12 = vld [vmem:[#allocation10 + $0x48] sm:$0xff]  ;;  %v1682_v16 = vld [vmem:[#allocation32] sm:$0xff] }
 0x671   :  { %v1302_v38 = vpop.f32.mrf.mxu3 }
 0x672   :  { %v1308_v42 = vadd.f32 %v1302_v38, %v1272_v13 }
 0x674   :  { %v1314_v15 = vadd.f32 %v3940_v14, %v1308_v42  ;;  %v1657_v42 = vld [vmem:[#allocation31] sm:$0xff] }
 0x676   :  { %v1316_v39 = vmax.f32 %v1314_v15, 0.0 }
 0x678   :  { %3796 = vmatmul.msk.f32.vlgmr.msra.gmra.mxu0 %vm570_vm0, %v1316_v39  ;;  %3798 = vmatmul.msk.f32.vlgmr.msrb.gmra.mxu1 %vm570_vm0, %v1316_v39 }
 0x679   :  { %3800 = vmatmul.msk.f32.vlgmr.msrb.gmra.mxu2 %vm570_vm0, %v1316_v39  ;;  %v1305_v17 = vpop.f32.mrf.mxu3 }
 0x67a   :  { %v1309_v18 = vadd.f32 %v1305_v17, %v1275_v43  ;;  %v1716_v43 = vld [vmem:[#allocation11 + $0x18] sm:$0xff] }
 0x67b   :  { %v1743_v17 = vld [vmem:[#allocation11 + $0x38] sm:$0xff] }
 0x67c   :  { %v1315_v19 = vadd.f32 %v3940_v14, %v1309_v18  ;;  %v1767_v18 = vld [vmem:[#allocation11 + $0x58] sm:$0xff] }
 0x67e   :  { %v1317_v20 = vmax.f32 %v1315_v19, 0.0  ;;  %v1715_v19 = vld [vmem:[#allocation11 + $0x10] sm:$0xff] }
 0x680   :  { %3797 = vmatmul.msk.f32.gmra.mxu0 %vm570_vm0, %v1317_v20  ;;  %3799 = vmatmul.msk.f32.gmra.mxu1 %vm570_vm0, %v1317_v20 }
 0x681   :  { %3801 = vmatmul.msk.f32.gmra.mxu2 %vm570_vm0, %v1317_v20  ;;  %v1742_v20 = vld [vmem:[#allocation11 + $0x30] sm:$0xff] }
 0x6f5   :  { %v1349_v21 = vpop.f32.mrf.mxu0  ;;  %v1380_v45 = vpop.f32.mrf.mxu1 }
 0x6fc   :  { %v1411_v22 = vpop.f32.mrf.mxu2 }
 0x6fd   :  { %v1352_v23 = vpop.f32.mrf.mxu0  ;;  %v1383_v49 = vpop.f32.mrf.mxu1 }
 0x6fe   :  { %1431 = vmatpush.msrb.mxu3 %v1352_v23  ;;  %v1741_v23 = vld [vmem:[#allocation11 + $0x28] sm:$0xff] }
 0x700   :  { %1432 = vmatpush.msrb.mxu3 %v1349_v21  ;;  %v1766_v21 = vld [vmem:[#allocation11 + $0x50] sm:$0xff] }
 0x701   :  { %3802 = vmatmul.msk.f32.vlgmr.msrb.gmra.mxu3 %vm1247_vm2, %v5189_v48 }
 0x702   :  { %1541 = vmatpush.msra.mxu3 %v1529_v25  ;;  %v1713_v25 = vld [vmem:[#allocation11] sm:$0xff] }
 0x704   :  { %v1414_v24 = vpop.f32.mrf.mxu2  ;;  %1542 = vmatpush.msra.mxu3 %v1528_v27  ;;  %v1764_v27 = vld [vmem:[#allocation11 + $0x40] sm:$0xff] }
 0x705   :  { %1454 = vmatpush.msrb.mxu0 %v1414_v24  ;;  %v1765_v24 = vld [vmem:[#allocation11 + $0x48] sm:$0xff] }
 0x706   :  { %1543 = vmatpush.msra.mxu3 %v1527_v29 }
 0x707   :  { %1455 = vmatpush.msrb.mxu0 %v1411_v22  ;;  %v1714_v22 = vld [vmem:[#allocation11 + $0x8] sm:$0xff] }
 0x708   :  { %3804 = vmatmul.msk.f32.vlgmr.msrb.gmra.mxu0 %vm1247_vm2, %v5197_v52  ;;  %1544 = vmatpush.msra.mxu3 %v1526_v31  ;;  %v3941_v52 = vld [vmem:[%s5467_s22] ss:$0 sm:$0xff] }
 0x709   :  { %3803 = vmatmul.msk.f32.gmra.mxu3 %vm1247_vm2, %v5193_v50  ;;  %1569 = vmatpush.msra.mxu0 %v1560_v26  ;;  %v1740_v26 = vld [vmem:[#allocation11 + $0x20] sm:$0xff] }
 0x70a   :  { %1545 = vmatpush.msra.mxu3 %v1525_v33  ;;  %v3942_v31 = vld [vmem:[%s5468_s24] ss:$0 sm:$0xff] }
 0x70b   :  { %1570 = vmatpush.msra.mxu0 %v1559_v28 }
 0x70c   :  { %1546 = vmatpush.msra.mxu3 %v1524_v36 }
 0x70d   :  { %1571 = vmatpush.msra.mxu0 %v1558_v30 }
 0x70e   :  { %1547 = vmatpush.msra.mxu3 %v1523_v62  ;;  %v1884_v62 = vld [vmem:[#allocation37] sm:$0xff] }
 0x70f   :  { %1572 = vmatpush.msra.mxu0 %v1557_v32 }
 0x710   :  { %3805 = vmatmul.msk.f32.gmra.mxu0 %vm1247_vm2, %v5201_v53  ;;  %1548 = vmatpush.msra.mxu3 %v1522_v0 }
 0x711   :  { %1573 = vmatpush.msra.mxu0 %v1556_v34 }
 0x713   :  { %1574 = vmatpush.msra.mxu0 %v1555_v44 }
 0x715   :  { %1575 = vmatpush.msra.mxu0 %v1554_v63  ;;  %v1911_v63 = vld [vmem:[#allocation38] sm:$0xff] }
 0x717   :  { %1576 = vmatpush.msra.mxu0 %v1553_v1 }
 0x719   :  { %1732 = vmatpush.msrb.mxu0 %v1716_v43 }
 0x71b   :  { %1733 = vmatpush.msrb.mxu0 %v1715_v19  ;;  %v2060_v19 = vld [vmem:[#allocation41 + $0x230] sm:$0xff] }
 0x71d   :  { %1734 = vmatpush.msrb.mxu0 %v1714_v22  ;;  %v2039_v22 = vld [vmem:[#allocation41 + $0x188] sm:$0xff] }
 0x71f   :  { %1735 = vmatpush.msrb.mxu0 %v1713_v25  ;;  %v2062_v25 = vld [vmem:[#allocation41 + $0x240] sm:$0xff] }
 0x784   :  { %v1434_v46 = vpop.f32.mrf.mxu3 }
 0x785   :  { %v1457_v47 = vpop.f32.mrf.mxu0  ;;  %v1435_v48 = vadd.f32 %v1434_v46, %v1380_v45  ;;  %v1887_v46 = vld [vmem:[#allocation37 + $0x18] sm:$0xff] }
 0x787   :  { %v1463_v51 = vadd.f32 %v1457_v47, %v1435_v48  ;;  %v1914_v47 = vld [vmem:[#allocation38 + $0x18] sm:$0xff]  ;;  %v1886_v48 = vld [vmem:[#allocation37 + $0x10] sm:$0xff] }
 0x789   :  { %v1469_v56 = vadd.f32 %v3941_v52, %v1463_v51 }
 0x78b   :  { %v1471_v59 = vmax.f32 %v1469_v56, 0.0 }
 0x78c   :  { %v1437_v50 = vpop.f32.mrf.mxu3 }
 0x78d   :  { %v1438_v53 = vadd.f32 %v1437_v50, %v1383_v49  ;;  %v1460_v54 = vpop.f32.mrf.mxu0  ;;  %v1913_v49 = vld [vmem:[#allocation38 + $0x10] sm:$0xff] }
 0x78f   :  { %v1464_v55 = vadd.f32 %v1460_v54, %v1438_v53  ;;  %v3943_v54 = vld [vmem:[%s5469_s17] ss:$0 sm:$0xff] }
 0x791   :  { %v1470_v57 = vadd.f32 %v3941_v52, %v1464_v55 }
 0x793   :  { %v1472_v58 = vmax.f32 %v1470_v57, 0.0 }
 0x795   :  { %1491 = vmatpush.msra.mxu1 %v1472_v58  ;;  %1515 = vmatpush.msra.mxu2 %v1472_v58  ;;  %v1859_v58 = vld [vmem:[#allocation35] sm:$0xf] }
 0x797   :  { %1492 = vmatpush.msra.mxu1 %v1471_v59  ;;  %1516 = vmatpush.msra.mxu2 %v1471_v59  ;;  %v1835_v59 = vld [vmem:[#allocation34] sm:$0xf] }
 0x798   :  { %3807 = vmatmul.msk.f32.vlgmr.msra.gmra.mxu2 %vm1247_vm2, %v1497_v60  ;;  %3806 = vmatmul.msk.f32.vlgmr.msra.gmra.mxu1 %vm1247_vm2, %v1473_v61  ;;  %v1885_v60 = vld [vmem:[#allocation37 + $0x8] sm:$0xff] }
 0x799   :  { %1601 = vmatpush.msrb.mxu1 %v1585_v5  ;;  %1625 = vmatpush.msrb.mxu2 %v1612_v6  ;;  %v1912_v61 = vld [vmem:[#allocation38 + $0x8] sm:$0xff] }
 0x79b   :  { %1602 = vmatpush.msrb.mxu1 %v1584_v7  ;;  %1626 = vmatpush.msrb.mxu2 %v1611_v8  ;;  %v2006_v8 = vld [vmem:[#allocation40 + $0x2] sm:$0x3] }
 0x79d   :  { %1603 = vmatpush.msrb.mxu1 %v1583_v35  ;;  %1627 = vmatpush.msrb.mxu2 %v1610_v40  ;;  %v1936_v35 = vld [vmem:[#allocation40] sm:$0x3]  ;;  %v2052_v40 = vld [vmem:[#allocation41 + $0x1f0] sm:$0xff] }
 0x79f   :  { %1604 = vmatpush.msrb.mxu1 %v1582_v9  ;;  %1628 = vmatpush.msrb.mxu2 %v1609_v10  ;;  %v2053_v9 = vld [vmem:[#allocation41 + $0x1f8] sm:$0xff]  ;;  %v2030_v10 = vld [vmem:[#allocation41 + $0x140] sm:$0xff] }
 0x7a1   :  { %1649 = vmatpush.msra.mxu1 %v1636_v37  ;;  %v2031_v37 = vld [vmem:[#allocation41 + $0x148] sm:$0xff] }
 0x7a3   :  { %1650 = vmatpush.msra.mxu1 %v1635_v11  ;;  %v2032_v11 = vld [vmem:[#allocation41 + $0x150] sm:$0xff] }
 0x7a5   :  { %1651 = vmatpush.msra.mxu1 %v1634_v12  ;;  %v2033_v12 = vld [vmem:[#allocation41 + $0x158] sm:$0xff] }
 0x7a7   :  { %1652 = vmatpush.msra.mxu1 %v1633_v41  ;;  %v2054_v41 = vld [vmem:[#allocation41 + $0x200] sm:$0xff] }
 0x815   :  { %v1494_v2 = vpop.f32.mrf.mxu1 }
 0x81b   :  { %v1518_v3 = vpop.f32.mrf.mxu2 }
 0x81c   :  { %v1521_v4 = vmax.f32 %v1494_v2, %v1518_v3  ;;  %v2050_v3 = vld [vmem:[#allocation41 + $0x1e0] sm:$0xff] }
 0x81e   :  { %3808 = vmatmul.msk.f32.vlgmr.msra.gmra.mxu3 %vm570_vm0, %v1521_v4  ;;  %3809 = vmatmul.msk.f32.vlgmr.msra.gmra.mxu0 %vm570_vm0, %v1521_v4  ;;  %v2051_v4 = vld [vmem:[#allocation41 + $0x1e8] sm:$0xff] }
 0x89b   :  { %v1578_v13 = vpop.f32.mrf.mxu0 }
 0x8a1   :  { %v1550_v14 = vpop.f32.mrf.mxu3 }
 0x8a2   :  { %v1581_v38 = vmax.f32 %v1550_v14, %v1578_v13  ;;  %v2055_v13 = vld [vmem:[#allocation41 + $0x208] sm:$0xff]  ;;  %v2056_v14 = vld [vmem:[#allocation41 + $0x210] sm:$0xff] }
 0x8a4   :  { %3810 = vmatmul.msk.f32.vlgmr.msrb.gmra.mxu1 %vm690_vm1, %v1581_v38  ;;  %3811 = vmatmul.msk.f32.vlgmr.msrb.gmra.mxu2 %vm690_vm1, %v1581_v38 }
 0x8a5   :  { %1756 = vmatpush.msrb.mxu1 %v1743_v17  ;;  %v2058_v17 = vld [vmem:[#allocation41 + $0x220] sm:$0xff] }
 0x8a7   :  { %1757 = vmatpush.msrb.mxu1 %v1742_v20  ;;  %v2061_v20 = vld [vmem:[#allocation41 + $0x238] sm:$0xff] }
 0x8a9   :  { %1758 = vmatpush.msrb.mxu1 %v1741_v23  ;;  %v2040_v23 = vld [vmem:[#allocation41 + $0x190] sm:$0xff] }
 0x8ab   :  { %1759 = vmatpush.msrb.mxu1 %v1740_v26  ;;  %v2063_v26 = vld [vmem:[#allocation41 + $0x248] sm:$0xff] }
 0x8ac   :  { %3812 = vmatmul.msk.f32.vlgmr.msra.gmra.mxu1 %vm690_vm1, %v1581_v38  ;;  %v2057_v38 = vld [vmem:[#allocation41 + $0x218] sm:$0xff] }
 0x921   :  { %v1606_v15 = vpop.f32.mrf.mxu1 }
 0x922   :  { %1677 = vmatpush.msra.mxu2 %v1606_v15  ;;  %v2035_v15 = vld [vmem:[#allocation41 + $0x168] sm:$0xff] }
 0x923   :  { %3813 = vmatmul.msk.f32.vlgmr.msra.gmra.mxu2 %vm1658_vm3, %v1657_v42 }
 0x924   :  { %1780 = vmatpush.msrb.mxu2 %v1767_v18  ;;  %v2059_v18 = vld [vmem:[#allocation41 + $0x228] sm:$0xff] }
 0x926   :  { %1781 = vmatpush.msrb.mxu2 %v1766_v21  ;;  %v2038_v21 = vld [vmem:[#allocation41 + $0x180] sm:$0xff] }
 0x927   :  { %v1630_v28 = vpop.f32.mrf.mxu2 }
 0x928   :  { %1782 = vmatpush.msrb.mxu2 %v1765_v24  ;;  %v2041_v24 = vld [vmem:[#allocation41 + $0x198] sm:$0xff] }
 0x929   :  { %v1654_v39 = vpop.f32.mrf.mxu1 }
 0x92a   :  { %1701 = vmatpush.msrb.mxu3 %v1654_v39  ;;  %1783 = vmatpush.msrb.mxu2 %v1764_v27  ;;  %v2037_v39 = vld [vmem:[#allocation41 + $0x178] sm:$0xff]  ;;  %v2064_v27 = vld [vmem:[#allocation41 + $0x250] sm:$0xff] }
 0x92b   :  { %3814 = vmatmul.msk.f32.vlgmr.msrb.gmra.mxu3 %vm1658_vm3, %v1682_v16 }
 0x9a6   :  { %v1679_v29 = vpop.f32.mrf.mxu2 }
 0x9a7   :  { %v1680_v30 = vadd.f32 %v1679_v29, %v1630_v28  ;;  %v2065_v28 = vld [vmem:[#allocation41 + $0x258] sm:$0xff]  ;;  %v2042_v29 = vld [vmem:[#allocation41 + $0x1a0] sm:$0xff] }
 0x9ae   :  { %v1703_v32 = vpop.f32.mrf.mxu3 }
 0x9af   :  { %v1706_v33 = vadd.f32 %v1703_v32, %v1680_v30  ;;  %v2043_v30 = vld [vmem:[#allocation41 + $0x1a8] sm:$0xff]  ;;  %v2045_v32 = vld [vmem:[#allocation41 + $0x1b8] sm:$0xff] }
 0x9b1   :  { %v1711_v34 = vadd.f32 %v3942_v31, %v1706_v33  ;;  %v2044_v31 = vld [vmem:[#allocation41 + $0x1b0] sm:$0xff]  ;;  %v2066_v33 = vld [vmem:[#allocation41 + $0x260] sm:$0xff] }
 0x9b3   :  { %v1712_v36 = vmax.f32 %v1711_v34, 0.0  ;;  %v2067_v34 = vld [vmem:[#allocation41 + $0x268] sm:$0xff] }
 0x9b5   :  { %3815 = vmatmul.msk.f32.vlgmr.msrb.gmra.mxu0 %vm690_vm1, %v1712_v36  ;;  %3816 = vmatmul.msk.f32.vlgmr.msrb.gmra.mxu1 %vm690_vm1, %v1712_v36 }
 0x9b6   :  { %3817 = vmatmul.msk.f32.vlgmr.msrb.gmra.mxu2 %vm690_vm1, %v1712_v36  ;;  %v2068_v36 = vld [vmem:[#allocation41 + $0x270] sm:$0xff] }
 0xa32   :  { %v1737_v44 = vpop.f32.mrf.mxu0  ;;  %v1761_v50 = vpop.f32.mrf.mxu1 }
 0xa33   :  { %1803 = vmatpush.msra.mxu3 %v1737_v44  ;;  %v2069_v44 = vld [vmem:[#allocation41 + $0x278] sm:$0xff] }
 0xa34   :  { %3818 = vmatmul.msk.f32.vlgmr.msra.gmra.mxu3 %vm1658_vm3, %v1657_v42  ;;  %v2034_v42 = vld [vmem:[#allocation41 + $0x160] sm:$0xff] }
 0xa35   :  { %1903 = vmatpush.msrb.mxu3 %v1887_v46  ;;  %v2047_v46 = vld [vmem:[#allocation41 + $0x1c8] sm:$0xff] }
 0xa37   :  { %1904 = vmatpush.msrb.mxu3 %v1886_v48  ;;  %v2049_v48 = vld [vmem:[#allocation41 + $0x1d8] sm:$0xff] }
 0xa39   :  { %v1785_v45 = vpop.f32.mrf.mxu2  ;;  %1905 = vmatpush.msrb.mxu3 %v1885_v60  ;;  %v1992_v60 = vld [vmem:[#allocation41 + $0xd8] sm:$0xff] }
 0xa3a   :  { %1823 = vmatpush.msra.mxu0 %v1785_v45  ;;  %v2046_v45 = vld [vmem:[#allocation41 + $0x1c0] sm:$0xff] }
 0xa3b   :  { %3819 = vmatmul.msk.f32.vlgmr.msra.gmra.mxu0 %vm1658_vm3, %v1682_v16  ;;  %1906 = vmatpush.msrb.mxu3 %v1884_v62  ;;  %v2036_v16 = vld [vmem:[#allocation41 + $0x170] sm:$0xff]  ;;  %v1970_v62 = vld [vmem:[#allocation41 + $0x28] sm:$0xff] }
 0xa3c   :  { %1927 = vmatpush.msrb.mxu0 %v1914_v47  ;;  %v2048_v47 = vld [vmem:[#allocation41 + $0x1d0] sm:$0xff] }
 0xa3d   :  { %2087 = vmatpush.msra.mxu3 %v2050_v3  ;;  %v1994_v3 = vld [vmem:[#allocation41 + $0xe8] sm:$0xff] }
 0xa3e   :  { %1928 = vmatpush.msrb.mxu0 %v1913_v49  ;;  %v1985_v49 = vld [vmem:[#allocation41 + $0xa0] sm:$0xff] }
 0xa3f   :  { %2088 = vmatpush.msra.mxu3 %v2030_v10  ;;  %v1999_v10 = vld [vmem:[#allocation41 + $0x110] sm:$0xff] }
 0xa40   :  { %1929 = vmatpush.msrb.mxu0 %v1912_v61  ;;  %v1969_v61 = vld [vmem:[#allocation41 + $0x20] sm:$0xff] }
 0xa42   :  { %1930 = vmatpush.msrb.mxu0 %v1911_v63  ;;  %v1971_v63 = vld [vmem:[#allocation41 + $0x30] sm:$0xff] }
 0xa44   :  { %2107 = vmatpush.msra.mxu0 %v2051_v4  ;;  %v1995_v4 = vld [vmem:[#allocation41 + $0xf0] sm:$0xff] }
 0xa46   :  { %2108 = vmatpush.msra.mxu0 %v2031_v37  ;;  %v2000_v37 = vld [vmem:[#allocation41 + $0x118] sm:$0xff] }
 0xab7   :  { %v1805_v51 = vpop.f32.mrf.mxu3 }
 0xab8   :  { %v1806_v52 = vadd.f32 %v1805_v51, %v1761_v50  ;;  %v1825_v53 = vpop.f32.mrf.mxu0  ;;  %v1986_v50 = vld [vmem:[#allocation41 + $0xa8] sm:$0xff]  ;;  %v1987_v51 = vld [vmem:[#allocation41 + $0xb0] sm:$0xff] }
 0xaba   :  { %v1828_v55 = vadd.f32 %v1825_v53, %v1806_v52  ;;  %v1988_v52 = vld [vmem:[#allocation41 + $0xb8] sm:$0xff]  ;;  %v1965_v53 = vld [vmem:[#allocation41] sm:$0xff] }
 0xabc   :  { %v1833_v56 = vadd.f32 %v3943_v54, %v1828_v55  ;;  %v1966_v54 = vld [vmem:[#allocation41 + $0x8] sm:$0xff]  ;;  %v1967_v55 = vld [vmem:[#allocation41 + $0x10] sm:$0xff] }
 0xabe   :  { %v1834_v57 = vmax.f32 %v1833_v56, 0.0  ;;  %v1968_v56 = vld [vmem:[#allocation41 + $0x18] sm:$0xff] }
 0xac0   :  { %1854 = vmatpush.msra.mxu1 %v1834_v57  ;;  %1878 = vmatpush.msra.mxu2 %v1834_v57  ;;  %v1989_v57 = vld [vmem:[#allocation41 + $0xc0] sm:$0xff] }
 0xac1   :  { %3821 = vmatmul.msk.f32.vlgmr.msra.gmra.mxu2 %vm1658_vm3, %v1859_v58  ;;  %3820 = vmatmul.msk.f32.vlgmr.msra.gmra.mxu1 %vm1658_vm3, %v1835_v59  ;;  %v1990_v58 = vld [vmem:[#allocation41 + $0xc8] sm:$0xff]  ;;  %v1991_v59 = vld [vmem:[#allocation41 + $0xd0] sm:$0xff] }
 0xb3e   :  { %v1856_v0 = vpop.f32.mrf.mxu1 }
 0xb44   :  { %v1880_v1 = vpop.f32.mrf.mxu2 }
 0xb45   :  { %v1883_v2 = vmax.f32 %v1856_v0, %v1880_v1  ;;  %v1972_v0 = vld [vmem:[#allocation41 + $0x38] sm:$0xff] }
 0xb47   :  { %3822 = vmatmul.msk.f32.vlgmr.msrb.gmra.mxu3 %vm690_vm1, %v1883_v2  ;;  %3823 = vmatmul.msk.f32.vlgmr.msrb.gmra.mxu0 %vm690_vm1, %v1883_v2  ;;  %v1993_v2 = vld [vmem:[#allocation41 + $0xe0] sm:$0xff] }
 0xb48   :  { %2167 = vmatpush.msrb.mxu3 %v2054_v41  ;;  %2187 = vmatpush.msrb.mxu0 %v2055_v13  ;;  %v1979_v41 = vld [vmem:[#allocation41 + $0x70] sm:$0xff]  ;;  %v1980_v13 = vld [vmem:[#allocation41 + $0x78] sm:$0xff] }
 0xb4a   :  { %2168 = vmatpush.msrb.mxu3 %v2034_v42  ;;  %2188 = vmatpush.msrb.mxu0 %v2035_v15  ;;  %v2003_v42 = vld [vmem:[#allocation41 + $0x130] sm:$0xff]  ;;  %v2004_v15 = vld [vmem:[#allocation41 + $0x138] sm:$0xff] }
 0xbc4   :  { %v1932_v5 = vpop.f32.mrf.mxu0 }
 0xbca   :  { %v1908_v6 = vpop.f32.mrf.mxu3 }
 0xbcb   :  { %v1935_v7 = vmax.f32 %v1908_v6, %v1932_v5  ;;  %v1996_v5 = vld [vmem:[#allocation41 + $0xf8] sm:$0xff]  ;;  %v1973_v6 = vld [vmem:[#allocation41 + $0x40] sm:$0xff] }
 0xbcd   :  { %3824 = vmatpush.msk.msrb.mxu1 %vm1941_vm4, %v1935_v7  ;;  %3826 = vmatpush.msk.msrb.mxu2 %vm1941_vm4, %v1935_v7  ;;  %v1974_v7 = vld [vmem:[#allocation41 + $0x48] sm:$0xff] }
 0xbce   :  { %3827 = vmatmul.msk.f32.vlgmr.msrb.gmra.mxu2 %vm1937_vm5, %v2006_v8  ;;  %3825 = vmatmul.msk.f32.vlgmr.msrb.gmra.mxu1 %vm1937_vm5, %v1936_v35  ;;  %v1975_v8 = vld [vmem:[#allocation41 + $0x50] sm:$0xff]  ;;  %v1976_v35 = vld [vmem:[#allocation41 + $0x58] sm:$0xff] }
 0xbcf   :  { %2127 = vmatpush.msra.mxu1 %v2052_v40  ;;  %2147 = vmatpush.msra.mxu2 %v2053_v9  ;;  %v1997_v40 = vld [vmem:[#allocation41 + $0x100] sm:$0xff]  ;;  %v1998_v9 = vld [vmem:[#allocation41 + $0x108] sm:$0xff] }
 0xbd1   :  { %2128 = vmatpush.msra.mxu1 %v2032_v11  ;;  %2148 = vmatpush.msra.mxu2 %v2033_v12  ;;  %v1977_v11 = vld [vmem:[#allocation41 + $0x60] sm:$0xff]  ;;  %v1978_v12 = vld [vmem:[#allocation41 + $0x68] sm:$0xff] }
 0xbd3   :  { %2207 = vmatpush.msrb.mxu1 %v2056_v14  ;;  %2227 = vmatpush.msrb.mxu2 %v2057_v38  ;;  %v2001_v14 = vld [vmem:[#allocation41 + $0x120] sm:$0xff]  ;;  %v2002_v38 = vld [vmem:[#allocation41 + $0x128] sm:$0xff] }
 0xbd5   :  { %2208 = vmatpush.msrb.mxu1 %v2036_v16  ;;  %2228 = vmatpush.msrb.mxu2 %v2037_v39  ;;  %v1981_v16 = vld [vmem:[#allocation41 + $0x80] sm:$0xff]  ;;  %v1982_v39 = vld [vmem:[#allocation41 + $0x88] sm:$0xff] }
 0xc4b   :  { %v5283_v1 = vpop.f32.mrf.mxu1 }
 0xc51   :  { %v5241_v43 = vpop.f32.mrf.mxu2 }
 0xc52   :  { %3828 = vmatmul.msk.f32.vlgmr.msra.gmra.mxu3 %vm1247_vm2, %v5241_v43  ;;  %3829 = vmatmul.msk.f32.vlgmr.msra.gmra.mxu0 %vm1247_vm2, %v5241_v43 }
 0xc53   :  { %3830 = vmatmul.msk.f32.vlgmr.msra.gmra.mxu1 %vm1247_vm2, %v5241_v43  ;;  %3831 = vmatmul.msk.f32.vlgmr.msra.gmra.mxu2 %vm1247_vm2, %v5241_v43 }
 0xc54   :  { %2247 = vmatpush.msra.mxu3 %v2058_v17  ;;  %2267 = vmatpush.msra.mxu0 %v2059_v18  ;;  %v1984_v17 = vld [vmem:[#allocation41 + $0x98] sm:$0xff] }
 0xc55   :  { %2287 = vmatpush.msra.mxu1 %v2060_v19  ;;  %2307 = vmatpush.msra.mxu2 %v2061_v20  ;;  %v2993_v18 = vld [vmem:[#allocation43 + $0xf8] sm:$0xff] }
 0xc56   :  { %2248 = vmatpush.msra.mxu3 %v2038_v21  ;;  %2268 = vmatpush.msra.mxu0 %v2039_v22  ;;  %v3009_v19 = vld [vmem:[#allocation43 + $0x178] sm:$0xff]  ;;  %v2992_v22 = vld [vmem:[#allocation43 + $0xf0] sm:$0xff] }
 0xc57   :  { %2288 = vmatpush.msra.mxu1 %v2040_v23  ;;  %2308 = vmatpush.msra.mxu2 %v2041_v24  ;;  %v2977_v20 = vld [vmem:[#allocation43 + $0x78] sm:$0xff]  ;;  %v3008_v23 = vld [vmem:[#allocation43 + $0x170] sm:$0xff] }
 0xc58   :  { %v3025_v21 = vld [vmem:[#allocation43 + $0x1f8] sm:$0xff]  ;;  %v2976_v24 = vld [vmem:[#allocation43 + $0x70] sm:$0xff] }
 0xc5a   :  { %3832 = vmatmul.msk.f32.vlgmr.msrb.gmra.mxu3 %vm1247_vm2, %v5241_v43  ;;  %3833 = vmatmul.msk.f32.vlgmr.msrb.gmra.mxu0 %vm1247_vm2, %v5241_v43 }
 0xc5b   :  { %3834 = vmatmul.msk.f32.vlgmr.msrb.gmra.mxu1 %vm1247_vm2, %v5241_v43  ;;  %3835 = vmatmul.msk.f32.vlgmr.msrb.gmra.mxu2 %vm1247_vm2, %v5241_v43 }
 0xc5c   :  { %2327 = vmatpush.msrb.mxu3 %v2062_v25  ;;  %2347 = vmatpush.msrb.mxu0 %v2063_v26  ;;  %v3024_v25 = vld [vmem:[#allocation43 + $0x1f0] sm:$0xff]  ;;  %v2991_v26 = vld [vmem:[#allocation43 + $0xe8] sm:$0xff] }
 0xc5d   :  { %2367 = vmatpush.msrb.mxu1 %v2064_v27  ;;  %2387 = vmatpush.msrb.mxu2 %v2065_v28  ;;  %v3007_v27 = vld [vmem:[#allocation43 + $0x168] sm:$0xff] }
 0xc5e   :  { %2328 = vmatpush.msrb.mxu3 %v2042_v29  ;;  %2348 = vmatpush.msrb.mxu0 %v2043_v30  ;;  %v2975_v28 = vld [vmem:[#allocation43 + $0x68] sm:$0xff]  ;;  %v2990_v30 = vld [vmem:[#allocation43 + $0xe0] sm:$0xff] }
 0xc5f   :  { %2368 = vmatpush.msrb.mxu1 %v2044_v31  ;;  %2388 = vmatpush.msrb.mxu2 %v2045_v32  ;;  %v3023_v29 = vld [vmem:[#allocation43 + $0x1e8] sm:$0xff]  ;;  %v3006_v31 = vld [vmem:[#allocation43 + $0x160] sm:$0xff] }
 0xc60   :  { %v2974_v32 = vld [vmem:[#allocation43 + $0x60] sm:$0xff] }
 0xc62   :  { %3836 = vmatmul.msk.f32.vlgmr.msra.gmra.mxu3 %vm1247_vm2, %v5241_v43  ;;  %3837 = vmatmul.msk.f32.vlgmr.msra.gmra.mxu0 %vm1247_vm2, %v5241_v43 }
 0xc63   :  { %3838 = vmatmul.msk.f32.vlgmr.msra.gmra.mxu1 %vm1247_vm2, %v5241_v43  ;;  %3839 = vmatmul.msk.f32.vlgmr.msra.gmra.mxu2 %vm1247_vm2, %v5241_v43 }
 0xc64   :  { %2407 = vmatpush.msra.mxu3 %v2066_v33  ;;  %2427 = vmatpush.msra.mxu0 %v2067_v34  ;;  %v3022_v33 = vld [vmem:[#allocation43 + $0x1e0] sm:$0xff]  ;;  %v2989_v34 = vld [vmem:[#allocation43 + $0xd8] sm:$0xff] }
 0xc65   :  { %2447 = vmatpush.msra.mxu1 %v2068_v36  ;;  %2467 = vmatpush.msra.mxu2 %v2069_v44  ;;  %v3005_v36 = vld [vmem:[#allocation43 + $0x158] sm:$0xff] }
 0xc66   :  { %2408 = vmatpush.msra.mxu3 %v2046_v45  ;;  %2428 = vmatpush.msra.mxu0 %v2047_v46  ;;  %v2973_v44 = vld [vmem:[#allocation43 + $0x58] sm:$0xff]  ;;  %v2988_v46 = vld [vmem:[#allocation43 + $0xd0] sm:$0xff] }
 0xc67   :  { %2448 = vmatpush.msra.mxu1 %v2048_v47  ;;  %2468 = vmatpush.msra.mxu2 %v2049_v48  ;;  %v3021_v45 = vld [vmem:[#allocation43 + $0x1d8] sm:$0xff]  ;;  %v3004_v47 = vld [vmem:[#allocation43 + $0x150] sm:$0xff]  ;;  %v2987_v48 = vld [vmem:[#allocation43 + $0xc8] sm:$0xff] }
 0xc6a   :  { %3840 = vmatmul.msk.f32.vlgmr.msrb.gmra.mxu3 %vm1247_vm2, %v5241_v43  ;;  %3841 = vmatmul.msk.f32.vlgmr.msrb.gmra.mxu0 %vm1247_vm2, %v5241_v43 }
 0xc6b   :  { %3842 = vmatmul.msk.f32.vlgmr.msrb.gmra.mxu1 %vm1247_vm2, %v5241_v43  ;;  %3843 = vmatmul.msk.f32.vlgmr.msrb.gmra.mxu2 %vm1247_vm2, %v5241_v43 }
 0xc6c   :  { %2490 = vmatpush.msrb.mxu3 %v1985_v49  ;;  %2510 = vmatpush.msrb.mxu0 %v1986_v50  ;;  %v3003_v49 = vld [vmem:[#allocation43 + $0x148] sm:$0xff]  ;;  %v2986_v50 = vld [vmem:[#allocation43 + $0xc0] sm:$0xff] }
 0xc6d   :  { %2530 = vmatpush.msrb.mxu1 %v1987_v51  ;;  %2550 = vmatpush.msrb.mxu2 %v1988_v52  ;;  %v3002_v51 = vld [vmem:[#allocation43 + $0x140] sm:$0xff]  ;;  %v2972_v52 = vld [vmem:[#allocation43 + $0x50] sm:$0xff] }
 0xc6e   :  { %2491 = vmatpush.msrb.mxu3 %v1965_v53  ;;  %2511 = vmatpush.msrb.mxu0 %v1966_v54  ;;  %v2985_v53 = vld [vmem:[#allocation43 + $0xb8] sm:$0xff] }
 0xc6f   :  { %2531 = vmatpush.msrb.mxu1 %v1967_v55  ;;  %2551 = vmatpush.msrb.mxu2 %v1968_v56  ;;  %v3001_v54 = vld [vmem:[#allocation43 + $0x138] sm:$0xff]  ;;  %v3020_v55 = vld [vmem:[#allocation43 + $0x1d0] sm:$0xff]  ;;  %v2971_v56 = vld [vmem:[#allocation43 + $0x48] sm:$0xff] }
 0xc72   :  { %3844 = vmatmul.msk.f32.vlgmr.msra.gmra.mxu3 %vm1247_vm2, %v5241_v43  ;;  %3845 = vmatmul.msk.f32.vlgmr.msra.gmra.mxu0 %vm1247_vm2, %v5241_v43 }
 0xc73   :  { %3846 = vmatmul.msk.f32.vlgmr.msra.gmra.mxu1 %vm1247_vm2, %v5241_v43  ;;  %3847 = vmatmul.msk.f32.vlgmr.msra.gmra.mxu2 %vm1247_vm2, %v5241_v43  ;;  %v1983_v43 = vld [vmem:[#allocation41 + $0x90] sm:$0xff] }
 0xc74   :  { %2570 = vmatpush.msra.mxu3 %v1989_v57  ;;  %2590 = vmatpush.msra.mxu0 %v1990_v58  ;;  %v2984_v57 = vld [vmem:[#allocation43 + $0xb0] sm:$0xff] }
 0xc75   :  { %2610 = vmatpush.msra.mxu1 %v1991_v59  ;;  %2630 = vmatpush.msra.mxu2 %v1992_v60  ;;  %v3000_v58 = vld [vmem:[#allocation43 + $0x130] sm:$0xff]  ;;  %v3019_v59 = vld [vmem:[#allocation43 + $0x1c8] sm:$0xff]  ;;  %v2970_v60 = vld [vmem:[#allocation43 + $0x40] sm:$0xff] }
 0xc76   :  { %2571 = vmatpush.msra.mxu3 %v1969_v61  ;;  %2591 = vmatpush.msra.mxu0 %v1970_v62  ;;  %v2983_v61 = vld [vmem:[#allocation43 + $0xa8] sm:$0xff] }
 0xc77   :  { %2611 = vmatpush.msra.mxu1 %v1971_v63  ;;  %2631 = vmatpush.msra.mxu2 %v1972_v0  ;;  %v2999_v62 = vld [vmem:[#allocation43 + $0x128] sm:$0xff]  ;;  %v3018_v63 = vld [vmem:[#allocation43 + $0x1c0] sm:$0xff]  ;;  %v2969_v0 = vld [vmem:[#allocation43 + $0x38] sm:$0xff] }
 0xc7a   :  { %3848 = vmatmul.msk.f32.vlgmr.msrb.gmra.mxu3 %vm1247_vm2, %v5283_v1  ;;  %3849 = vmatmul.msk.f32.vlgmr.msrb.gmra.mxu0 %vm1247_vm2, %v5283_v1 }
 0xc7b   :  { %3850 = vmatmul.msk.f32.vlgmr.msrb.gmra.mxu1 %vm1247_vm2, %v5283_v1  ;;  %3851 = vmatmul.msk.f32.vlgmr.msrb.gmra.mxu2 %vm1247_vm2, %v5283_v1 }
 0xc7c   :  { %2650 = vmatpush.msrb.mxu3 %v1993_v2  ;;  %2670 = vmatpush.msrb.mxu0 %v1994_v3  ;;  %v2998_v2 = vld [vmem:[#allocation43 + $0x120] sm:$0xff]  ;;  %v3017_v3 = vld [vmem:[#allocation43 + $0x1b8] sm:$0xff] }
 0xc7d   :  { %2690 = vmatpush.msrb.mxu1 %v1995_v4  ;;  %2710 = vmatpush.msrb.mxu2 %v1996_v5  ;;  %v2968_v4 = vld [vmem:[#allocation43 + $0x30] sm:$0xff]  ;;  %v2981_v5 = vld [vmem:[#allocation43 + $0x98] sm:$0xff] }
 0xc7e   :  { %2651 = vmatpush.msrb.mxu3 %v1973_v6  ;;  %2671 = vmatpush.msrb.mxu0 %v1974_v7  ;;  %v2997_v6 = vld [vmem:[#allocation43 + $0x118] sm:$0xff]  ;;  %v3016_v7 = vld [vmem:[#allocation43 + $0x1b0] sm:$0xff] }
 0xc7f   :  { %2691 = vmatpush.msrb.mxu1 %v1975_v8  ;;  %2711 = vmatpush.msrb.mxu2 %v1976_v35  ;;  %v2967_v8 = vld [vmem:[#allocation43 + $0x28] sm:$0xff]  ;;  %v2980_v35 = vld [vmem:[#allocation43 + $0x90] sm:$0xff] }
 0xc82   :  { %3852 = vmatmul.msk.f32.vlgmr.msra.gmra.mxu3 %vm1247_vm2, %v5283_v1  ;;  %3853 = vmatmul.msk.f32.vlgmr.msra.gmra.mxu0 %vm1247_vm2, %v5283_v1 }
 0xc83   :  { %3854 = vmatmul.msk.f32.vlgmr.msra.gmra.mxu1 %vm1247_vm2, %v5283_v1  ;;  %3855 = vmatmul.msk.f32.vlgmr.msra.gmra.mxu2 %vm1247_vm2, %v5283_v1 }
 0xc84   :  { %2730 = vmatpush.msra.mxu3 %v1997_v40  ;;  %2750 = vmatpush.msra.mxu0 %v1998_v9  ;;  %v2996_v40 = vld [vmem:[#allocation43 + $0x110] sm:$0xff]  ;;  %v3015_v9 = vld [vmem:[#allocation43 + $0x1a8] sm:$0xff] }
 0xc85   :  { %2770 = vmatpush.msra.mxu1 %v1999_v10  ;;  %2790 = vmatpush.msra.mxu2 %v2000_v37  ;;  %v2966_v10 = vld [vmem:[#allocation43 + $0x20] sm:$0xff]  ;;  %v2979_v37 = vld [vmem:[#allocation43 + $0x88] sm:$0xff] }
 0xc86   :  { %2731 = vmatpush.msra.mxu3 %v1977_v11  ;;  %2751 = vmatpush.msra.mxu0 %v1978_v12  ;;  %v2995_v11 = vld [vmem:[#allocation43 + $0x108] sm:$0xff]  ;;  %v3014_v12 = vld [vmem:[#allocation43 + $0x1a0] sm:$0xff] }
 0xc87   :  { %2771 = vmatpush.msra.mxu1 %v1979_v41  ;;  %2791 = vmatpush.msra.mxu2 %v1980_v13  ;;  %v2965_v41 = vld [vmem:[#allocation43 + $0x18] sm:$0xff]  ;;  %v2978_v13 = vld [vmem:[#allocation43 + $0x80] sm:$0xff] }
 0xc8a   :  { %3856 = vmatmul.msk.f32.vlgmr.msrb.gmra.mxu3 %vm1247_vm2, %v5283_v1  ;;  %3857 = vmatmul.msk.f32.vlgmr.msrb.gmra.mxu0 %vm1247_vm2, %v5283_v1 }
 0xc8b   :  { %3858 = vmatmul.msk.f32.vlgmr.msrb.gmra.mxu1 %vm1247_vm2, %v5283_v1  ;;  %3859 = vmatmul.msk.f32.vlgmr.msrb.gmra.mxu2 %vm1247_vm2, %v5283_v1 }
 0xc8c   :  { %2810 = vmatpush.msrb.mxu3 %v2001_v14  ;;  %2830 = vmatpush.msrb.mxu0 %v2002_v38  ;;  %v2994_v14 = vld [vmem:[#allocation43 + $0x100] sm:$0xff]  ;;  %v3013_v38 = vld [vmem:[#allocation43 + $0x198] sm:$0xff] }
 0xc8d   :  { %2850 = vmatpush.msrb.mxu1 %v2003_v42  ;;  %2870 = vmatpush.msrb.mxu2 %v2004_v15  ;;  %v3057_v42 = vld [vmem:[#allocation43 + $0x2f8] sm:$0xff] }
 0xc8e   :  { %2811 = vmatpush.msrb.mxu3 %v1981_v16  ;;  %2831 = vmatpush.msrb.mxu0 %v1982_v39  ;;  %v3073_v15 = vld [vmem:[#allocation43 + $0x378] sm:$0xff]  ;;  %v2964_v16 = vld [vmem:[#allocation43 + $0x10] sm:$0xff] }
 0xc8f   :  { %2851 = vmatpush.msrb.mxu1 %v1983_v43  ;;  %2871 = vmatpush.msrb.mxu2 %v1984_v17  ;;  %v3012_v39 = vld [vmem:[#allocation43 + $0x190] sm:$0xff] }
 0xc90   :  { %v3056_v43 = vld [vmem:[#allocation43 + $0x2f0] sm:$0xff] }
 0xc91   :  { %v3072_v17 = vld [vmem:[#allocation43 + $0x370] sm:$0xff] }
 0xc92   :  { %3860 = vmatmul.msk.f32.vlgmr.msra.gmra.mxu3 %vm1247_vm2, %v5283_v1  ;;  %3861 = vmatmul.msk.f32.vlgmr.msra.gmra.mxu0 %vm1247_vm2, %v5283_v1 }
 0xc93   :  { %3862 = vmatmul.msk.f32.vlgmr.msra.gmra.mxu1 %vm1247_vm2, %v5283_v1  ;;  %3863 = vmatmul.msk.f32.vlgmr.msra.gmra.mxu2 %vm1247_vm2, %v5283_v1 }
 0xc94   :  { %3306 = vmatpush.msra.mxu0 %v2993_v18  ;;  %3326 = vmatpush.msra.mxu1 %v3009_v19  ;;  %v2963_v18 = vld [vmem:[#allocation43 + $0x8] sm:$0xff] }
 0xc95   :  { %3286 = vmatpush.msra.mxu3 %v2977_v20  ;;  %3346 = vmatpush.msra.mxu2 %v3025_v21  ;;  %v3011_v19 = vld [vmem:[#allocation43 + $0x188] sm:$0xff] }
 0xc96   :  { %3307 = vmatpush.msra.mxu0 %v2992_v22  ;;  %3327 = vmatpush.msra.mxu1 %v3008_v23  ;;  %v3055_v20 = vld [vmem:[#allocation43 + $0x2e8] sm:$0xff]  ;;  %v2962_v22 = vld [vmem:[#allocation43] sm:$0xff] }
 0xc97   :  { %3287 = vmatpush.msra.mxu3 %v2976_v24  ;;  %3347 = vmatpush.msra.mxu2 %v3024_v25  ;;  %v3071_v21 = vld [vmem:[#allocation43 + $0x368] sm:$0xff]  ;;  %v3010_v23 = vld [vmem:[#allocation43 + $0x180] sm:$0xff]  ;;  %v3041_v24 = vld [vmem:[#allocation43 + $0x278] sm:$0xff] }
 0xc98   :  { %3308 = vmatpush.msra.mxu0 %v2991_v26  ;;  %3328 = vmatpush.msra.mxu1 %v3007_v27  ;;  %v3054_v25 = vld [vmem:[#allocation43 + $0x2e0] sm:$0xff]  ;;  %v3089_v27 = vld [vmem:[#allocation43 + $0x3f8] sm:$0xff] }
 0xc99   :  { %3288 = vmatpush.msra.mxu3 %v2975_v28  ;;  %3348 = vmatpush.msra.mxu2 %v3023_v29  ;;  %v3070_v26 = vld [vmem:[#allocation43 + $0x360] sm:$0xff]  ;;  %v3040_v28 = vld [vmem:[#allocation43 + $0x270] sm:$0xff]  ;;  %v3053_v29 = vld [vmem:[#allocation43 + $0x2d8] sm:$0xff] }
 0xc9a   :  { %3864 = vmatmul.msk.f32.vlgmr.msrb.gmra.mxu3 %vm1247_vm2, %v5283_v1  ;;  %3865 = vmatmul.msk.f32.vlgmr.msrb.gmra.mxu0 %vm1247_vm2, %v5283_v1 }
 0xc9b   :  { %3866 = vmatmul.msk.f32.vlgmr.msrb.gmra.mxu1 %vm1247_vm2, %v5283_v1  ;;  %3867 = vmatmul.msk.f32.vlgmr.msrb.gmra.mxu2 %vm1247_vm2, %v5283_v1  ;;  %v2982_v1 = vld [vmem:[#allocation43 + $0xa0] sm:$0xff] }
 0xc9c   :  { %3309 = vmatpush.msra.mxu0 %v2990_v30  ;;  %3329 = vmatpush.msra.mxu1 %v3006_v31  ;;  %v3069_v30 = vld [vmem:[#allocation43 + $0x358] sm:$0xff]  ;;  %v3088_v31 = vld [vmem:[#allocation43 + $0x3f0] sm:$0xff] }
 0xc9d   :  { %3289 = vmatpush.msra.mxu3 %v2974_v32  ;;  %3349 = vmatpush.msra.mxu2 %v3022_v33  ;;  %v3039_v32 = vld [vmem:[#allocation43 + $0x268] sm:$0xff]  ;;  %v3052_v33 = vld [vmem:[#allocation43 + $0x2d0] sm:$0xff] }
 0xc9e   :  { %3310 = vmatpush.msra.mxu0 %v2989_v34  ;;  %3330 = vmatpush.msra.mxu1 %v3005_v36  ;;  %v3068_v34 = vld [vmem:[#allocation43 + $0x350] sm:$0xff]  ;;  %v3087_v36 = vld [vmem:[#allocation43 + $0x3e8] sm:$0xff] }
 0xc9f   :  { %3290 = vmatpush.msra.mxu3 %v2973_v44  ;;  %3350 = vmatpush.msra.mxu2 %v3021_v45  ;;  %v3038_v44 = vld [vmem:[#allocation43 + $0x260] sm:$0xff]  ;;  %v3051_v45 = vld [vmem:[#allocation43 + $0x2c8] sm:$0xff] }
 0xca0   :  { %3311 = vmatpush.msra.mxu0 %v2988_v46  ;;  %3331 = vmatpush.msra.mxu1 %v3004_v47  ;;  %v3067_v46 = vld [vmem:[#allocation43 + $0x348] sm:$0xff]  ;;  %v3086_v47 = vld [vmem:[#allocation43 + $0x3e0] sm:$0xff] }
 0xca1   :  { %3291 = vmatpush.msra.mxu3 %v2972_v52  ;;  %3351 = vmatpush.msra.mxu2 %v3020_v55  ;;  %v3065_v55 = vld [vmem:[#allocation43 + $0x338] sm:$0xff] }
 0xca2   :  { %3312 = vmatpush.msra.mxu0 %v2987_v48  ;;  %3332 = vmatpush.msra.mxu1 %v3003_v49  ;;  %v3037_v48 = vld [vmem:[#allocation43 + $0x258] sm:$0xff]  ;;  %v3050_v49 = vld [vmem:[#allocation43 + $0x2c0] sm:$0xff] }
 0xca3   :  { %3292 = vmatpush.msra.mxu3 %v2971_v56  ;;  %3352 = vmatpush.msra.mxu2 %v3019_v59  ;;  %v3048_v59 = vld [vmem:[#allocation43 + $0x2b0] sm:$0xff] }
 0xca4   :  { %3313 = vmatpush.msra.mxu0 %v2986_v50  ;;  %3333 = vmatpush.msra.mxu1 %v3002_v51  ;;  %v3066_v50 = vld [vmem:[#allocation43 + $0x340] sm:$0xff]  ;;  %v3085_v51 = vld [vmem:[#allocation43 + $0x3d8] sm:$0xff] }
 0xca5   :  { %3293 = vmatpush.msra.mxu3 %v2970_v60  ;;  %3353 = vmatpush.msra.mxu2 %v3018_v63  ;;  %v3064_v60 = vld [vmem:[#allocation43 + $0x330] sm:$0xff]  ;;  %v3047_v63 = vld [vmem:[#allocation43 + $0x2a8] sm:$0xff] }
 0xca6   :  { %3314 = vmatpush.msra.mxu0 %v2985_v53  ;;  %3334 = vmatpush.msra.mxu1 %v3001_v54  ;;  %v3036_v53 = vld [vmem:[#allocation43 + $0x250] sm:$0xff]  ;;  %v3049_v54 = vld [vmem:[#allocation43 + $0x2b8] sm:$0xff] }
 0xca7   :  { %3294 = vmatpush.msra.mxu3 %v2969_v0  ;;  %3354 = vmatpush.msra.mxu2 %v3017_v3  ;;  %v3063_v0 = vld [vmem:[#allocation43 + $0x328] sm:$0xff]  ;;  %v3033_v3 = vld [vmem:[#allocation43 + $0x238] sm:$0xff] }
 0xca8   :  { %3315 = vmatpush.msra.mxu0 %v2984_v57  ;;  %3335 = vmatpush.msra.mxu1 %v3000_v58  ;;  %v3084_v57 = vld [vmem:[#allocation43 + $0x3d0] sm:$0xff]  ;;  %v3035_v58 = vld [vmem:[#allocation43 + $0x248] sm:$0xff] }
 0xca9   :  { %3295 = vmatpush.msra.mxu3 %v2968_v4  ;;  %3355 = vmatpush.msra.mxu2 %v3016_v7  ;;  %v3046_v4 = vld [vmem:[#allocation43 + $0x2a0] sm:$0xff]  ;;  %v3081_v7 = vld [vmem:[#allocation43 + $0x3b8] sm:$0xff] }
 0xcaa   :  { %3316 = vmatpush.msra.mxu0 %v2983_v61  ;;  %3336 = vmatpush.msra.mxu1 %v2999_v62  ;;  %v3083_v61 = vld [vmem:[#allocation43 + $0x3c8] sm:$0xff]  ;;  %v3034_v62 = vld [vmem:[#allocation43 + $0x240] sm:$0xff] }
 0xcab   :  { %3296 = vmatpush.msra.mxu3 %v2967_v8  ;;  %3356 = vmatpush.msra.mxu2 %v3015_v9  ;;  %v3061_v9 = vld [vmem:[#allocation43 + $0x318] sm:$0xff] }
 0xcac   :  { %3317 = vmatpush.msra.mxu0 %v2982_v1  ;;  %3337 = vmatpush.msra.mxu1 %v2998_v2  ;;  %v3082_v1 = vld [vmem:[#allocation43 + $0x3c0] sm:$0xff] }
 0xcad   :  { %3297 = vmatpush.msra.mxu3 %v2966_v10  ;;  %3357 = vmatpush.msra.mxu2 %v3014_v12  ;;  %v3044_v12 = vld [vmem:[#allocation43 + $0x290] sm:$0xff] }
 0xcae   :  { %3318 = vmatpush.msra.mxu0 %v2981_v5  ;;  %3338 = vmatpush.msra.mxu1 %v2997_v6  ;;  %v3062_v5 = vld [vmem:[#allocation43 + $0x320] sm:$0xff] }
 0xcaf   :  { %3298 = vmatpush.msra.mxu3 %v2965_v41  ;;  %3358 = vmatpush.msra.mxu2 %v3013_v38  ;;  %v3060_v41 = vld [vmem:[#allocation43 + $0x310] sm:$0xff]  ;;  %v3043_v38 = vld [vmem:[#allocation43 + $0x288] sm:$0xff] }
 0xcb0   :  { %3319 = vmatpush.msra.mxu0 %v2980_v35  ;;  %3339 = vmatpush.msra.mxu1 %v2996_v40  ;;  %v3032_v35 = vld [vmem:[#allocation43 + $0x230] sm:$0xff]  ;;  %v3045_v40 = vld [vmem:[#allocation43 + $0x298] sm:$0xff] }
 0xcb1   :  { %3299 = vmatpush.msra.mxu3 %v2964_v16  ;;  %3359 = vmatpush.msra.mxu2 %v3012_v39  ;;  %v3029_v39 = vld [vmem:[#allocation43 + $0x218] sm:$0xff] }
 0xcb2   :  { %3320 = vmatpush.msra.mxu0 %v2979_v37  ;;  %3340 = vmatpush.msra.mxu1 %v2995_v11  ;;  %v3080_v37 = vld [vmem:[#allocation43 + $0x3b0] sm:$0xff]  ;;  %v3031_v11 = vld [vmem:[#allocation43 + $0x228] sm:$0xff] }
 0xcb3   :  { %3300 = vmatpush.msra.mxu3 %v2963_v18  ;;  %3360 = vmatpush.msra.mxu2 %v3011_v19  ;;  %v3077_v19 = vld [vmem:[#allocation43 + $0x398] sm:$0xff] }
 0xcb4   :  { %3321 = vmatpush.msra.mxu0 %v2978_v13  ;;  %3341 = vmatpush.msra.mxu1 %v2994_v14  ;;  %v3079_v13 = vld [vmem:[#allocation43 + $0x3a8] sm:$0xff]  ;;  %v3030_v14 = vld [vmem:[#allocation43 + $0x220] sm:$0xff] }
 0xcb5   :  { %3301 = vmatpush.msra.mxu3 %v2962_v22  ;;  %3361 = vmatpush.msra.mxu2 %v3010_v23  ;;  %v3028_v22 = vld [vmem:[#allocation43 + $0x210] sm:$0xff] }
 0xcb6   :  { %3386 = vmatpush.msrb.mxu0 %v3057_v42  ;;  %3406 = vmatpush.msrb.mxu1 %v3073_v15  ;;  %v3059_v42 = vld [vmem:[#allocation43 + $0x308] sm:$0xff]  ;;  %v3078_v15 = vld [vmem:[#allocation43 + $0x3a0] sm:$0xff]  ;;  %v3076_v23 = vld [vmem:[#allocation43 + $0x390] sm:$0xff] }
 0xcb7   :  { %3366 = vmatpush.msrb.mxu3 %v3041_v24  ;;  %3426 = vmatpush.msrb.mxu2 %v3089_v27  ;;  %v3027_v24 = vld [vmem:[#allocation43 + $0x208] sm:$0xff]  ;;  %v3074_v27 = vld [vmem:[#allocation43 + $0x380] sm:$0xff] }
 0xcb8   :  { %3387 = vmatpush.msrb.mxu0 %v3056_v43  ;;  %3407 = vmatpush.msrb.mxu1 %v3072_v17  ;;  %v3042_v43 = vld [vmem:[#allocation43 + $0x280] sm:$0xff] }
 0xcb9   :  { %3367 = vmatpush.msrb.mxu3 %v3040_v28  ;;  %3427 = vmatpush.msrb.mxu2 %v3088_v31  ;;  %v3058_v17 = vld [vmem:[#allocation43 + $0x300] sm:$0xff] }
 0xcba   :  { %3388 = vmatpush.msrb.mxu0 %v3055_v20  ;;  %3408 = vmatpush.msrb.mxu1 %v3071_v21 }
 0xcbb   :  { %3368 = vmatpush.msrb.mxu3 %v3039_v32  ;;  %3428 = vmatpush.msrb.mxu2 %v3087_v36 }
 0xcbc   :  { %3389 = vmatpush.msrb.mxu0 %v3054_v25  ;;  %3409 = vmatpush.msrb.mxu1 %v3070_v26  ;;  %v3075_v25 = vld [vmem:[#allocation43 + $0x388] sm:$0xff]  ;;  %v3026_v26 = vld [vmem:[#allocation43 + $0x200] sm:$0xff] }
 0xcbd   :  { %3369 = vmatpush.msrb.mxu3 %v3038_v44  ;;  %3429 = vmatpush.msrb.mxu2 %v3086_v47  ;;  %v5362_v44 = vld [vmem:[%s4890_s29] sm:$0xff] }
 0xcbe   :  { %3390 = vmatpush.msrb.mxu0 %v3053_v29  ;;  %3410 = vmatpush.msrb.mxu1 %v3069_v30  ;;  %v2883_v47 = vperm.slane %v5362_v44, 1 }
 0xcbf   :  { %3370 = vmatpush.msrb.mxu3 %v3037_v48  ;;  %3430 = vmatpush.msrb.mxu2 %v3085_v51 }
 0xcc0   :  { %3391 = vmatpush.msrb.mxu0 %v3052_v33  ;;  %3411 = vmatpush.msrb.mxu1 %v3068_v34 }
 0xcc1   :  { %3371 = vmatpush.msrb.mxu3 %v3036_v53  ;;  %3431 = vmatpush.msrb.mxu2 %v3084_v57 }
 0xcc2   :  { %3392 = vmatpush.msrb.mxu0 %v3051_v45  ;;  %3412 = vmatpush.msrb.mxu1 %v3067_v46 }
 0xcc3   :  { %3372 = vmatpush.msrb.mxu3 %v3035_v58  ;;  %3432 = vmatpush.msrb.mxu2 %v3083_v61  ;;  %v2882_v58 = vperm.slane %v5362_v44, 0 }
 0xcc4   :  { %3393 = vmatpush.msrb.mxu0 %v3050_v49  ;;  %3413 = vmatpush.msrb.mxu1 %v3066_v50  ;;  %v2884_v49 = vperm.slane %v5362_v44, 2 }
 0xcc5   :  { %3373 = vmatpush.msrb.mxu3 %v3034_v62  ;;  %3433 = vmatpush.msrb.mxu2 %v3082_v1  ;;  %v2885_v62 = vperm.slane %v5362_v44, 3 }
 0xcc6   :  { %3394 = vmatpush.msrb.mxu0 %v3049_v54  ;;  %3414 = vmatpush.msrb.mxu1 %v3065_v55 }
 0xcc7   :  { %3374 = vmatpush.msrb.mxu3 %v3033_v3  ;;  %3434 = vmatpush.msrb.mxu2 %v3081_v7  ;;  %v3120_v3 = vld [vmem:[#allocation43 + $0x4f0] sm:$0xff] }
 0xcc8   :  { %3395 = vmatpush.msrb.mxu0 %v3048_v59  ;;  %3415 = vmatpush.msrb.mxu1 %v3064_v60  ;;  %v3121_v59 = vld [vmem:[#allocation43 + $0x4f8] sm:$0xff]  ;;  %v3136_v7 = vld [vmem:[#allocation43 + $0x570] sm:$0xff] }
 0xcc9   :  { %3375 = vmatpush.msrb.mxu3 %v3032_v35  ;;  %3435 = vmatpush.msrb.mxu2 %v3080_v37  ;;  %v3119_v37 = vld [vmem:[#allocation43 + $0x4e8] sm:$0xff] }
 0xcca   :  { %3396 = vmatpush.msrb.mxu0 %v3047_v63  ;;  %3416 = vmatpush.msrb.mxu1 %v3063_v0  ;;  %v3137_v63 = vld [vmem:[#allocation43 + $0x578] sm:$0xff] }
 0xccb   :  { %3376 = vmatpush.msrb.mxu3 %v3031_v11  ;;  %3436 = vmatpush.msrb.mxu2 %v3079_v13 }
 0xccc   :  { %3397 = vmatpush.msrb.mxu0 %v3046_v4  ;;  %3417 = vmatpush.msrb.mxu1 %v3062_v5  ;;  %v2888_v5 = vperm.slane %v5362_v44, 6 }
 0xccd   :  { %3377 = vmatpush.msrb.mxu3 %v3030_v14  ;;  %3437 = vmatpush.msrb.mxu2 %v3078_v15  ;;  %v3134_v15 = vld [vmem:[#allocation43 + $0x560] sm:$0xff] }
 0xcce   :  { %3398 = vmatpush.msrb.mxu0 %v3045_v40  ;;  %3418 = vmatpush.msrb.mxu1 %v3061_v9 }
 0xccf   :  { %v5325_v52 = vpop.f32.mrf.mxu0  ;;  %3378 = vmatpush.msrb.mxu3 %v3029_v39  ;;  %3438 = vmatpush.msrb.mxu2 %v3077_v19  ;;  %v2889_v19 = vperm.slane %v5362_v44, 7 }
 0xcd0   :  { %v5327_v56 = vpop.f32.mrf.mxu1  ;;  %3399 = vmatpush.msrb.mxu0 %v3044_v12  ;;  %3419 = vmatpush.msrb.mxu1 %v3060_v41  ;;  %v3135_v12 = vld [vmem:[#allocation43 + $0x568] sm:$0xff] }
 0xcd1   :  { %3379 = vmatpush.msrb.mxu3 %v3028_v22  ;;  %3439 = vmatpush.msrb.mxu2 %v3076_v23  ;;  %v3104_v22 = vld [vmem:[#allocation43 + $0x470] sm:$0xff] }
 0xcd2   :  { %3400 = vmatpush.msrb.mxu0 %v3043_v38  ;;  %3420 = vmatpush.msrb.mxu1 %v3059_v42  ;;  %v3118_v42 = vld [vmem:[#allocation43 + $0x4e0] sm:$0xff] }
 0xcd3   :  { %3380 = vmatpush.msrb.mxu3 %v3027_v24  ;;  %3440 = vmatpush.msrb.mxu2 %v3075_v25  ;;  %v3117_v25 = vld [vmem:[#allocation43 + $0x4d8] sm:$0xff] }
 0xcd4   :  { %3401 = vmatpush.msrb.mxu0 %v3042_v43  ;;  %3421 = vmatpush.msrb.mxu1 %v3058_v17  ;;  %v2886_v43 = vperm.slane %v5362_v44, 4 }
 0xcd5   :  { %v5329_v2 = vpop.f32.mrf.mxu3  ;;  %3381 = vmatpush.msrb.mxu3 %v3026_v26  ;;  %3441 = vmatpush.msrb.mxu2 %v3074_v27  ;;  %v3133_v26 = vld [vmem:[#allocation43 + $0x558] sm:$0xff] }
 0xcd6   :  { %v5331_v6 = vpop.f32.mrf.mxu2 }
 0xcd7   :  { %v5333_v8 = vpop.f32.mrf.mxu0 }
 0xcd8   :  { %v5335_v10 = vpop.f32.mrf.mxu1 }
 0xcdd   :  { %v5337_v16 = vpop.f32.mrf.mxu3 }
 0xcde   :  { %v5339_v18 = vpop.f32.mrf.mxu2 }
 0xcdf   :  { %v5341_v20 = vpop.f32.mrf.mxu0 }
 0xce0   :  { %v5343_v21 = vpop.f32.mrf.mxu1 }
 0xce5   :  { %v5345_v28 = vpop.f32.mrf.mxu3 }
 0xce6   :  { %v5347_v29 = vpop.f32.mrf.mxu2 }
 0xce7   :  { %v5349_v30 = vpop.f32.mrf.mxu0 }
 0xce8   :  { %v5351_v31 = vpop.f32.mrf.mxu1 }
 0xced   :  { %v5353_v32 = vpop.f32.mrf.mxu3 }
 0xcee   :  { %v5355_v33 = vpop.f32.mrf.mxu2 }
 0xcef   :  { %v5357_v34 = vpop.f32.mrf.mxu0 }
 0xcf0   :  { %v5359_v36 = vpop.f32.mrf.mxu1 }
 0xcf5   :  { %v5364_v45 = vpop.f32.mrf.mxu3 }
 0xcf6   :  { %v5366_v46 = vpop.f32.mrf.mxu2 }
 0xcf7   :  { %v2513_v48 = vpop.f32.mrf.mxu0 }
 0xcf8   :  { %v2514_v50 = vadd.f32 %v2513_v48, %v5325_v52  ;;  %v2533_v51 = vpop.f32.mrf.mxu1  ;;  %v2887_v52 = vperm.slane %v5362_v44, 5  ;;  %v3103_v48 = vld [vmem:[#allocation43 + $0x468] sm:$0xff] }
 0xcf9   :  { %v2534_v53 = vadd.f32 %v2533_v51, %v5327_v56  ;;  %v3132_v51 = vld [vmem:[#allocation43 + $0x550] sm:$0xff] }
 0xcfa   :  { %v2923_v54 = vadd.f32 %v2883_v47, %v2514_v50  ;;  %v3152_v47 = vld [vmem:[#allocation43 + $0x5f0] sm:$0xff] }
 0xcfb   :  { %v2924_v55 = vadd.f32 %v2884_v49, %v2534_v53  ;;  %v3116_v50 = vld [vmem:[#allocation43 + $0x4d0] sm:$0xff]  ;;  %v3151_v53 = vld [vmem:[#allocation43 + $0x5e8] sm:$0xff] }
 0xcfc   :  { %v2943_v57 = vmax.f32 %v2923_v54, 0.0  ;;  %v3102_v54 = vld [vmem:[#allocation43 + $0x460] sm:$0xff] }
 0xcfd   :  { %v2944_v60 = vmax.f32 %v2924_v55, 0.0  ;;  %v2493_v61 = vpop.f32.mrf.mxu3  ;;  %v3115_v55 = vld [vmem:[#allocation43 + $0x4c8] sm:$0xff] }
 0xcfe   :  { %v2494_v0 = vadd.f32 %v2493_v61, %v5329_v2  ;;  %v2553_v1 = vpop.f32.mrf.mxu2  ;;  %3322 = vmatmul.f32.vlgmr.msra.gmra.mxu0 %v2943_v57  ;;  %v3131_v57 = vld [vmem:[#allocation43 + $0x548] sm:$0xff]  ;;  %v3130_v61 = vld [vmem:[#allocation43 + $0x540] sm:$0xff] }
 0xcff   :  { %v2554_v56 = vadd.f32 %v2553_v1, %v5331_v6  ;;  %3342 = vmatmul.f32.vlgmr.msra.gmra.mxu1 %v2944_v60  ;;  %3466 = vmatpush.msra.mxu0 %v3121_v59  ;;  %v2593_v4 = vpop.f32.mrf.mxu0  ;;  %v3105_v6 = vld [vmem:[#allocation43 + $0x478] sm:$0xff]  ;;  %v3114_v60 = vld [vmem:[#allocation43 + $0x4c0] sm:$0xff] }
 0xd00   :  { %v2922_v35 = vadd.f32 %v2882_v58, %v2494_v0  ;;  %3486 = vmatpush.msra.mxu1 %v3137_v63  ;;  %v2594_v40 = vadd.f32 %v2593_v4, %v5333_v8  ;;  %v2613_v9 = vpop.f32.mrf.mxu1  ;;  %v3153_v8 = vld [vmem:[#allocation43 + $0x5f8] sm:$0xff]  ;;  %v3100_v63 = vld [vmem:[#allocation43 + $0x450] sm:$0xff] }
 0xd01   :  { %v2925_v2 = vadd.f32 %v2885_v62, %v2554_v56  ;;  %v2614_v11 = vadd.f32 %v2613_v9, %v5335_v10  ;;  %3467 = vmatpush.msra.mxu0 %v3120_v3  ;;  %v3101_v59 = vld [vmem:[#allocation43 + $0x458] sm:$0xff]  ;;  %v3099_v3 = vld [vmem:[#allocation43 + $0x448] sm:$0xff]  ;;  %v3112_v56 = vld [vmem:[#allocation43 + $0x4b0] sm:$0xff] }
 0xd02   :  { %v2942_v41 = vmax.f32 %v2922_v35, 0.0  ;;  %v2927_v13 = vadd.f32 %v2887_v52, %v2594_v40  ;;  %3487 = vmatpush.msra.mxu1 %v3136_v7  ;;  %v3149_v62 = vld [vmem:[#allocation43 + $0x5d8] sm:$0xff]  ;;  %v3148_v52 = vld [vmem:[#allocation43 + $0x5d0] sm:$0xff]  ;;  %v3098_v7 = vld [vmem:[#allocation43 + $0x440] sm:$0xff] }
 0xd03   :  { %v2945_v14 = vmax.f32 %v2925_v2, 0.0  ;;  %v2928_v38 = vadd.f32 %v2888_v5, %v2614_v11  ;;  %3468 = vmatpush.msra.mxu0 %v3119_v37  ;;  %v3113_v0 = vld [vmem:[#allocation43 + $0x4b8] sm:$0xff]  ;;  %v3128_v4 = vld [vmem:[#allocation43 + $0x530] sm:$0xff]  ;;  %v3147_v5 = vld [vmem:[#allocation43 + $0x5c8] sm:$0xff] }
 0xd04   :  { %v2947_v39 = vmax.f32 %v2927_v13, 0.0  ;;  %3488 = vmatpush.msra.mxu1 %v3135_v12  ;;  %3302 = vmatmul.f32.vlgmr.msra.gmra.mxu3 %v2942_v41  ;;  %v3129_v1 = vld [vmem:[#allocation43 + $0x538] sm:$0xff]  ;;  %v3111_v35 = vld [vmem:[#allocation43 + $0x4a8] sm:$0xff]  ;;  %v3146_v2 = vld [vmem:[#allocation43 + $0x5c0] sm:$0xff] }
 0xd05   :  { %v2948_v17 = vmax.f32 %v2928_v38, 0.0  ;;  %3362 = vmatmul.f32.vlgmr.msra.gmra.mxu2 %v2945_v14  ;;  %3446 = vmatpush.msra.mxu3 %v3105_v6  ;;  %v2573_v10 = vpop.f32.mrf.mxu3  ;;  %v3127_v40 = vld [vmem:[#allocation43 + $0x528] sm:$0xff]  ;;  %v5385_v37 = vld [vmem:[%s4890_s29 + $0x8] sm:$0xff]  ;;  %v3096_v14 = vld [vmem:[#allocation43 + $0x430] sm:$0xff] }
 0xd06   :  { %3469 = vmatpush.msra.mxu0 %v3118_v42  ;;  %3489 = vmatpush.msra.mxu1 %v3134_v15  ;;  %v2574_v23 = vadd.f32 %v2573_v10, %v5337_v16  ;;  %v2633_v24 = vpop.f32.mrf.mxu2  ;;  %v3097_v11 = vld [vmem:[#allocation43 + $0x438] sm:$0xff]  ;;  %v3110_v41 = vld [vmem:[#allocation43 + $0x4a0] sm:$0xff]  ;;  %v2891_v42 = vperm.slane %v5385_v37, 1  ;;  %v3095_v10 = vld [vmem:[#allocation43 + $0x428] sm:$0xff] }
 0xd07   :  { %3506 = vmatpush.msra.mxu2 %v3153_v8  ;;  %v2634_v27 = vadd.f32 %v2633_v24, %v5339_v18  ;;  %3402 = vmatmul.f32.vlgmr.msrb.gmra.mxu0 %v2947_v39  ;;  %v3150_v18 = vld [vmem:[#allocation43 + $0x5e0] sm:$0xff]  ;;  %v2673_v9 = vpop.f32.mrf.mxu0  ;;  %v3145_v6 = vld [vmem:[#allocation43 + $0x5b8] sm:$0xff] }
 0xd08   :  { %v2926_v49 = vadd.f32 %v2886_v43, %v2574_v23  ;;  %3422 = vmatmul.f32.vlgmr.msrb.gmra.mxu1 %v2948_v17  ;;  %3447 = vmatpush.msra.mxu3 %v3104_v22  ;;  %v2693_v12 = vpop.f32.mrf.mxu1  ;;  %v3126_v13 = vld [vmem:[#allocation43 + $0x520] sm:$0xff]  ;;  %v2674_v38 = vadd.f32 %v2673_v9, %v5341_v20  ;;  %v3109_v15 = vld [vmem:[#allocation43 + $0x498] sm:$0xff]  ;;  %v2892_v43 = vperm.slane %v5385_v37, 2  ;;  %v3144_v17 = vld [vmem:[#allocation43 + $0x5b0] sm:$0xff] }
 0xd09   :  { %v2929_v44 = vadd.f32 %v2889_v19, %v2634_v27  ;;  %3470 = vmatpush.msra.mxu0 %v3117_v25  ;;  %3490 = vmatpush.msra.mxu1 %v3133_v26  ;;  %v3125_v39 = vld [vmem:[#allocation43 + $0x518] sm:$0xff]  ;;  %v2694_v8 = vadd.f32 %v2693_v12, %v5343_v21  ;;  %v3108_v19 = vld [vmem:[#allocation43 + $0x490] sm:$0xff]  ;;  %v3143_v20 = vld [vmem:[#allocation43 + $0x5a8] sm:$0xff] }
 0xd0a   :  { %v2946_v16 = vmax.f32 %v2926_v49, 0.0  ;;  %3507 = vmatpush.msra.mxu2 %v3152_v47  ;;  %3448 = vmatpush.msra.mxu3 %v3103_v48  ;;  %v3124_v22 = vld [vmem:[#allocation43 + $0x510] sm:$0xff]  ;;  %v3094_v23 = vld [vmem:[#allocation43 + $0x420] sm:$0xff]  ;;  %v2931_v24 = vadd.f32 %v2891_v42, %v2674_v38  ;;  %v3107_v26 = vld [vmem:[#allocation43 + $0x488] sm:$0xff] }
 0xd0b   :  { %v2949_v58 = vmax.f32 %v2929_v44, 0.0  ;;  %3471 = vmatpush.msra.mxu0 %v3116_v50  ;;  %3491 = vmatpush.msra.mxu1 %v3132_v51  ;;  %v3123_v21 = vld [vmem:[#allocation43 + $0x508] sm:$0xff]  ;;  %v2932_v27 = vadd.f32 %v2892_v43, %v2694_v8  ;;  %v3142_v48 = vld [vmem:[#allocation43 + $0x5a0] sm:$0xff]  ;;  %v3093_v49 = vld [vmem:[#allocation43 + $0x418] sm:$0xff] }
 0xd0c   :  { %3508 = vmatpush.msra.mxu2 %v3151_v53  ;;  %3449 = vmatpush.msra.mxu3 %v3102_v54  ;;  %v3106_v50 = vld [vmem:[#allocation43 + $0x480] sm:$0xff]  ;;  %v2890_v53 = vperm.slane %v5385_v37, 0  ;;  %v3141_v54 = vld [vmem:[#allocation43 + $0x598] sm:$0xff]  ;;  %v3196_v38 = vld [vmem:[#allocation43 + $0x750] sm:$0xff] }
 0xd0d   :  { %3472 = vmatpush.msra.mxu0 %v3115_v55  ;;  %3492 = vmatpush.msra.mxu1 %v3131_v57  ;;  %v2653_v25 = vpop.f32.mrf.mxu3  ;;  %v3122_v51 = vld [vmem:[#allocation43 + $0x500] sm:$0xff]  ;;  %v2893_v57 = vperm.slane %v5385_v37, 3  ;;  %v3181_v12 = vld [vmem:[#allocation43 + $0x6d8] sm:$0xff]  ;;  %v3215_v42 = vld [vmem:[#allocation43 + $0x7e8] sm:$0xff] }
 0xd0e   :  { %3509 = vmatpush.msra.mxu2 %v3150_v18  ;;  %3382 = vmatmul.f32.vlgmr.msrb.gmra.mxu3 %v2946_v16  ;;  %v2713_v47 = vpop.f32.mrf.mxu2  ;;  %v2654_v44 = vadd.f32 %v2653_v25, %v5345_v28  ;;  %v2951_v16 = vmax.f32 %v2931_v24, 0.0  ;;  %v2952_v18 = vmax.f32 %v2932_v27, 0.0  ;;  %v3140_v28 = vld [vmem:[#allocation43 + $0x590] sm:$0xff]  ;;  %v3198_v9 = vld [vmem:[#allocation43 + $0x760] sm:$0xff]  ;;  %v3195_v8 = vld [vmem:[#allocation43 + $0x748] sm:$0xff] }
 0xd0f   :  { %3442 = vmatmul.f32.vlgmr.msrb.gmra.mxu2 %v2949_v58  ;;  %3450 = vmatpush.msra.mxu3 %v3101_v59  ;;  %v2714_v55 = vadd.f32 %v2713_v47, %v5347_v29  ;;  %v3185_v58 = vld [vmem:[#allocation43 + $0x6f8] sm:$0xff]  ;;  %v3214_v43 = vld [vmem:[#allocation43 + $0x7e0] sm:$0xff]  ;;  %v3212_v25 = vld [vmem:[#allocation43 + $0x7d0] sm:$0xff] }
 0xd10   :  { %3473 = vmatpush.msra.mxu0 %v3114_v60  ;;  %3493 = vmatpush.msra.mxu1 %v3130_v61  ;;  %v3201_v59 = vld [vmem:[#allocation43 + $0x778] sm:$0xff]  ;;  %v3092_v60 = vld [vmem:[#allocation43 + $0x410] sm:$0xff]  ;;  %v3211_v47 = vld [vmem:[#allocation43 + $0x7c8] sm:$0xff] }
 0xd11   :  { %3510 = vmatpush.msra.mxu2 %v3149_v62  ;;  %3451 = vmatpush.msra.mxu3 %v3100_v63  ;;  %v3184_v61 = vld [vmem:[#allocation43 + $0x6f0] sm:$0xff]  ;;  %v2930_v62 = vadd.f32 %v2890_v53, %v2654_v44  ;;  %v2933_v29 = vadd.f32 %v2893_v57, %v2714_v55  ;;  %v3193_v24 = vld [vmem:[#allocation43 + $0x738] sm:$0xff]  ;;  %v3210_v44 = vld [vmem:[#allocation43 + $0x7c0] sm:$0xff] }
 0xd12   :  { %3474 = vmatpush.msra.mxu0 %v3113_v0  ;;  %3494 = vmatpush.msra.mxu1 %v3129_v1  ;;  %v3200_v63 = vld [vmem:[#allocation43 + $0x770] sm:$0xff]  ;;  %v3091_v0 = vld [vmem:[#allocation43 + $0x408] sm:$0xff]  ;;  %v3161_v53 = vld [vmem:[#allocation43 + $0x638] sm:$0xff] }
 0xd13   :  { %3511 = vmatpush.msra.mxu2 %v3148_v52  ;;  %3452 = vmatpush.msra.mxu3 %v3099_v3  ;;  %v3139_v1 = vld [vmem:[#allocation43 + $0x588] sm:$0xff]  ;;  %v3192_v27 = vld [vmem:[#allocation43 + $0x730] sm:$0xff]  ;;  %v3190_v55 = vld [vmem:[#allocation43 + $0x720] sm:$0xff] }
 0xd14   :  { %3475 = vmatpush.msra.mxu0 %v3112_v56  ;;  %3495 = vmatpush.msra.mxu1 %v3128_v4  ;;  %v3183_v52 = vld [vmem:[#allocation43 + $0x6e8] sm:$0xff]  ;;  %v3090_v56 = vld [vmem:[#allocation43 + $0x400] sm:$0xff]  ;;  %v3209_v57 = vld [vmem:[#allocation43 + $0x7b8] sm:$0xff] }
 0xd15   :  { %3512 = vmatpush.msra.mxu2 %v3147_v5  ;;  %3453 = vmatpush.msra.mxu3 %v3098_v7  ;;  %v3199_v3 = vld [vmem:[#allocation43 + $0x768] sm:$0xff]  ;;  %v3138_v4 = vld [vmem:[#allocation43 + $0x580] sm:$0xff]  ;;  %v2950_v5 = vmax.f32 %v2930_v62, 0.0  ;;  %v3169_v7 = vld [vmem:[#allocation43 + $0x678] sm:$0xff]  ;;  %v2896_v62 = vperm.slane %v5385_v37, 6 }
 0xd16   :  { %3476 = vmatpush.msra.mxu0 %v3111_v35  ;;  %3496 = vmatpush.msra.mxu1 %v3127_v40  ;;  %v2953_v35 = vmax.f32 %v2933_v29, 0.0  ;;  %v3182_v40 = vld [vmem:[#allocation43 + $0x6e0] sm:$0xff]  ;;  %v3172_v29 = vld [vmem:[#allocation43 + $0x690] sm:$0xff] }
 0xd17   :  { %3513 = vmatpush.msra.mxu2 %v3146_v2  ;;  %3454 = vmatpush.msra.mxu3 %v3097_v11  ;;  %v3217_v2 = vld [vmem:[#allocation43 + $0x7f8] sm:$0xff]  ;;  %v3168_v11 = vld [vmem:[#allocation43 + $0x670] sm:$0xff] }
 0xd18   :  { %3477 = vmatpush.msra.mxu0 %v3110_v41  ;;  %3497 = vmatpush.msra.mxu1 %v3126_v13  ;;  %v3197_v41 = vld [vmem:[#allocation43 + $0x758] sm:$0xff]  ;;  %v3216_v13 = vld [vmem:[#allocation43 + $0x7f0] sm:$0xff] }
 0xd19   :  { %3514 = vmatpush.msra.mxu2 %v3145_v6  ;;  %3455 = vmatpush.msra.mxu3 %v3096_v14  ;;  %v3167_v6 = vld [vmem:[#allocation43 + $0x668] sm:$0xff]  ;;  %v3180_v14 = vld [vmem:[#allocation43 + $0x6d0] sm:$0xff] }
 0xd1a   :  { %3478 = vmatpush.msra.mxu0 %v3109_v15  ;;  %3498 = vmatpush.msra.mxu1 %v3125_v39  ;;  %v3166_v15 = vld [vmem:[#allocation43 + $0x660] sm:$0xff]  ;;  %v3179_v39 = vld [vmem:[#allocation43 + $0x6c8] sm:$0xff] }
 0xd1b   :  { %3515 = vmatpush.msra.mxu2 %v3144_v17  ;;  %3456 = vmatpush.msra.mxu3 %v3095_v10  ;;  %v3165_v17 = vld [vmem:[#allocation43 + $0x658] sm:$0xff]  ;;  %v3178_v10 = vld [vmem:[#allocation43 + $0x6c0] sm:$0xff] }
 0xd1c   :  { %3479 = vmatpush.msra.mxu0 %v3108_v19  ;;  %3499 = vmatpush.msra.mxu1 %v3124_v22  ;;  %v3194_v19 = vld [vmem:[#allocation43 + $0x740] sm:$0xff]  ;;  %v3213_v22 = vld [vmem:[#allocation43 + $0x7d8] sm:$0xff] }
 0xd1d   :  { %3516 = vmatpush.msra.mxu2 %v3143_v20  ;;  %3457 = vmatpush.msra.mxu3 %v3094_v23  ;;  %v3164_v20 = vld [vmem:[#allocation43 + $0x650] sm:$0xff]  ;;  %v3177_v23 = vld [vmem:[#allocation43 + $0x6b8] sm:$0xff] }
 0xd1e   :  { %3480 = vmatpush.msra.mxu0 %v3107_v26  ;;  %3500 = vmatpush.msra.mxu1 %v3123_v21  ;;  %v3163_v26 = vld [vmem:[#allocation43 + $0x648] sm:$0xff]  ;;  %v3176_v21 = vld [vmem:[#allocation43 + $0x6b0] sm:$0xff] }
 0xd1f   :  { %3517 = vmatpush.msra.mxu2 %v3142_v48  ;;  %3458 = vmatpush.msra.mxu3 %v3093_v49  ;;  %v3162_v48 = vld [vmem:[#allocation43 + $0x640] sm:$0xff]  ;;  %v3175_v49 = vld [vmem:[#allocation43 + $0x6a8] sm:$0xff] }
 0xd20   :  { %3481 = vmatpush.msra.mxu0 %v3106_v50  ;;  %3501 = vmatpush.msra.mxu1 %v3122_v51  ;;  %v3191_v50 = vld [vmem:[#allocation43 + $0x728] sm:$0xff]  ;;  %v2753_v51 = vpop.f32.mrf.mxu0 }
 0xd21   :  { %3518 = vmatpush.msra.mxu2 %v3141_v54  ;;  %3482 = vmatmul.f32.vlgmr.msra.gmra.mxu0 %v2951_v16  ;;  %v2773_v54 = vpop.f32.mrf.mxu1  ;;  %v3174_v16 = vld [vmem:[#allocation43 + $0x6a0] sm:$0xff] }
 0xd22   :  { %3502 = vmatmul.f32.vlgmr.msra.gmra.mxu1 %v2952_v18  ;;  %3546 = vmatpush.msrb.mxu0 %v3185_v58  ;;  %v3160_v58 = vld [vmem:[#allocation43 + $0x630] sm:$0xff]  ;;  %v2754_v18 = vadd.f32 %v2753_v51, %v5349_v30  ;;  %v3207_v30 = vld [vmem:[#allocation43 + $0x7a8] sm:$0xff] }
 0xd23   :  { %3566 = vmatpush.msrb.mxu1 %v3201_v59  ;;  %3459 = vmatpush.msra.mxu3 %v3092_v60  ;;  %v2895_v59 = vperm.slane %v5385_v37, 5  ;;  %v3173_v60 = vld [vmem:[#allocation43 + $0x698] sm:$0xff]  ;;  %v3280_v51 = vld [vmem:[#allocation43 + $0x9f0] sm:$0xff] }
 0xd24   :  { %3519 = vmatpush.msra.mxu2 %v3140_v28  ;;  %3547 = vmatpush.msrb.mxu0 %v3184_v61  ;;  %v3189_v28 = vld [vmem:[#allocation43 + $0x718] sm:$0xff]  ;;  %v2774_v61 = vadd.f32 %v2773_v54, %v5351_v31  ;;  %v3187_v31 = vld [vmem:[#allocation43 + $0x708] sm:$0xff]  ;;  %v3260_v54 = vld [vmem:[#allocation43 + $0x950] sm:$0xff] }
 0xd25   :  { %3567 = vmatpush.msrb.mxu1 %v3200_v63  ;;  %3460 = vmatpush.msra.mxu3 %v3091_v0  ;;  %v3208_v63 = vld [vmem:[#allocation43 + $0x7b0] sm:$0xff]  ;;  %v3159_v0 = vld [vmem:[#allocation43 + $0x628] sm:$0xff] }
 0xd26   :  { %3520 = vmatpush.msra.mxu2 %v3139_v1  ;;  %3548 = vmatpush.msrb.mxu0 %v3183_v52  ;;  %v3188_v1 = vld [vmem:[#allocation43 + $0x710] sm:$0xff]  ;;  %v3158_v52 = vld [vmem:[#allocation43 + $0x620] sm:$0xff] }
 0xd27   :  { %3568 = vmatpush.msrb.mxu1 %v3199_v3  ;;  %3461 = vmatpush.msra.mxu3 %v3090_v56  ;;  %v2935_v3 = vadd.f32 %v2895_v59, %v2754_v18  ;;  %v2733_v56 = vpop.f32.mrf.mxu3  ;;  %v3278_v18 = vld [vmem:[#allocation43 + $0x9e0] sm:$0xff]  ;;  %v3229_v59 = vld [vmem:[#allocation43 + $0x858] sm:$0xff] }
 0xd28   :  { %3521 = vmatpush.msra.mxu2 %v3138_v4  ;;  %3462 = vmatmul.f32.vlgmr.msra.gmra.mxu3 %v2950_v5  ;;  %v3171_v4 = vld [vmem:[#allocation43 + $0x688] sm:$0xff]  ;;  %v2936_v5 = vadd.f32 %v2896_v62, %v2774_v61  ;;  %v3277_v61 = vld [vmem:[#allocation43 + $0x9d8] sm:$0xff]  ;;  %v3228_v62 = vld [vmem:[#allocation43 + $0x850] sm:$0xff] }
 0xd29   :  { %3522 = vmatmul.f32.vlgmr.msra.gmra.mxu2 %v2953_v35  ;;  %3526 = vmatpush.msrb.mxu3 %v3169_v7  ;;  %v2793_v7 = vpop.f32.mrf.mxu2  ;;  %v3206_v35 = vld [vmem:[#allocation43 + $0x7a0] sm:$0xff] }
 0xd2a   :  { %3549 = vmatpush.msrb.mxu0 %v3182_v40  ;;  %3569 = vmatpush.msrb.mxu1 %v3198_v9  ;;  %v3157_v40 = vld [vmem:[#allocation43 + $0x618] sm:$0xff]  ;;  %v3170_v9 = vld [vmem:[#allocation43 + $0x680] sm:$0xff] }
 0xd2b   :  { %3586 = vmatpush.msrb.mxu2 %v3217_v2  ;;  %3527 = vmatpush.msrb.mxu3 %v3168_v11  ;;  %v3186_v2 = vld [vmem:[#allocation43 + $0x700] sm:$0xff]  ;;  %v2734_v11 = vadd.f32 %v2733_v56, %v5353_v32  ;;  %v3204_v32 = vld [vmem:[#allocation43 + $0x790] sm:$0xff] }
 0xd2c   :  { %3550 = vmatpush.msrb.mxu0 %v3181_v12  ;;  %3570 = vmatpush.msrb.mxu1 %v3197_v41  ;;  %v2894_v12 = vperm.slane %v5385_v37, 4  ;;  %v3205_v41 = vld [vmem:[#allocation43 + $0x798] sm:$0xff]  ;;  %v3226_v56 = vld [vmem:[#allocation43 + $0x840] sm:$0xff] }
 0xd2d   :  { %3587 = vmatpush.msrb.mxu2 %v3216_v13  ;;  %3528 = vmatpush.msrb.mxu3 %v3167_v6  ;;  %v2955_v13 = vmax.f32 %v2935_v3, 0.0  ;;  %v2794_v6 = vadd.f32 %v2793_v7, %v5355_v33  ;;  %v3275_v3 = vld [vmem:[#allocation43 + $0x9c8] sm:$0xff]  ;;  %v5404_v7 = vld [vmem:[%s4890_s29 + $0x10] sm:$0xf] }
 0xd2e   :  { %3551 = vmatpush.msrb.mxu0 %v3180_v14  ;;  %3571 = vmatpush.msrb.mxu1 %v3196_v38  ;;  %v2897_v14 = vperm.slane %v5385_v37, 7  ;;  %v3249_v38 = vld [vmem:[#allocation43 + $0x8f8] sm:$0xff]  ;;  %v3203_v37 = vld [vmem:[#allocation43 + $0x788] sm:$0xff] }
 0xd2f   :  { %3588 = vmatpush.msrb.mxu2 %v3215_v42  ;;  %3529 = vmatpush.msrb.mxu3 %v3166_v15  ;;  %v2956_v42 = vmax.f32 %v2936_v5, 0.0  ;;  %v3265_v15 = vld [vmem:[#allocation43 + $0x978] sm:$0xff]  ;;  %v2833_v5 = vpop.f32.mrf.mxu0 }
 0xd30   :  { %3552 = vmatpush.msrb.mxu0 %v3179_v39  ;;  %3572 = vmatpush.msrb.mxu1 %v3195_v8  ;;  %v3156_v39 = vld [vmem:[#allocation43 + $0x610] sm:$0xff]  ;;  %v2937_v33 = vadd.f32 %v2897_v14, %v2794_v6  ;;  %v2899_v6 = vperm.slane %v5404_v7, 1  ;;  %v3237_v14 = vld [vmem:[#allocation43 + $0x898] sm:$0xff] }
 0xd31   :  { %3589 = vmatpush.msrb.mxu2 %v3214_v43  ;;  %3530 = vmatpush.msrb.mxu3 %v3165_v17  ;;  %v3248_v8 = vld [vmem:[#allocation43 + $0x8f0] sm:$0xff]  ;;  %v2934_v43 = vadd.f32 %v2894_v12, %v2734_v11  ;;  %v3254_v11 = vld [vmem:[#allocation43 + $0x920] sm:$0xff]  ;;  %v3273_v12 = vld [vmem:[#allocation43 + $0x9b8] sm:$0xff] }
 0xd32   :  { %3553 = vmatpush.msrb.mxu0 %v3178_v10  ;;  %3573 = vmatpush.msrb.mxu1 %v3194_v19  ;;  %v3264_v17 = vld [vmem:[#allocation43 + $0x970] sm:$0xff]  ;;  %v3155_v10 = vld [vmem:[#allocation43 + $0x608] sm:$0xff] }
 0xd33   :  { %3590 = vmatpush.msrb.mxu2 %v3213_v22  ;;  %3531 = vmatpush.msrb.mxu3 %v3164_v20  ;;  %v3247_v19 = vld [vmem:[#allocation43 + $0x8e8] sm:$0xff]  ;;  %v3154_v20 = vld [vmem:[#allocation43 + $0x600] sm:$0xff] }
 0xd34   :  { %3554 = vmatpush.msrb.mxu0 %v3177_v23  ;;  %3574 = vmatpush.msrb.mxu1 %v3193_v24  ;;  %v3263_v22 = vld [vmem:[#allocation43 + $0x968] sm:$0xff]  ;;  %v3202_v23 = vld [vmem:[#allocation43 + $0x780] sm:$0xff]  ;;  %v2954_v24 = vmax.f32 %v2934_v43, 0.0  ;;  %v3252_v43 = vld [vmem:[#allocation43 + $0x910] sm:$0xff] }
 0xd35   :  { %3591 = vmatpush.msrb.mxu2 %v3212_v25  ;;  %3532 = vmatpush.msrb.mxu3 %v3163_v26  ;;  %v3233_v25 = vld [vmem:[#allocation43 + $0x878] sm:$0xff]  ;;  %v2957_v26 = vmax.f32 %v2937_v33, 0.0 }
 0xd36   :  { %3555 = vmatpush.msrb.mxu0 %v3176_v21  ;;  %3575 = vmatpush.msrb.mxu1 %v3192_v27  ;;  %v3246_v21 = vld [vmem:[#allocation43 + $0x8e0] sm:$0xff] }
 0xd37   :  { %3592 = vmatpush.msrb.mxu2 %v3211_v47  ;;  %3533 = vmatpush.msrb.mxu3 %v3162_v48  ;;  %v3262_v27 = vld [vmem:[#allocation43 + $0x960] sm:$0xff]  ;;  %v3281_v47 = vld [vmem:[#allocation43 + $0x9f8] sm:$0xff]  ;;  %v3232_v48 = vld [vmem:[#allocation43 + $0x870] sm:$0xff] }
 0xd38   :  { %3556 = vmatpush.msrb.mxu0 %v3175_v49  ;;  %3576 = vmatpush.msrb.mxu1 %v3191_v50  ;;  %v3245_v49 = vld [vmem:[#allocation43 + $0x8d8] sm:$0xff] }
 0xd39   :  { %3593 = vmatpush.msrb.mxu2 %v3210_v44  ;;  %3534 = vmatpush.msrb.mxu3 %v3161_v53  ;;  %v3261_v50 = vld [vmem:[#allocation43 + $0x958] sm:$0xff]  ;;  %v3231_v44 = vld [vmem:[#allocation43 + $0x868] sm:$0xff]  ;;  %v3244_v53 = vld [vmem:[#allocation43 + $0x8d0] sm:$0xff] }
 0xd3a   :  { %3557 = vmatpush.msrb.mxu0 %v3174_v16  ;;  %3577 = vmatpush.msrb.mxu1 %v3190_v55  ;;  %v3279_v16 = vld [vmem:[#allocation43 + $0x9e8] sm:$0xff]  ;;  %v3230_v55 = vld [vmem:[#allocation43 + $0x860] sm:$0xff] }
 0xd3b   :  { %3594 = vmatpush.msrb.mxu2 %v3209_v57  ;;  %3535 = vmatpush.msrb.mxu3 %v3160_v58  ;;  %v3243_v57 = vld [vmem:[#allocation43 + $0x8c8] sm:$0xff] }
 0xd3c   :  { %3558 = vmatpush.msrb.mxu0 %v3173_v60  ;;  %3578 = vmatpush.msrb.mxu1 %v3189_v28  ;;  %v3259_v58 = vld [vmem:[#allocation43 + $0x948] sm:$0xff]  ;;  %v3242_v60 = vld [vmem:[#allocation43 + $0x8c0] sm:$0xff] }
 0xd3d   :  { %3595 = vmatpush.msrb.mxu2 %v3208_v63  ;;  %3536 = vmatpush.msrb.mxu3 %v3159_v0  ;;  %v3258_v28 = vld [vmem:[#allocation43 + $0x940] sm:$0xff]  ;;  %v3241_v63 = vld [vmem:[#allocation43 + $0x8b8] sm:$0xff] }
 0xd3e   :  { %3559 = vmatpush.msrb.mxu0 %v3172_v29  ;;  %3579 = vmatpush.msrb.mxu1 %v3188_v1  ;;  %v3257_v0 = vld [vmem:[#allocation43 + $0x938] sm:$0xff]  ;;  %v3276_v29 = vld [vmem:[#allocation43 + $0x9d0] sm:$0xff]  ;;  %v3227_v1 = vld [vmem:[#allocation43 + $0x848] sm:$0xff] }
 0xd3f   :  { %3596 = vmatpush.msrb.mxu2 %v3207_v30  ;;  %3537 = vmatpush.msrb.mxu3 %v3158_v52  ;;  %v3240_v30 = vld [vmem:[#allocation43 + $0x8b0] sm:$0xff] }
 0xd40   :  { %3560 = vmatpush.msrb.mxu0 %v3171_v4  ;;  %3580 = vmatpush.msrb.mxu1 %v3187_v31  ;;  %v3256_v52 = vld [vmem:[#allocation43 + $0x930] sm:$0xff]  ;;  %v3239_v4 = vld [vmem:[#allocation43 + $0x8a8] sm:$0xff] }
 0xd41   :  { %3597 = vmatpush.msrb.mxu2 %v3206_v35  ;;  %3538 = vmatpush.msrb.mxu3 %v3157_v40  ;;  %v3255_v31 = vld [vmem:[#allocation43 + $0x928] sm:$0xff]  ;;  %v3274_v35 = vld [vmem:[#allocation43 + $0x9c0] sm:$0xff]  ;;  %v3225_v40 = vld [vmem:[#allocation43 + $0x838] sm:$0xff] }
 0xd42   :  { %3561 = vmatpush.msrb.mxu0 %v3170_v9  ;;  %3581 = vmatpush.msrb.mxu1 %v3186_v2  ;;  %v2853_v9 = vpop.f32.mrf.mxu1  ;;  %v3238_v2 = vld [vmem:[#allocation43 + $0x8a0] sm:$0xff] }
 0xd43   :  { %3598 = vmatpush.msrb.mxu2 %v3205_v41  ;;  %3562 = vmatmul.f32.vlgmr.msrb.gmra.mxu0 %v2955_v13  ;;  %v3224_v41 = vld [vmem:[#allocation43 + $0x830] sm:$0xff]  ;;  %v2834_v13 = vadd.f32 %v2833_v5, %v5357_v34  ;;  %v3271_v34 = vld [vmem:[#allocation43 + $0x9a8] sm:$0xff] }
 0xd44   :  { %3582 = vmatmul.f32.vlgmr.msrb.gmra.mxu1 %v2956_v42  ;;  %3626 = vmatpush.msra.mxu0 %v3249_v38  ;;  %v3253_v38 = vld [vmem:[#allocation43 + $0x918] sm:$0xff]  ;;  %v2854_v42 = vadd.f32 %v2853_v9, %v5359_v36  ;;  %v3235_v36 = vld [vmem:[#allocation43 + $0x888] sm:$0xff] }
 0xd45   :  { %3646 = vmatpush.msra.mxu1 %v3265_v15  ;;  %3539 = vmatpush.msrb.mxu3 %v3156_v39  ;;  %v2900_v15 = vperm.slane %v5404_v7, 2  ;;  %v3272_v39 = vld [vmem:[#allocation43 + $0x9b0] sm:$0xff]  ;;  %v2939_v33 = vadd.f32 %v2899_v6, %v2834_v13 }
 0xd46   :  { %3599 = vmatpush.msrb.mxu2 %v3204_v32  ;;  %3627 = vmatpush.msra.mxu0 %v3248_v8  ;;  %v3223_v32 = vld [vmem:[#allocation43 + $0x828] sm:$0xff]  ;;  %v3236_v8 = vld [vmem:[#allocation43 + $0x890] sm:$0xff] }
 0xd47   :  { %3647 = vmatpush.msra.mxu1 %v3264_v17  ;;  %3540 = vmatpush.msrb.mxu3 %v3155_v10  ;;  %v2813_v17 = vpop.f32.mrf.mxu3  ;;  %v3222_v10 = vld [vmem:[#allocation43 + $0x820] sm:$0xff] }
 0xd48   :  { %3600 = vmatpush.msrb.mxu2 %v3203_v37  ;;  %3628 = vmatpush.msra.mxu0 %v3247_v19  ;;  %v2873_v37 = vpop.f32.mrf.mxu2  ;;  %v3251_v19 = vld [vmem:[#allocation43 + $0x908] sm:$0xff] }
 0xd49   :  { %3648 = vmatpush.msra.mxu1 %v3263_v22  ;;  %3541 = vmatpush.msrb.mxu3 %v3154_v20  ;;  %v2940_v22 = vadd.f32 %v2900_v15, %v2854_v42  ;;  %v3270_v20 = vld [vmem:[#allocation43 + $0x9a0] sm:$0xff] }
 0xd4a   :  { %3601 = vmatpush.msrb.mxu2 %v3202_v23  ;;  %3542 = vmatmul.f32.vlgmr.msrb.gmra.mxu3 %v2954_v24  ;;  %v3221_v23 = vld [vmem:[#allocation43 + $0x818] sm:$0xff]  ;;  %v2814_v24 = vadd.f32 %v2813_v17, %v5364_v45  ;;  %v3268_v45 = vld [vmem:[#allocation43 + $0x990] sm:$0xff] }
 0xd4b   :  { %3602 = vmatmul.f32.vlgmr.msrb.gmra.mxu2 %v2957_v26  ;;  %3606 = vmatpush.msra.mxu3 %v3233_v25  ;;  %v2898_v25 = vperm.slane %v5404_v7, 0  ;;  %v3234_v26 = vld [vmem:[#allocation43 + $0x880] sm:$0xff] }
 0xd4c   :  { %3629 = vmatpush.msra.mxu0 %v3246_v21  ;;  %3649 = vmatpush.msra.mxu1 %v3262_v27  ;;  %v3250_v21 = vld [vmem:[#allocation43 + $0x900] sm:$0xff]  ;;  %v2874_v27 = vadd.f32 %v2873_v37, %v5366_v46  ;;  %v3267_v46 = vld [vmem:[#allocation43 + $0x988] sm:$0xff] }
 0xd4d   :  { %3666 = vmatpush.msra.mxu2 %v3281_v47  ;;  %3607 = vmatpush.msra.mxu3 %v3232_v48  ;;  %v2901_v47 = vperm.slane %v5404_v7, 3  ;;  %v3269_v48 = vld [vmem:[#allocation43 + $0x998] sm:$0xff] }
 0xd4e   :  { %3630 = vmatpush.msra.mxu0 %v3245_v49  ;;  %3650 = vmatpush.msra.mxu1 %v3261_v50  ;;  %v2959_v49 = vmax.f32 %v2939_v33, 0.0  ;;  %v3220_v50 = vld [vmem:[#allocation43 + $0x810] sm:$0xff] }
 0xd4f   :  { %3667 = vmatpush.msra.mxu2 %v3280_v51  ;;  %3608 = vmatpush.msra.mxu3 %v3231_v44  ;;  %v2960_v51 = vmax.f32 %v2940_v22, 0.0  ;;  %v2938_v44 = vadd.f32 %v2898_v25, %v2814_v24 }
 0xd50   :  { %3631 = vmatpush.msra.mxu0 %v3244_v53  ;;  %3651 = vmatpush.msra.mxu1 %v3260_v54  ;;  %v3219_v53 = vld [vmem:[#allocation43 + $0x808] sm:$0xff]  ;;  %v2941_v54 = vadd.f32 %v2901_v47, %v2874_v27 }
 0xd51   :  { %3668 = vmatpush.msra.mxu2 %v3279_v16  ;;  %3609 = vmatpush.msra.mxu3 %v3230_v55  ;;  %v3218_v16 = vld [vmem:[#allocation43 + $0x800] sm:$0xff] }
 0xd52   :  { %3632 = vmatpush.msra.mxu0 %v3243_v57  ;;  %3652 = vmatpush.msra.mxu1 %v3259_v58  ;;  %v3266_v55 = vld [vmem:[#allocation43 + $0x980] sm:$0xff]  ;;  %v2958_v57 = vmax.f32 %v2938_v44, 0.0  ;;  %v2961_v58 = vmax.f32 %v2941_v54, 0.0 }
 0xd53   :  { %3669 = vmatpush.msra.mxu2 %v3278_v18  ;;  %3610 = vmatpush.msra.mxu3 %v3229_v59  ;;  %v3944_v18 = vld [vmem:[%s4900_s13] ss:$0 sm:$0xff]  ;;  %s4716_s13 = smov [#allocation44]  }
 0xd54   :  { %3633 = vmatpush.msra.mxu0 %v3242_v60  ;;  %3653 = vmatpush.msra.mxu1 %v3258_v28  ;;  %s3693_s29 = sshll.u32 %s4716_s13, 4  ;;  %s3694_s29 = int_to_ptr.vmem [resolvable:$true] %s3693_s29 }
 0xd55   :  { %3670 = vmatpush.msra.mxu2 %v3277_v61  ;;  %3611 = vmatpush.msra.mxu3 %v3228_v62 }
 0xd56   :  { %3634 = vmatpush.msra.mxu0 %v3241_v63  ;;  %3654 = vmatpush.msra.mxu1 %v3257_v0 }
 0xd57   :  { %3671 = vmatpush.msra.mxu2 %v3276_v29  ;;  %3612 = vmatpush.msra.mxu3 %v3227_v1 }
 0xd58   :  { %3635 = vmatpush.msra.mxu0 %v3240_v30  ;;  %3655 = vmatpush.msra.mxu1 %v3256_v52 }
 0xd59   :  { %3672 = vmatpush.msra.mxu2 %v3275_v3  ;;  %3613 = vmatpush.msra.mxu3 %v3226_v56 }
 0xd5a   :  { %3636 = vmatpush.msra.mxu0 %v3239_v4  ;;  %3656 = vmatpush.msra.mxu1 %v3255_v31 }
 0xd5b   :  { %3673 = vmatpush.msra.mxu2 %v3274_v35  ;;  %3614 = vmatpush.msra.mxu3 %v3225_v40 }
 0xd5c   :  { %3637 = vmatpush.msra.mxu0 %v3238_v2  ;;  %3657 = vmatpush.msra.mxu1 %v3254_v11 }
 0xd5d   :  { %3674 = vmatpush.msra.mxu2 %v3273_v12  ;;  %3615 = vmatpush.msra.mxu3 %v3224_v41 }
 0xd5e   :  { %3638 = vmatpush.msra.mxu0 %v3237_v14  ;;  %3658 = vmatpush.msra.mxu1 %v3253_v38 }
 0xd5f   :  { %3675 = vmatpush.msra.mxu2 %v3272_v39  ;;  %3616 = vmatpush.msra.mxu3 %v3223_v32 }
 0xd60   :  { %3639 = vmatpush.msra.mxu0 %v3236_v8  ;;  %3659 = vmatpush.msra.mxu1 %v3252_v43 }
 0xd61   :  { %3676 = vmatpush.msra.mxu2 %v3271_v34  ;;  %3617 = vmatpush.msra.mxu3 %v3222_v10 }
 0xd62   :  { %3640 = vmatpush.msra.mxu0 %v3235_v36  ;;  %3660 = vmatpush.msra.mxu1 %v3251_v19 }
 0xd63   :  { %3677 = vmatpush.msra.mxu2 %v3270_v20  ;;  %3618 = vmatpush.msra.mxu3 %v3221_v23 }
 0xd64   :  { %3641 = vmatpush.msra.mxu0 %v3234_v26  ;;  %3661 = vmatpush.msra.mxu1 %v3250_v21 }
 0xd65   :  { %3678 = vmatpush.msra.mxu2 %v3269_v48  ;;  %3642 = vmatmul.f32.vlgmr.msra.gmra.mxu0 %v2959_v49 }
 0xd66   :  { %3662 = vmatmul.f32.vlgmr.msra.gmra.mxu1 %v2960_v51  ;;  %3619 = vmatpush.msra.mxu3 %v3220_v50 }
 0xd67   :  { %3679 = vmatpush.msra.mxu2 %v3268_v45 }
 0xd68   :  { %3620 = vmatpush.msra.mxu3 %v3219_v53 }
 0xd69   :  { %3680 = vmatpush.msra.mxu2 %v3267_v46 }
 0xd6a   :  { %3621 = vmatpush.msra.mxu3 %v3218_v16 }
 0xd6b   :  { %3681 = vmatpush.msra.mxu2 %v3266_v55  ;;  %3622 = vmatmul.f32.vlgmr.msra.gmra.mxu3 %v2958_v57 }
 0xd6c   :  { %3682 = vmatmul.f32.vlgmr.msra.gmra.mxu2 %v2961_v58 }
 0xd7b   :  { %v3323_v28 = vpop.f32.mrf.mxu0 }
 0xd7c   :  { %v3343_v62 = vpop.f32.mrf.mxu1 }
 0xd84   :  { %v3403_v52 = vpop.f32.mrf.mxu0 }
 0xd85   :  { %v3423_v56 = vpop.f32.mrf.mxu1 }
 0xd87   :  { %v3303_v59 = vpop.f32.mrf.mxu3 }
 0xd88   :  { %v3304_v60 = vadd.f32 %v3944_v18, %v3303_v59  ;;  %v3363_v0 = vpop.f32.mrf.mxu2 }
 0xd8a   :  { %v3324_v61 = vadd.f32 %v3323_v28, %v3304_v60 }
 0xd8c   :  { %v3344_v63 = vadd.f32 %v3343_v62, %v3324_v61 }
 0xd8e   :  { %v3364_v29 = vadd.f32 %v3363_v0, %v3344_v63 }
 0xd91   :  { %v3383_v1 = vpop.f32.mrf.mxu3 }
 0xd92   :  { %v3384_v30 = vadd.f32 %v3383_v1, %v3364_v29  ;;  %v3443_v31 = vpop.f32.mrf.mxu2 }
 0xd94   :  { %v3404_v3 = vadd.f32 %v3403_v52, %v3384_v30 }
 0xd96   :  { %v3424_v4 = vadd.f32 %v3423_v56, %v3404_v3 }
 0xd98   :  { %v3444_v7 = vadd.f32 %v3443_v31, %v3424_v4 }
 0xd9e   :  { %v3483_v40 = vpop.f32.mrf.mxu0 }
 0xd9f   :  { %v3503_v2 = vpop.f32.mrf.mxu1 }
 0xdab   :  { %v3463_v5 = vpop.f32.mrf.mxu3 }
 0xdac   :  { %v3464_v35 = vadd.f32 %v3463_v5, %v3444_v7  ;;  %v3523_v12 = vpop.f32.mrf.mxu2 }
 0xdae   :  { %v3484_v9 = vadd.f32 %v3483_v40, %v3464_v35 }
 0xdb0   :  { %v3504_v11 = vadd.f32 %v3503_v2, %v3484_v9 }
 0xdb2   :  { %v3524_v13 = vadd.f32 %v3523_v12, %v3504_v11 }
 0xdc0   :  { %v3563_v14 = vpop.f32.mrf.mxu0 }
 0xdc1   :  { %v3583_v42 = vpop.f32.mrf.mxu1 }
 0xdcd   :  { %v3543_v41 = vpop.f32.mrf.mxu3 }
 0xdce   :  { %v3544_v6 = vadd.f32 %v3543_v41, %v3524_v13  ;;  %v3603_v39 = vpop.f32.mrf.mxu2 }
 0xdd0   :  { %v3564_v38 = vadd.f32 %v3563_v14, %v3544_v6 }
 0xdd2   :  { %v3584_v15 = vadd.f32 %v3583_v42, %v3564_v38 }
 0xdd4   :  { %v3604_v32 = vadd.f32 %v3603_v39, %v3584_v15 }
 0xde2   :  { %v3643_v17 = vpop.f32.mrf.mxu0 }
 0xde3   :  { %v3663_v10 = vpop.f32.mrf.mxu1 }
 0xdee   :  { %v3623_v8 = vpop.f32.mrf.mxu3 }
 0xdef   :  { %v3624_v43 = vadd.f32 %v3623_v8, %v3604_v32  ;;  %v3683_v37 = vpop.f32.mrf.mxu2 }
 0xdf1   :  { %v3644_v34 = vadd.f32 %v3643_v17, %v3624_v43 }
 0xdf3   :  { %v3664_v33 = vadd.f32 %v3663_v10, %v3644_v34 }
 0xdf5   :  { %v3684_v36 = vadd.f32 %v3683_v37, %v3664_v33 }
 0xdf7   :  { %3687 = vst.msk [vmem:[#allocation44] sm:$0x3] %vm3686_vm6, %v3684_v36 }
 0xdf8   :  { %4616 = shalt.err (!%p4613_p13)
}
 0xdf9   :  { %3698 = dma.vmem_to_hbm [thread:$0]  %s3694_s29, 32, %s3696_s5, [#allocation4]  }
 0xdfa   :  { %4645 = dma.done.wait [#allocation4], 32  }
 0xdfb   :  { %4646 = vsyncadd [#allocation4], 4294967264 }
 0xdfc   :  { %3703 = vsyncpa [#allocation3], 1 }
 0xdfd   :  { %3704 = vsyncpa [#allocation6], 1 }
 0xdfe   :  { %3705 = vsyncpa [#allocation9], 1 }
 0xdff   :  { %3706 = vsyncpa [#allocation12], 1 }
 0xe00   :  { %3707 = vsyncpa [#allocation15], 1 }
 0xe01   :  { %3708 = vsyncpa [#allocation18], 1 }
 0xe02   :  { %3709 = vsyncpa [#allocation21], 1 }
 0xe03   :  { %3710 = vsyncpa [#allocation24], 1 }
 0xe04   :  { %3711 = vsyncpa [#allocation27], 1 }
 0xe05   :  { %3712 = vsyncpa [#allocation30], 1 }
 0xe06   :  { %3713 = vsyncpa [#allocation33], 1 }
 0xe07   :  { %3714 = vsyncpa [#allocation36], 1 }
 0xe08   :  { %3715 = vsyncpa [#allocation39], 1 }
 0xe09   :  { %3716 = vsyncpa [#allocation42], 1 }
 0xe0a   :  { %3717 = vsyncpa [#allocation4], 1 }

</bundles_post_ra>
